<compile_context>
chip_gen: v7x
topology: tpu7x:2x2x1
jax: 0.10.0
libtpu: 0.0.40
codegen_flags: <defaults>
</compile_context>

<pallas_src>
import jax
import jax.numpy as jnp
from jax.experimental import pallas as pl
from jax.experimental.pallas import tpu as pltpu

MODEL_DIM = 1024               # ViT-large pooler width / MultiHeadAttention model_dim
NUM_HEADS = 4
DPH = MODEL_DIM // NUM_HEADS   # 256
SEQ = 2                        # pos = concat(x_feat, y_feat) along dim=1
FC1_DIM = 512
FC2_DIM, FC2_PAD = 100, 128
FC3_DIM, FC3_PAD = 2, 128
LN_EPS = 1e-5
# Faithful to the PyTorch reference: scale = (key.size(-1) // num_heads) ** -0.5
# = (256 // 4) ** -0.5 = 0.125 (NOT the conventional dph**-0.5; exact in bf16).
ATTN_SCALE = float((DPH // NUM_HEADS) ** (-0.5))


def _fullblock(shape):
    """Whole-array block at grid step 0 (grid=(1,))."""
    return pl.BlockSpec(shape, lambda i, _n=len(shape): (0,) * _n)


# ----------------------------------------------------------------------------
# Kernel A: frozen pooler stand-in + MLP head, fused.
# ----------------------------------------------------------------------------
def _pooler_mlp_kernel(px_ref, vw_ref, vb_ref, w1_ref, b1_ref,
                       w2_ref, b2_ref, w3_ref, b3_ref,
                       feat_ref, head_ref):
    # TODO(synk): the frozen pretrained ViT-large backbone (self.model(x).pooler_output)
    # cannot be reproduced in-script; a deterministic frozen linear+tanh "pooler"
    # stand-in over flattened pixels produces the 1024-dim features.
    feats = jnp.tanh(
        jnp.dot(px_ref[...].astype(jnp.bfloat16), vw_ref[...],
                preferred_element_type=jnp.float32) + vb_ref[...])
    feat_ref[...] = feats

    # fc1 -> (dropout: identity) -> relu -> fc2 -> relu -> fc3
    # (computed for every row; the wrapper keeps the x rows / first 2 lanes).
    h = jnp.maximum(
        jnp.dot(feats.astype(jnp.bfloat16), w1_ref[...],
                preferred_element_type=jnp.float32) + b1_ref[...], 0.0)
    h = jnp.maximum(
        jnp.dot(h.astype(jnp.bfloat16), w2_ref[...],
                preferred_element_type=jnp.float32) + b2_ref[...], 0.0)
    head_ref[...] = jnp.dot(h.astype(jnp.bfloat16), w3_ref[...],
                            preferred_element_type=jnp.float32) + b3_ref[...]


def pallas_pooler_mlp(px, p):
    M, P = px.shape
    return pl.pallas_call(
        _pooler_mlp_kernel,
        grid=(1,),
        in_specs=[
            _fullblock((M, P)),
            _fullblock((P, MODEL_DIM)), _fullblock((1, MODEL_DIM)),
            _fullblock((MODEL_DIM, FC1_DIM)), _fullblock((1, FC1_DIM)),
            _fullblock((FC1_DIM, FC2_PAD)), _fullblock((1, FC2_PAD)),
            _fullblock((FC2_PAD, FC3_PAD)), _fullblock((1, FC3_PAD)),
        ],
        out_specs=(_fullblock((M, MODEL_DIM)), _fullblock((M, FC3_PAD))),
        out_shape=(jax.ShapeDtypeStruct((M, MODEL_DIM), jnp.float32),
                   jax.ShapeDtypeStruct((M, FC3_PAD), jnp.float32)),
        compiler_params=pltpu.CompilerParams(vmem_limit_bytes=32 * 1024 * 1024),
    )(px, p["vit_w"], p["vit_b"], p["w1"], p["b1"],
      p["w2p"], p["b2p"], p["w3p"], p["b3p"])


# ----------------------------------------------------------------------------
# Kernel B: MultiHeadAttention fully fused
#   (QKV projection -> .view head split -> softmax attention -> context view ->
#    linear_final -> residual -> LayerNorm), one pallas_call.
# ----------------------------------------------------------------------------
def _mha_fused_kernel(x_ref, wqkv_ref, bqkv_ref, wo_ref, bo_ref,
                      g_ref, beta_ref, o_ref):
    x = x_ref[...]                                              # [M, 1024] f32
    # Fused [K | V | Q*scale] projection (softmax scale folded in at init).
    qkv = jnp.dot(x.astype(jnp.bfloat16), wqkv_ref[...],
                  preferred_element_type=jnp.float32) + bqkv_ref[...]
    k2d = qkv[:, :MODEL_DIM]
    v2d = qkv[:, MODEL_DIM:2 * MODEL_DIM]
    q2d = qkv[:, 2 * MODEL_DIM:]

    # Faithful torch .view(batch*heads, -1, dph) head split WITHOUT transpose:
    # group g = (row, half-of-1024); its length-2 "sequence" axis ranges over
    # the two adjacent 256-wide feature chunks of the SAME row.  Attention is
    # therefore a per-row operation -> per-chunk dot products + lane reductions
    # (reshape-free).  softmax is over the key axis (dim=2 of the reference).
    ctx_chunks = []
    for half in range(2):
        base = half * 2 * DPH
        k0 = k2d[:, base:base + DPH]
        k1 = k2d[:, base + DPH:base + 2 * DPH]
        v0 = v2d[:, base:base + DPH]
        v1 = v2d[:, base + DPH:base + 2 * DPH]
        for l in range(2):
            q = q2d[:, base + l * DPH:base + (l + 1) * DPH]
            s0 = jnp.sum(q * k0, axis=-1, keepdims=True)        # [M, 1]
            s1 = jnp.sum(q * k1, axis=-1, keepdims=True)
            mx = jnp.maximum(s0, s1)
            p0 = jnp.exp(s0 - mx)
            p1 = jnp.exp(s1 - mx)
            inv = 1.0 / (p0 + p1)
            ctx_chunks.append((p0 * v0 + p1 * v1) * inv)        # [M, 256]
    ctx2d = jnp.concatenate(ctx_chunks, axis=-1)                # context.view -> [M, 1024]

    # linear_final + (dropout: identity) + residual + LayerNorm(model_dim)
    out = jnp.dot(ctx2d.astype(jnp.bfloat16), wo_ref[...],
                  preferred_element_type=jnp.float32) + bo_ref[...]
    res = x + out
    mean = jnp.mean(res, axis=-1, keepdims=True)
    var = jnp.mean((res - mean) ** 2, axis=-1, keepdims=True)
    o_ref[...] = (res - mean) * jax.lax.rsqrt(var + LN_EPS) * g_ref[...] + beta_ref[...]


def pallas_mha(feats, p):
    M = feats.shape[0]
    D = MODEL_DIM
    return pl.pallas_call(
        _mha_fused_kernel,
        grid=(1,),
        in_specs=[
            _fullblock((M, D)),
            _fullblock((D, 3 * D)), _fullblock((1, 3 * D)),
            _fullblock((D, D)), _fullblock((1, D)),
            _fullblock((1, D)), _fullblock((1, D)),
        ],
        out_specs=_fullblock((M, D)),
        out_shape=jax.ShapeDtypeStruct((M, D), jnp.float32),
        compiler_params=pltpu.CompilerParams(vmem_limit_bytes=32 * 1024 * 1024),
    )(feats, p["w_qkv"], p["b_qkv"], p["wo"], p["bo"], p["ln_g"], p["ln_b"])


# ----------------------------------------------------------------------------
# Model glue
# ----------------------------------------------------------------------------
def vit_couple_forward(params, x_img, y_img):
    """Returns exactly what VIT_Couple.forward returns: fc3(relu(fc2(relu(fc1(pool(x)))))).

    The MultiHeadAttention output (and the y-pooler feeding it) never reaches the
    returned value in the reference, so per the performance review it is elided
    here (single pallas_call).  Use vit_couple_forward_full to also run it.
    """
    B = x_img.shape[0]
    x_flat = x_img.reshape(B, -1)
    _, head = pallas_pooler_mlp(x_flat, params)
    return head[:, :FC3_DIM]


def vit_couple_forward_full(params, x_img, y_img):
    """Also computes the (output-unused) MultiHeadAttention branch, like the
    PyTorch module does.  Returns (pos, pos_mha); pos is identical to
    vit_couple_forward's output."""
    B = x_img.shape[0]
    xy = jnp.concatenate([x_img.reshape(B, -1), y_img.reshape(B, -1)], axis=0)  # [2B, P]
    feats, head = pallas_pooler_mlp(xy, params)       # feats rows: [x0..xB-1, y0..yB-1]
    # MHA is a per-row map (the .view head split never mixes rows), so it runs
    # directly on `feats`; rows are re-interleaved afterwards to the reference's
    # [B, 2(seq = x,y), 1024] layout of `pos` after attention.
    mha = pallas_mha(feats, params)                   # [2B, 1024]
    pos_mha = jnp.stack([mha[:B], mha[B:]], axis=1)   # [B, 2, 1024]
    return head[:B, :FC3_DIM], pos_mha


def init_params(key, pixel_dim):
    def linear(k, fan_in, fan_out):
        kw, kb = jax.random.split(k)
        bound = 1.0 / float(fan_in) ** 0.5
        w = jax.random.uniform(kw, (fan_in, fan_out), jnp.float32, -bound, bound)
        b = jax.random.uniform(kb, (1, fan_out), jnp.float32, -bound, bound)
        return w, b

    keys = jax.random.split(key, 9)
    p = {}
    # Frozen ViT "pooler" stand-in: bf16 weight, f32 bias.
    vw, vb = linear(keys[0], pixel_dim, MODEL_DIM)
    p["vit_w"], p["vit_b"] = vw.astype(jnp.bfloat16), vb

    # MultiHeadAttention: concatenated [K | V | Q] projection; softmax scale
    # (0.125, a power of two -> exact) folded into the Q weights/bias.
    wk, bk = linear(keys[1], MODEL_DIM, MODEL_DIM)
    wv, bv = linear(keys[2], MODEL_DIM, MODEL_DIM)
    wq, bq = linear(keys[3], MODEL_DIM, MODEL_DIM)
    p["w_qkv"] = jnp.concatenate([wk, wv, wq * ATTN_SCALE], axis=1).astype(jnp.bfloat16)
    p["b_qkv"] = jnp.concatenate([bk, bv, bq * ATTN_SCALE], axis=1)
    wo, bo = linear(keys[4], MODEL_DIM, MODEL_DIM)
    p["wo"], p["bo"] = wo.astype(jnp.bfloat16), bo
    p["ln_g"] = jnp.ones((1, MODEL_DIM), jnp.float32)
    p["ln_b"] = jnp.zeros((1, MODEL_DIM), jnp.float32)

    # MLP head: fc1(1024->512), fc2(512->100), fc3(100->2).
    # fc2/fc3 zero-padded to 128 lanes (lane-dense matmuls/stores); padded bias
    # columns are 0 so the padded lanes stay exactly 0 through relu/fc3, and the
    # wrapper slices the first 2 output columns.
    w1, b1 = linear(keys[5], MODEL_DIM, FC1_DIM)
    w2, b2 = linear(keys[6], FC1_DIM, FC2_DIM)
    w3, b3 = linear(keys[7], FC2_DIM, FC3_DIM)
    p["w1"], p["b1"] = w1.astype(jnp.bfloat16), b1
    p["w2p"] = (jnp.zeros((FC1_DIM, FC2_PAD), jnp.float32)
                .at[:, :FC2_DIM].set(w2).astype(jnp.bfloat16))
    p["b2p"] = jnp.zeros((1, FC2_PAD), jnp.float32).at[:, :FC2_DIM].set(b2)
    p["w3p"] = (jnp.zeros((FC2_PAD, FC3_PAD), jnp.float32)
                .at[:FC2_DIM, :FC3_DIM].set(w3).astype(jnp.bfloat16))
    p["b3p"] = jnp.zeros((1, FC3_PAD), jnp.float32).at[:, :FC3_DIM].set(b3)
    # TODO(synk): SparseMoE is constructed in __init__ but never used in forward.
    return p


if __name__ == "__main__":
    B, C, H, W = 2, 3, 16, 16
    key = jax.random.PRNGKey(0)
    pkey, xkey, ykey = jax.random.split(key, 3)
    params = init_params(pkey, C * H * W)

    x = jax.random.normal(xkey, (B, 1, C, H, W), jnp.float32)
    y = jax.random.normal(ykey, (B, 1, C, H, W), jnp.float32)

    fwd = jax.jit(vit_couple_forward)
    fwd_full = jax.jit(vit_couple_forward_full)

    out = fwd(params, x, y)                       # optimized path: 1 pallas_call
    out_full, pos_mha = fwd_full(params, x, y)    # full path: exercises fused MHA kernel
    jax.block_until_ready(out)
    jax.block_until_ready(out_full)
    jax.block_until_ready(pos_mha)

    assert out.shape == (B, FC3_DIM)
    assert out_full.shape == (B, FC3_DIM)
    assert pos_mha.shape == (B, SEQ, MODEL_DIM)
    assert bool(jnp.allclose(out, out_full, atol=1e-4, rtol=1e-4)), "lean/full output mismatch"
    print("KERNEL_OK")
</pallas_src>

<mosaic_0001>
module attributes {stable_mosaic.version = 11 : i64} {
  func.func @_pooler_mlp_kernel(%arg0: i32, %arg1: memref<2x768xf32, #tpu.memory_space<vmem>>, %arg2: memref<768x1024xbf16, #tpu.memory_space<vmem>>, %arg3: memref<1x1024xf32, #tpu.memory_space<vmem>>, %arg4: memref<1024x512xbf16, #tpu.memory_space<vmem>>, %arg5: memref<1x512xf32, #tpu.memory_space<vmem>>, %arg6: memref<512x128xbf16, #tpu.memory_space<vmem>>, %arg7: memref<1x128xf32, #tpu.memory_space<vmem>>, %arg8: memref<128x128xbf16, #tpu.memory_space<vmem>>, %arg9: memref<1x128xf32, #tpu.memory_space<vmem>>, %arg10: memref<2x1024xf32, #tpu.memory_space<vmem>>, %arg11: memref<2x128xf32, #tpu.memory_space<vmem>>) attributes {dimension_semantics = [#tpu.dimension_semantics<arbitrary>], iteration_bounds = array<i64: 1>, scalar_prefetch = 0 : i64, scratch_operands = 0 : i64, tpu.core_type = #tpu.core_type<tc>, window_params = [{pipeline_mode = #tpu.pipeline_mode<synchronous>, transform_indices = @transform_0, window_bounds = array<i64: 2, 768>}, {pipeline_mode = #tpu.pipeline_mode<synchronous>, transform_indices = @transform_1, window_bounds = array<i64: 768, 1024>}, {pipeline_mode = #tpu.pipeline_mode<synchronous>, transform_indices = @transform_2, window_bounds = array<i64: 1, 1024>}, {pipeline_mode = #tpu.pipeline_mode<synchronous>, transform_indices = @transform_3, window_bounds = array<i64: 1024, 512>}, {pipeline_mode = #tpu.pipeline_mode<synchronous>, transform_indices = @transform_4, window_bounds = array<i64: 1, 512>}, {pipeline_mode = #tpu.pipeline_mode<synchronous>, transform_indices = @transform_5, window_bounds = array<i64: 512, 128>}, {pipeline_mode = #tpu.pipeline_mode<synchronous>, transform_indices = @transform_6, window_bounds = array<i64: 1, 128>}, {pipeline_mode = #tpu.pipeline_mode<synchronous>, transform_indices = @transform_7, window_bounds = array<i64: 128, 128>}, {pipeline_mode = #tpu.pipeline_mode<synchronous>, transform_indices = @transform_8, window_bounds = array<i64: 1, 128>}, {pipeline_mode = #tpu.pipeline_mode<synchronous>, transform_indices = @transform_9, window_bounds = array<i64: 2, 1024>}, {pipeline_mode = #tpu.pipeline_mode<synchronous>, transform_indices = @transform_10, window_bounds = array<i64: 2, 128>}]} {
    %c0 = arith.constant 0 : index
    %c0_0 = arith.constant 0 : index
    %0 = vector.load %arg1[%c0, %c0_0] : memref<2x768xf32, #tpu.memory_space<vmem>>, vector<2x768xf32>
    %1 = arith.truncf %0 : vector<2x768xf32> to vector<2x768xbf16>
    %c0_1 = arith.constant 0 : index
    %c0_2 = arith.constant 0 : index
    %2 = vector.load %arg2[%c0_1, %c0_2] : memref<768x1024xbf16, #tpu.memory_space<vmem>>, vector<768x1024xbf16>
    %cst = arith.constant dense<0.000000e+00> : vector<2x1024xf32>
    %3 = tpu.matmul %1, %2, %cst {dimension_numbers = #tpu.dot_dimension_numbers<[1], [0], [0], [1], [0, 0, 1, 1], [], []>} : vector<2x768xbf16>, vector<768x1024xbf16>, vector<2x1024xf32> -> vector<2x1024xf32>
    %c0_3 = arith.constant 0 : index
    %c0_4 = arith.constant 0 : index
    %4 = vector.load %arg3[%c0_3, %c0_4] : memref<1x1024xf32, #tpu.memory_space<vmem>>, vector<1x1024xf32>
    %5 = vector.broadcast %4 : vector<1x1024xf32> to vector<2x1024xf32>
    %6 = arith.addf %3, %5 : vector<2x1024xf32>
    %7 = math.tanh %6 : vector<2x1024xf32>
    %c0_5 = arith.constant 0 : index
    %c0_6 = arith.constant 0 : index
    %8 = vector.load %arg10[%c0_5, %c0_6] : memref<2x1024xf32, #tpu.memory_space<vmem>>, vector<2x1024xf32>
    tpu.vector_store %arg10[%c0_5, %c0_6], %7 {strides = array<i32>} : memref<2x1024xf32, #tpu.memory_space<vmem>>, vector<2x1024xf32>,
    %9 = arith.truncf %7 : vector<2x1024xf32> to vector<2x1024xbf16>
    %c0_7 = arith.constant 0 : index
    %c0_8 = arith.constant 0 : index
    %10 = vector.load %arg4[%c0_7, %c0_8] : memref<1024x512xbf16, #tpu.memory_space<vmem>>, vector<1024x512xbf16>
    %cst_9 = arith.constant dense<0.000000e+00> : vector<2x512xf32>
    %11 = tpu.matmul %9, %10, %cst_9 {dimension_numbers = #tpu.dot_dimension_numbers<[1], [0], [0], [1], [0, 0, 1, 1], [], []>} : vector<2x1024xbf16>, vector<1024x512xbf16>, vector<2x512xf32> -> vector<2x512xf32>
    %c0_10 = arith.constant 0 : index
    %c0_11 = arith.constant 0 : index
    %12 = vector.load %arg5[%c0_10, %c0_11] : memref<1x512xf32, #tpu.memory_space<vmem>>, vector<1x512xf32>
    %13 = vector.broadcast %12 : vector<1x512xf32> to vector<2x512xf32>
    %14 = arith.addf %11, %13 : vector<2x512xf32>
    %cst_12 = arith.constant 0.000000e+00 : f32
    %15 = vector.broadcast %cst_12 : f32 to vector<2x512xf32>
    %16 = arith.maximumf %14, %15 : vector<2x512xf32>
    %17 = arith.truncf %16 : vector<2x512xf32> to vector<2x512xbf16>
    %c0_13 = arith.constant 0 : index
    %c0_14 = arith.constant 0 : index
    %18 = vector.load %arg6[%c0_13, %c0_14] : memref<512x128xbf16, #tpu.memory_space<vmem>>, vector<512x128xbf16>
    %cst_15 = arith.constant dense<0.000000e+00> : vector<2x128xf32>
    %19 = tpu.matmul %17, %18, %cst_15 {dimension_numbers = #tpu.dot_dimension_numbers<[1], [0], [0], [1], [0, 0, 1, 1], [], []>} : vector<2x512xbf16>, vector<512x128xbf16>, vector<2x128xf32> -> vector<2x128xf32>
    %c0_16 = arith.constant 0 : index
    %c0_17 = arith.constant 0 : index
    %20 = vector.load %arg7[%c0_16, %c0_17] : memref<1x128xf32, #tpu.memory_space<vmem>>, vector<1x128xf32>
    %21 = vector.broadcast %20 : vector<1x128xf32> to vector<2x128xf32>
    %22 = arith.addf %19, %21 : vector<2x128xf32>
    %cst_18 = arith.constant 0.000000e+00 : f32
    %23 = vector.broadcast %cst_18 : f32 to vector<2x128xf32>
    %24 = arith.maximumf %22, %23 : vector<2x128xf32>
    %25 = arith.truncf %24 : vector<2x128xf32> to vector<2x128xbf16>
    %c0_19 = arith.constant 0 : index
    %c0_20 = arith.constant 0 : index
    %26 = vector.load %arg8[%c0_19, %c0_20] : memref<128x128xbf16, #tpu.memory_space<vmem>>, vector<128x128xbf16>
    %cst_21 = arith.constant dense<0.000000e+00> : vector<2x128xf32>
    %27 = tpu.matmul %25, %26, %cst_21 {dimension_numbers = #tpu.dot_dimension_numbers<[1], [0], [0], [1], [0, 0, 1, 1], [], []>} : vector<2x128xbf16>, vector<128x128xbf16>, vector<2x128xf32> -> vector<2x128xf32>
    %c0_22 = arith.constant 0 : index
    %c0_23 = arith.constant 0 : index
    %28 = vector.load %arg9[%c0_22, %c0_23] : memref<1x128xf32, #tpu.memory_space<vmem>>, vector<1x128xf32>
    %29 = vector.broadcast %28 : vector<1x128xf32> to vector<2x128xf32>
    %30 = arith.addf %27, %29 : vector<2x128xf32>
    %c0_24 = arith.constant 0 : index
    %c0_25 = arith.constant 0 : index
    %31 = vector.load %arg11[%c0_24, %c0_25] : memref<2x128xf32, #tpu.memory_space<vmem>>, vector<2x128xf32>
    tpu.vector_store %arg11[%c0_24, %c0_25], %30 {strides = array<i32>} : memref<2x128xf32, #tpu.memory_space<vmem>>, vector<2x128xf32>,
    return
  }
  func.func @transform_0(%arg0: i32) -> (i32, i32) {
    %c0_i32 = arith.constant 0 : i32
    %c0_i32_0 = arith.constant 0 : i32
    %c0_i32_1 = arith.constant 0 : i32
    return %c0_i32, %c0_i32_0 : i32, i32
  }
  func.func @transform_1(%arg0: i32) -> (i32, i32) {
    %c0_i32 = arith.constant 0 : i32
    %c0_i32_0 = arith.constant 0 : i32
    %c0_i32_1 = arith.constant 0 : i32
    return %c0_i32, %c0_i32_0 : i32, i32
  }
  func.func @transform_2(%arg0: i32) -> (i32, i32) {
    %c0_i32 = arith.constant 0 : i32
    %c0_i32_0 = arith.constant 0 : i32
    %c0_i32_1 = arith.constant 0 : i32
    return %c0_i32, %c0_i32_0 : i32, i32
  }
  func.func @transform_3(%arg0: i32) -> (i32, i32) {
    %c0_i32 = arith.constant 0 : i32
    %c0_i32_0 = arith.constant 0 : i32
    %c0_i32_1 = arith.constant 0 : i32
    return %c0_i32, %c0_i32_0 : i32, i32
  }
  func.func @transform_4(%arg0: i32) -> (i32, i32) {
    %c0_i32 = arith.constant 0 : i32
    %c0_i32_0 = arith.constant 0 : i32
    %c0_i32_1 = arith.constant 0 : i32
    return %c0_i32, %c0_i32_0 : i32, i32
  }
  func.func @transform_5(%arg0: i32) -> (i32, i32) {
    %c0_i32 = arith.constant 0 : i32
    %c0_i32_0 = arith.constant 0 : i32
    %c0_i32_1 = arith.constant 0 : i32
    return %c0_i32, %c0_i32_0 : i32, i32
  }
  func.func @transform_6(%arg0: i32) -> (i32, i32) {
    %c0_i32 = arith.constant 0 : i32
    %c0_i32_0 = arith.constant 0 : i32
    %c0_i32_1 = arith.constant 0 : i32
    return %c0_i32, %c0_i32_0 : i32, i32
  }
  func.func @transform_7(%arg0: i32) -> (i32, i32) {
    %c0_i32 = arith.constant 0 : i32
    %c0_i32_0 = arith.constant 0 : i32
    %c0_i32_1 = arith.constant 0 : i32
    return %c0_i32, %c0_i32_0 : i32, i32
  }
  func.func @transform_8(%arg0: i32) -> (i32, i32) {
    %c0_i32 = arith.constant 0 : i32
    %c0_i32_0 = arith.constant 0 : i32
    %c0_i32_1 = arith.constant 0 : i32
    return %c0_i32, %c0_i32_0 : i32, i32
  }
  func.func @transform_9(%arg0: i32) -> (i32, i32) {
    %c0_i32 = arith.constant 0 : i32
    %c0_i32_0 = arith.constant 0 : i32
    %c0_i32_1 = arith.constant 0 : i32
    return %c0_i32, %c0_i32_0 : i32, i32
  }
  func.func @transform_10(%arg0: i32) -> (i32, i32) {
    %c0_i32 = arith.constant 0 : i32
    %c0_i32_0 = arith.constant 0 : i32
    %c0_i32_1 = arith.constant 0 : i32
    return %c0_i32, %c0_i32_0 : i32, i32
  }
}

</mosaic_0001>

<bundles_post_ra>
// kernel: vit_couple_forward.1
= control target key start
LH: loop header
LB: loop body
LE: loop exit
PB: predicated region body
PF: predicated region fallthrough
CT: control target
= control target key end

     0   :  { %16 = vsyncpa [#allocation3], 0  ;;  %s7312_s0 = inlined_call_operand.vmem [shape: f32[2,768], index: 0, kind: input, shape index: {}]   ;;  %s7313_s1 = inlined_call_operand.hbm [shape: bf16[768,1024], index: 1, kind: input, shape index: {}]   ;;  %s7314_s2 = inlined_call_operand.hbm [shape: f32[1,1024], index: 2, kind: input, shape index: {}]   ;;  %s7315_s3 = inlined_call_operand.hbm [shape: bf16[1024,512], index: 3, kind: input, shape index: {}]   ;;  %s7316_s4 = inlined_call_operand.hbm [shape: f32[1,512], index: 4, kind: input, shape index: {}]   ;;  %s7317_s5 = inlined_call_operand.hbm [shape: bf16[512,128], index: 5, kind: input, shape index: {}]   ;;  %s7318_s6 = inlined_call_operand.hbm [shape: f32[1,128], index: 6, kind: input, shape index: {}]   ;;  %s7319_s7 = inlined_call_operand.hbm [shape: bf16[128,128], index: 7, kind: input, shape index: {}]   ;;  %s7320_s8 = inlined_call_operand.hbm [shape: f32[1,128], index: 8, kind: input, shape index: {}]   ;;  %s7321_s9 = inlined_call_operand.hbm [shape: f32[2,1024], index: 9, kind: output, shape index: {0}]   ;;  %s7322_s10 = inlined_call_operand.hbm [shape: f32[2,128], index: 10, kind: output, shape index: {1}]  }
   0x1   :  { %17 = vsyncpa [#allocation6], 0 }
   0x2   :  { %18 = vsyncpa [#allocation9], 0 }
   0x3   :  { %19 = vsyncpa [#allocation12], 0 }
   0x4   :  { %20 = vsyncpa [#allocation15], 0 }
   0x5   :  { %21 = vsyncpa [#allocation4], 0 }
   0x6   :  { %22 = vsyncpa [#allocation18], 0  ;;  %s6981_s13 = smov [#allocation5]   ;;  %s6982_s15 = smov [#allocation8]  }
   0x7   :  { %s43_s14 = sshll.u32 %s6981_s13, 4  ;;  %s65_s16 = sshll.u32 %s6982_s15, 4  ;;  %s44_s14 = int_to_ptr.vmem [resolvable:$true] %s43_s14  ;;  %s66_s16 = int_to_ptr.vmem [resolvable:$true] %s65_s16 }
   0x8   :  { %s6747_s19 = scalar_lea.hbm %s7314_s2, 128 }
   0x9   :  { %p6748_p0 = scmp.ne.s32.totalorder %s7314_s2, %s6747_s19  ;;  %p6751_p1 = scmp.lt.u32.totalorder %s6747_s19, %s7314_s2 }
   0xb   :  { %p6753_p2 = pnand %p6751_p1, %p6748_p0 }
   0xd   :  { %6756 = shalt.err (!%p6753_p2)
}
   0xe   :  { %s6757_s24 = scalar_lea.vmem %s44_s14, 128  ;;  %p6762_p4 = scmp.lt.s32.totalorder %s44_s14, %s44_s14 }
   0xf   :  { %p6758_p3 = scmp.ne.s32.totalorder %s44_s14, %s6757_s24  ;;  %p6763_p5 = scmp.lt.s32.totalorder %s6757_s24, %s6757_s24 }
  0x11   :  { %p6764_p6 = por %p6763_p5, %p6762_p4 }
  0x13   :  { %p6765_p7 = pnand %p6764_p6, %p6758_p3 }
  0x15   :  { %6768 = shalt.err (!%p6765_p7)
}
  0x16   :  { %46 = dma.hbm_to_vmem [thread:$0]  %s7314_s2, 128, %s44_s14, [#allocation6]  }
  0x17   :  { %s6769_s29 = scalar_lea.hbm %s7316_s4, 64 }
  0x18   :  { %p6770_p8 = scmp.ne.s32.totalorder %s7316_s4, %s6769_s29  ;;  %p6773_p9 = scmp.lt.u32.totalorder %s6769_s29, %s7316_s4 }
  0x1a   :  { %p6775_p10 = pnand %p6773_p9, %p6770_p8 }
  0x1c   :  { %6778 = shalt.err (!%p6775_p10)
}
  0x1d   :  { %s6779_s15 = scalar_lea.vmem %s66_s16, 64  ;;  %p6784_p12 = scmp.lt.s32.totalorder %s66_s16, %s66_s16 }
  0x1e   :  { %p6780_p11 = scmp.ne.s32.totalorder %s66_s16, %s6779_s15  ;;  %p6785_p13 = scmp.lt.s32.totalorder %s6779_s15, %s6779_s15 }
  0x20   :  { %p6786_p0 = por %p6785_p13, %p6784_p12 }
  0x22   :  { %p6787_p1 = pnand %p6786_p0, %p6780_p11 }
  0x24   :  { %6790 = shalt.err (!%p6787_p1)
}
  0x25   :  { %68 = dma.hbm_to_vmem [thread:$0]  %s7316_s4, 64, %s66_s16, [#allocation9]  }
  0x26   :  { %s6983_s17 = smov [#allocation11]   ;;  %s6984_s19 = smov [#allocation2]  }
  0x27   :  { %s87_s18 = sshll.u32 %s6983_s17, 4  ;;  %s30_s20 = sshll.u32 %s6984_s19, 4  ;;  %s88_s18 = int_to_ptr.vmem [resolvable:$true] %s87_s18  ;;  %s7079_s20 = int_to_ptr.vmem [resolvable:$true] %s30_s20 }
  0x28   :  { %s6791_s23 = scalar_lea.hbm %s7318_s6, 16 }
  0x29   :  { %p6792_p2 = scmp.ne.s32.totalorder %s7318_s6, %s6791_s23  ;;  %p6795_p3 = scmp.lt.u32.totalorder %s6791_s23, %s7318_s6 }
  0x2b   :  { %p6797_p4 = pnand %p6795_p3, %p6792_p2 }
  0x2d   :  { %6800 = shalt.err (!%p6797_p4)
}
  0x2e   :  { %s6801_s4 = scalar_lea.vmem %s88_s18, 16  ;;  %s6805_s16 = scalar_lea.vmem %s88_s18, 32 }
  0x2f   :  { %p6802_p5 = scmp.ne.s32.totalorder %s88_s18, %s6801_s4  ;;  %p6806_p6 = scmp.lt.s32.totalorder %s88_s18, %s88_s18 }
  0x30   :  { %p6807_p7 = scmp.lt.s32.totalorder %s6805_s16, %s6801_s4 }
  0x32   :  { %p6808_p8 = por %p6807_p7, %p6806_p6 }
  0x34   :  { %p6809_p9 = pnand %p6808_p8, %p6802_p5 }
  0x36   :  { %6812 = shalt.err (!%p6809_p9)
}
  0x37   :  { %90 = dma.hbm_to_vmem [thread:$0]  %s7318_s6, 16, %s88_s18, [#allocation12]  }
  0x38   :  { %s6813_s12 = scalar_lea.hbm %s7313_s1, 49152 }
  0x39   :  { %p6814_p10 = scmp.ne.s32.totalorder %s7313_s1, %s6813_s12  ;;  %p6817_p11 = scmp.lt.u32.totalorder %s6813_s12, %s7313_s1 }
  0x3b   :  { %p6819_p12 = pnand %p6817_p11, %p6814_p10 }
  0x3d   :  { %6822 = shalt.err (!%p6819_p12)
}
  0x3e   :  { %s6823_s17 = scalar_lea.vmem %s7079_s20, 49152  ;;  %p6828_p0 = scmp.lt.s32.totalorder %s7079_s20, %s7079_s20 }
  0x3f   :  { %p6824_p13 = scmp.ne.s32.totalorder %s7079_s20, %s6823_s17  ;;  %p6829_p1 = scmp.lt.s32.totalorder %s6823_s17, %s6823_s17 }
  0x41   :  { %p6830_p2 = por %p6829_p1, %p6828_p0 }
  0x43   :  { %p6831_p3 = pnand %p6830_p2, %p6824_p13 }
  0x45   :  { %6834 = shalt.err (!%p6831_p3)
}
  0x46   :  { %s6985_s6 = smov 512   ;;  %s6986_s18 = smov 32  }
  0x47   :  { %36 = dma.hbm_to_vmem [thread:$0]  %s7313_s1, 49152, %s7079_s20, [#allocation3], %s6985_s6, %s6985_s6, %s6986_s18  }
  0x48   :  { %s6987_s22 = smov [#allocation7]   ;;  %s6835_s26 = scalar_lea.hbm %s7315_s3, 32768 }
  0x49   :  { %s52_s23 = sshll.u32 %s6987_s22, 4  ;;  %p6836_p4 = scmp.ne.s32.totalorder %s7315_s3, %s6835_s26  ;;  %s53_s23 = int_to_ptr.vmem [resolvable:$true] %s52_s23 }
  0x4a   :  { %p6839_p5 = scmp.lt.u32.totalorder %s6835_s26, %s7315_s3 }
  0x4c   :  { %p6841_p6 = pnand %p6839_p5, %p6836_p4 }
  0x4e   :  { %6844 = shalt.err (!%p6841_p6)
}
  0x4f   :  { %s6845_s29 = scalar_lea.vmem %s53_s23, 32768  ;;  %p6850_p8 = scmp.lt.s32.totalorder %s53_s23, %s53_s23 }
  0x50   :  { %p6846_p7 = scmp.ne.s32.totalorder %s53_s23, %s6845_s29  ;;  %p6851_p9 = scmp.lt.s32.totalorder %s6845_s29, %s6845_s29 }
  0x52   :  { %p6852_p10 = por %p6851_p9, %p6850_p8 }
  0x54   :  { %p6853_p11 = pnand %p6852_p10, %p6846_p7 }
  0x56   :  { %6856 = shalt.err (!%p6853_p11)
}
  0x57   :  { %s6988_s1 = smov 256   ;;  %s6989_s20 = smov 16  }
  0x58   :  { %58 = dma.hbm_to_vmem [thread:$0]  %s7315_s3, 32768, %s53_s23, [#allocation6], %s6988_s1, %s6988_s1, %s6989_s20  }
  0x59   :  { %s6990_s12 = smov [#allocation10]   ;;  %s6857_s14 = scalar_lea.hbm %s7317_s5, 4096 }
  0x5a   :  { %s74_s13 = sshll.u32 %s6990_s12, 4  ;;  %p6858_p12 = scmp.ne.s32.totalorder %s7317_s5, %s6857_s14  ;;  %s75_s13 = int_to_ptr.vmem [resolvable:$true] %s74_s13 }
  0x5b   :  { %p6861_p13 = scmp.lt.u32.totalorder %s6857_s14, %s7317_s5 }
  0x5d   :  { %p6863_p0 = pnand %p6861_p13, %p6858_p12 }
  0x5f   :  { %6866 = shalt.err (!%p6863_p0)
}
  0x60   :  { %s6867_s21 = scalar_lea.vmem %s75_s13, 4096  ;;  %p6872_p2 = scmp.lt.s32.totalorder %s75_s13, %s75_s13 }
  0x61   :  { %p6868_p1 = scmp.ne.s32.totalorder %s75_s13, %s6867_s21  ;;  %p6873_p3 = scmp.lt.s32.totalorder %s6867_s21, %s6867_s21 }
  0x63   :  { %p6874_p4 = por %p6873_p3, %p6872_p2 }
  0x65   :  { %p6875_p5 = pnand %p6874_p4, %p6868_p1 }
  0x67   :  { %6878 = shalt.err (!%p6875_p5)
}
  0x68   :  { %s6991_s3 = smov 64   ;;  %s6992_s22 = smov 4  }
  0x69   :  { %80 = dma.hbm_to_vmem [thread:$0]  %s7317_s5, 4096, %s75_s13, [#allocation9], %s6991_s3, %s6991_s3, %s6992_s22  }
  0x6a   :  { %s6993_s25 = smov [#allocation13]   ;;  %s6994_s27 = smov [#allocation14]  }
  0x6b   :  { %s96_s26 = sshll.u32 %s6993_s25, 4  ;;  %s109_s4 = sshll.u32 %s6994_s27, 4  ;;  %s97_s26 = int_to_ptr.vmem [resolvable:$true] %s96_s26  ;;  %s110_s4 = int_to_ptr.vmem [resolvable:$true] %s109_s4 }
  0x6c   :  { %s6879_s29 = scalar_lea.hbm %s7319_s7, 1024 }
  0x6d   :  { %p6880_p6 = scmp.ne.s32.totalorder %s7319_s7, %s6879_s29  ;;  %p6883_p7 = scmp.lt.u32.totalorder %s6879_s29, %s7319_s7 }
  0x6f   :  { %p6885_p8 = pnand %p6883_p7, %p6880_p6 }
  0x71   :  { %6888 = shalt.err (!%p6885_p8)
}
  0x72   :  { %s6889_s5 = scalar_lea.vmem %s97_s26, 1024  ;;  %p6894_p10 = scmp.lt.s32.totalorder %s97_s26, %s97_s26 }
  0x73   :  { %p6890_p9 = scmp.ne.s32.totalorder %s97_s26, %s6889_s5  ;;  %p6895_p11 = scmp.lt.s32.totalorder %s6889_s5, %s6889_s5 }
  0x75   :  { %p6896_p12 = por %p6895_p11, %p6894_p10 }
  0x77   :  { %p6897_p13 = pnand %p6896_p12, %p6890_p9 }
  0x79   :  { %6900 = shalt.err (!%p6897_p13)
}
  0x7a   :  { %102 = dma.hbm_to_vmem [thread:$0]  %s7319_s7, 1024, %s97_s26, [#allocation12], %s6991_s3, %s6991_s3, %s6992_s22  }
  0x7b   :  { %s6901_s14 = scalar_lea.hbm %s7320_s8, 16 }
  0x7c   :  { %p6902_p0 = scmp.ne.s32.totalorder %s7320_s8, %s6901_s14  ;;  %p6905_p1 = scmp.lt.u32.totalorder %s6901_s14, %s7320_s8 }
  0x7e   :  { %p6907_p2 = pnand %p6905_p1, %p6902_p0 }
  0x80   :  { %6910 = shalt.err (!%p6907_p2)
}
  0x81   :  { %s6911_s21 = scalar_lea.vmem %s110_s4, 16  ;;  %s6915_s23 = scalar_lea.vmem %s110_s4, 32 }
  0x82   :  { %p6912_p3 = scmp.ne.s32.totalorder %s110_s4, %s6911_s21  ;;  %p6916_p4 = scmp.lt.s32.totalorder %s110_s4, %s110_s4 }
  0x83   :  { %p6917_p5 = scmp.lt.s32.totalorder %s6915_s23, %s6911_s21 }
  0x85   :  { %p6918_p6 = por %p6917_p5, %p6916_p4 }
  0x87   :  { %p6919_p7 = pnand %p6918_p6, %p6912_p3 }
  0x89   :  { %6922 = shalt.err (!%p6919_p7)
}
  0x8a   :  { %112 = dma.hbm_to_vmem [thread:$0]  %s7320_s8, 16, %s110_s4, [#allocation15]  }
  0x8b   :  { %6967 = dma.done.wait [#allocation3], 49152  }
  0x8c   :  { %6968 = vsyncadd [#allocation3], 4294918144 }
  0x8d   :  { %6969 = dma.done.wait [#allocation6], 32896  }
  0x8e   :  { %6970 = vsyncadd [#allocation6], 4294934400 }
  0x8f   :  { %6971 = dma.done.wait [#allocation9], 4160  }
  0x90   :  { %6972 = vsyncadd [#allocation9], 4294963136 }
  0x91   :  { %6973 = dma.done.wait [#allocation12], 1040  }
  0x92   :  { %6974 = vsyncadd [#allocation12], 4294966256 }
  0x93   :  { %6975 = dma.done.wait [#allocation15], 16  }
  0x94   :  { %6976 = vsyncadd [#allocation15], 4294967280  ;;  %v179_v0 = vld [vmem:[#allocation2] sm:$0xff]  ;;  %v180_v2 = vld [vmem:[#allocation2 + $0x8] sm:$0xff]  ;;  %v6995_v32 = vmov 1983009808   ;;  %v146_v34 = vlaneseq }
  0x95   :  { %v183_v1 = vld [vmem:[#allocation2 + $0x20] sm:$0xff]  ;;  %v184_v4 = vld [vmem:[#allocation2 + $0x28] sm:$0xff]  ;;  %v144_v33 = vunpack.c.l.s4 %v6995_v32  ;;  %vm6997_vm0 = vmmov 0  }
  0x96   :  { %v5465_v3 = vcombine.high %v179_v0, %v183_v1  ;;  %v5464_v5 = vcombine.low %v179_v0, %v183_v1  ;;  %v187_v6 = vld [vmem:[#allocation2 + $0x40] sm:$0xff]  ;;  %v5467_v8 = vcombine.high %v180_v2, %v184_v4  ;;  %v5466_v9 = vcombine.low %v180_v2, %v184_v4  ;;  %v188_v11 = vld [vmem:[#allocation2 + $0x48] sm:$0xff] }
  0x97   :  { %v191_v7 = vld [vmem:[#allocation2 + $0x60] sm:$0xff]  ;;  %v192_v12 = vld [vmem:[#allocation2 + $0x68] sm:$0xff]  ;;  %v145_v43 = vunpack.c.0.s8 %v144_v33  ;;  %v7158_v44 = vshrl.u32 %v146_v34, 7 }
  0x98   :  { %v5473_v10 = vcombine.high %v187_v6, %v191_v7  ;;  %v195_v13 = vld [vmem:[#allocation2 + $0x80] sm:$0xff]  ;;  %2525 = vmatprep.subr.bf16.mxu0 %v5465_v3  ;;  %v5475_v14 = vcombine.high %v188_v11, %v192_v12  ;;  %v196_v16 = vld [vmem:[#allocation2 + $0x88] sm:$0xff]  ;;  %2648 = vmatprep.subr.bf16.mxu1 %v5467_v8  ;;  %v5472_v18 = vcombine.low %v187_v6, %v191_v7 }
  0x99   :  { %v199_v15 = vld [vmem:[#allocation2 + $0xa0] sm:$0xff]  ;;  %v200_v17 = vld [vmem:[#allocation2 + $0xa8] sm:$0xff]  ;;  %2526 = vmatpush1.bf16.msra.mxu0 %v5464_v5  ;;  %2649 = vmatpush1.bf16.msra.mxu1 %v5466_v9  ;;  %v5474_v19 = vcombine.low %v188_v11, %v192_v12  ;;  %v7161_v53 = vsub.s32 %v145_v43, %v7158_v44 }
  0x9a   :  { %2527 = vmatprep.subr.bf16.mxu0 %v5473_v10  ;;  %v5481_v20 = vcombine.high %v195_v13, %v199_v15  ;;  %2650 = vmatprep.subr.bf16.mxu1 %v5475_v14  ;;  %v5483_v21 = vcombine.high %v196_v16, %v200_v17  ;;  %v203_v22 = vld [vmem:[#allocation2 + $0xc0] sm:$0xff]  ;;  %v204_v24 = vld [vmem:[#allocation2 + $0xc8] sm:$0xff]  ;;  %v5480_v26 = vcombine.low %v195_v13, %v199_v15 }
  0x9b   :  { %v207_v23 = vld [vmem:[#allocation2 + $0xe0] sm:$0xff]  ;;  %v208_v25 = vld [vmem:[#allocation2 + $0xe8] sm:$0xff]  ;;  %v5482_v27 = vcombine.low %v196_v16, %v200_v17 }
  0x9c   :  { %v5489_v28 = vcombine.high %v203_v22, %v207_v23  ;;  %v5491_v29 = vcombine.high %v204_v24, %v208_v25  ;;  %v211_v30 = vld [vmem:[#allocation2 + $0x100] sm:$0xff]  ;;  %v212_v35 = vld [vmem:[#allocation2 + $0x108] sm:$0xff]  ;;  %v5488_v37 = vcombine.low %v203_v22, %v207_v23  ;;  %v5490_v38 = vcombine.low %v204_v24, %v208_v25 }
  0x9d   :  { %2528 = vmatpush1.bf16.msra.mxu0 %v5472_v18  ;;  %2651 = vmatpush1.bf16.msra.mxu1 %v5474_v19  ;;  %v215_v31 = vld [vmem:[#allocation2 + $0x120] sm:$0xff]  ;;  %v216_v36 = vld [vmem:[#allocation2 + $0x128] sm:$0xff] }
  0x9e   :  { %2529 = vmatprep.subr.bf16.mxu0 %v5481_v20  ;;  %2652 = vmatprep.subr.bf16.mxu1 %v5483_v21  ;;  %v5497_v39 = vcombine.high %v211_v30, %v215_v31  ;;  %v5499_v40 = vcombine.high %v212_v35, %v216_v36  ;;  %v219_v41 = vld [vmem:[#allocation2 + $0x140] sm:$0xff]  ;;  %v220_v45 = vld [vmem:[#allocation2 + $0x148] sm:$0xff]  ;;  %v5496_v47 = vcombine.low %v211_v30, %v215_v31 }
  0x9f   :  { %v223_v42 = vld [vmem:[#allocation2 + $0x160] sm:$0xff]  ;;  %v224_v46 = vld [vmem:[#allocation2 + $0x168] sm:$0xff]  ;;  %v5498_v48 = vcombine.low %v212_v35, %v216_v36 }
  0xa0   :  { %v5505_v49 = vcombine.high %v219_v41, %v223_v42  ;;  %v5507_v50 = vcombine.high %v220_v45, %v224_v46  ;;  %v227_v51 = vld [vmem:[#allocation2 + $0x180] sm:$0xff]  ;;  %v228_v54 = vld [vmem:[#allocation2 + $0x188] sm:$0xff]  ;;  %v5504_v56 = vcombine.low %v219_v41, %v223_v42  ;;  %v5506_v57 = vcombine.low %v220_v45, %v224_v46 }
  0xa1   :  { %2530 = vmatpush1.bf16.msra.mxu0 %v5480_v26  ;;  %2653 = vmatpush1.bf16.msra.mxu1 %v5482_v27  ;;  %v231_v52 = vld [vmem:[#allocation2 + $0x1a0] sm:$0xff]  ;;  %v232_v55 = vld [vmem:[#allocation2 + $0x1a8] sm:$0xff] }
  0xa2   :  { %2531 = vmatprep.subr.bf16.mxu0 %v5489_v28  ;;  %2654 = vmatprep.subr.bf16.mxu1 %v5491_v29  ;;  %v5513_v58 = vcombine.high %v227_v51, %v231_v52  ;;  %v7166_v59 = vld [vmem:[%s7312_s0] sm:$0xff]  ;;  %v5515_v60 = vcombine.high %v228_v54, %v232_v55  ;;  %v236_v0 = vld [vmem:[#allocation2 + $0x1c8] sm:$0xff]  ;;  %v5512_v2 = vcombine.low %v227_v51, %v231_v52 }
  0xa3   :  { %v235_v61 = vld [vmem:[#allocation2 + $0x1c0] sm:$0xff]  ;;  %v7170_v63 = vrot.slane %v7166_v59, %v7161_v53  ;;  %v240_v1 = vld [vmem:[#allocation2 + $0x1e8] sm:$0xff]  ;;  %v5514_v4 = vcombine.low %v228_v54, %v232_v55 }
  0xa4   :  { %v239_v62 = vld [vmem:[#allocation2 + $0x1e0] sm:$0xff]  ;;  %v5523_v6 = vcombine.high %v236_v0, %v240_v1  ;;  %v244_v10 = vld [vmem:[#allocation2 + $0x208] sm:$0xff]  ;;  %v5522_v13 = vcombine.low %v236_v0, %v240_v1 }
  0xa5   :  { %2532 = vmatpush1.bf16.msra.mxu0 %v5488_v37  ;;  %2655 = vmatpush1.bf16.msra.mxu1 %v5490_v38  ;;  %v157_v3 = vcombine.high %v7170_v63, %v7170_v63  ;;  %v5521_v5 = vcombine.high %v235_v61, %v239_v62  ;;  %v243_v7 = vld [vmem:[#allocation2 + $0x200] sm:$0xff]  ;;  %v248_v11 = vld [vmem:[#allocation2 + $0x228] sm:$0xff]  ;;  %v5520_v12 = vcombine.low %v235_v61, %v239_v62 }
  0xa6   :  { %2533 = vmatprep.subr.bf16.mxu0 %v5497_v39  ;;  %2656 = vmatprep.subr.bf16.mxu1 %v5499_v40  ;;  %v247_v8 = vld [vmem:[#allocation2 + $0x220] sm:$0xff]  ;;  %v5531_v15 = vcombine.high %v244_v10, %v248_v11  ;;  %v252_v18 = vld [vmem:[#allocation2 + $0x248] sm:$0xff]  ;;  %v5530_v21 = vcombine.low %v244_v10, %v248_v11 }
  0xa7   :  { %v7174_v9 = vpack.c.bf16 %v157_v3, %v157_v3  ;;  %v5529_v14 = vcombine.high %v243_v7, %v247_v8  ;;  %v251_v16 = vld [vmem:[#allocation2 + $0x240] sm:$0xff]  ;;  %v256_v19 = vld [vmem:[#allocation2 + $0x268] sm:$0xff]  ;;  %v5528_v20 = vcombine.low %v243_v7, %v247_v8 }
  0xa8   :  { %v255_v17 = vld [vmem:[#allocation2 + $0x260] sm:$0xff]  ;;  %v5539_v23 = vcombine.high %v252_v18, %v256_v19  ;;  %v260_v26 = vld [vmem:[#allocation2 + $0x288] sm:$0xff]  ;;  %v5538_v29 = vcombine.low %v252_v18, %v256_v19 }
  0xa9   :  { %2534 = vmatpush1.bf16.msra.mxu0 %v5496_v47  ;;  %2657 = vmatpush1.bf16.msra.mxu1 %v5498_v48  ;;  %v5537_v22 = vcombine.high %v251_v16, %v255_v17  ;;  %v259_v24 = vld [vmem:[#allocation2 + $0x280] sm:$0xff]  ;;  %v264_v27 = vld [vmem:[#allocation2 + $0x2a8] sm:$0xff]  ;;  %v5536_v28 = vcombine.low %v251_v16, %v255_v17 }
  0xaa   :  { %2535 = vmatprep.subr.bf16.mxu0 %v5505_v49  ;;  %2658 = vmatprep.subr.bf16.mxu1 %v5507_v50  ;;  %v263_v25 = vld [vmem:[#allocation2 + $0x2a0] sm:$0xff]  ;;  %v5547_v31 = vcombine.high %v260_v26, %v264_v27  ;;  %v268_v34 = vld [vmem:[#allocation2 + $0x2c8] sm:$0xff]  ;;  %v5546_v37 = vcombine.low %v260_v26, %v264_v27 }
  0xab   :  { %2557 = vmatprep.mubr.bf16.mxu0 %v7174_v9  ;;  %2680 = vmatprep.mubr.bf16.mxu1 %v7174_v9  ;;  %v5545_v30 = vcombine.high %v259_v24, %v263_v25  ;;  %v267_v32 = vld [vmem:[#allocation2 + $0x2c0] sm:$0xff]  ;;  %v272_v35 = vld [vmem:[#allocation2 + $0x2e8] sm:$0xff]  ;;  %v5544_v36 = vcombine.low %v259_v24, %v263_v25  ;;  %v7187_v25 = vpack.c.bf16 %v7170_v63, %v7170_v63 }
  0xac   :  { %v271_v33 = vld [vmem:[#allocation2 + $0x2e0] sm:$0xff]  ;;  %v5555_v39 = vcombine.high %v268_v34, %v272_v35  ;;  %v276_v42 = vld [vmem:[#allocation2 + $0x308] sm:$0xff]  ;;  %v5554_v46 = vcombine.low %v268_v34, %v272_v35 }
  0xad   :  { %2536 = vmatpush1.bf16.msra.mxu0 %v5504_v56  ;;  %2659 = vmatpush1.bf16.msra.mxu1 %v5506_v57  ;;  %v5553_v38 = vcombine.high %v267_v32, %v271_v33  ;;  %v275_v40 = vld [vmem:[#allocation2 + $0x300] sm:$0xff]  ;;  %v280_v43 = vld [vmem:[#allocation2 + $0x328] sm:$0xff]  ;;  %v5552_v45 = vcombine.low %v267_v32, %v271_v33 }
  0xae   :  { %2537 = vmatprep.subr.bf16.mxu0 %v5513_v58  ;;  %2660 = vmatprep.subr.bf16.mxu1 %v5515_v60  ;;  %v279_v41 = vld [vmem:[#allocation2 + $0x320] sm:$0xff]  ;;  %v5563_v48 = vcombine.high %v276_v42, %v280_v43  ;;  %v284_v51 = vld [vmem:[#allocation2 + $0x348] sm:$0xff]  ;;  %v5562_v55 = vcombine.low %v276_v42, %v280_v43 }
  0xaf   :  { %v5561_v47 = vcombine.high %v275_v40, %v279_v41  ;;  %v283_v49 = vld [vmem:[#allocation2 + $0x340] sm:$0xff]  ;;  %v288_v52 = vld [vmem:[#allocation2 + $0x368] sm:$0xff]  ;;  %v5560_v54 = vcombine.low %v275_v40, %v279_v41 }
  0xb0   :  { %v287_v50 = vld [vmem:[#allocation2 + $0x360] sm:$0xff]  ;;  %v5571_v57 = vcombine.high %v284_v51, %v288_v52  ;;  %v292_v61 = vld [vmem:[#allocation2 + $0x388] sm:$0xff]  ;;  %v5570_v1 = vcombine.low %v284_v51, %v288_v52 }
  0xb1   :  { %2538 = vmatpush1.bf16.msra.mxu0 %v5512_v2  ;;  %2661 = vmatpush1.bf16.msra.mxu1 %v5514_v4  ;;  %v5569_v56 = vcombine.high %v283_v49, %v287_v50  ;;  %v291_v58 = vld [vmem:[#allocation2 + $0x380] sm:$0xff]  ;;  %v296_v62 = vld [vmem:[#allocation2 + $0x3a8] sm:$0xff]  ;;  %v5568_v0 = vcombine.low %v283_v49, %v287_v50 }
  0xb2   :  { %2539 = vmatprep.subr.bf16.mxu0 %v5521_v5  ;;  %2662 = vmatprep.subr.bf16.mxu1 %v5523_v6  ;;  %v295_v60 = vld [vmem:[#allocation2 + $0x3a0] sm:$0xff]  ;;  %v5579_v3 = vcombine.high %v292_v61, %v296_v62  ;;  %v142_v6 = vcombine.high %v7166_v59, %v7166_v59  ;;  %v300_v7 = vld [vmem:[#allocation2 + $0x3c8] sm:$0xff]  ;;  %v5578_v11 = vcombine.low %v292_v61, %v296_v62 }
  0xb3   :  { %v5577_v2 = vcombine.high %v291_v58, %v295_v60  ;;  %v299_v4 = vld [vmem:[#allocation2 + $0x3c0] sm:$0xff]  ;;  %v304_v8 = vld [vmem:[#allocation2 + $0x3e8] sm:$0xff]  ;;  %v5576_v10 = vcombine.low %v291_v58, %v295_v60 }
  0xb4   :  { %v303_v5 = vld [vmem:[#allocation2 + $0x3e0] sm:$0xff]  ;;  %v7181_v16 = vrot.slane %v142_v6, %v7161_v53  ;;  %v308_v17 = vld [vmem:[#allocation2 + $0x408] sm:$0xff]  ;;  %v5586_v59 = vcombine.low %v300_v7, %v304_v8 }
  0xb5   :  { %2540 = vmatpush1.bf16.msra.mxu0 %v5520_v12  ;;  %2663 = vmatpush1.bf16.msra.mxu1 %v5522_v13  ;;  %v5585_v12 = vcombine.high %v299_v4, %v303_v5  ;;  %v5587_v13 = vcombine.high %v300_v7, %v304_v8  ;;  %v312_v18 = vld [vmem:[#allocation2 + $0x428] sm:$0xff]  ;;  %v5584_v19 = vcombine.low %v299_v4, %v303_v5  ;;  %v327_v32 = vld [vmem:[#allocation2 + $0x4a0] sm:$0xff] }
  0xb6   :  { %2541 = vmatprep.subr.bf16.mxu0 %v5529_v14  ;;  %2664 = vmatprep.subr.bf16.mxu1 %v5531_v15  ;;  %v307_v14 = vld [vmem:[#allocation2 + $0x400] sm:$0xff]  ;;  %v158_v24 = vcombine.high %v7181_v16, %v7181_v16  ;;  %v316_v26 = vld [vmem:[#allocation2 + $0x448] sm:$0xff] }
  0xb7   :  { %v311_v15 = vld [vmem:[#allocation2 + $0x420] sm:$0xff]  ;;  %v320_v27 = vld [vmem:[#allocation2 + $0x468] sm:$0xff] }
  0xb8   :  { %v324_v33 = vld [vmem:[#allocation2 + $0x488] sm:$0xff]  ;;  %v5603_v34 = vcombine.high %v316_v26, %v320_v27  ;;  %v335_v40 = vld [vmem:[#allocation2 + $0x4e0] sm:$0xff] }
  0xb9   :  { %2542 = vmatpush1.bf16.msra.mxu0 %v5528_v20  ;;  %2665 = vmatpush1.bf16.msra.mxu1 %v5530_v21  ;;  %v5593_v20 = vcombine.high %v307_v14, %v311_v15  ;;  %v5595_v21 = vcombine.high %v308_v17, %v312_v18  ;;  %v328_v35 = vld [vmem:[#allocation2 + $0x4a8] sm:$0xff]  ;;  %v343_v49 = vld [vmem:[#allocation2 + $0x520] sm:$0xff] }
  0xba   :  { %2543 = vmatprep.subr.bf16.mxu0 %v5537_v22  ;;  %2666 = vmatprep.subr.bf16.mxu1 %v5539_v23  ;;  %v315_v22 = vld [vmem:[#allocation2 + $0x440] sm:$0xff]  ;;  %v332_v41 = vld [vmem:[#allocation2 + $0x4c8] sm:$0xff]  ;;  %v5611_v42 = vcombine.high %v324_v33, %v328_v35 }
  0xbb   :  { %v319_v23 = vld [vmem:[#allocation2 + $0x460] sm:$0xff]  ;;  %v336_v43 = vld [vmem:[#allocation2 + $0x4e8] sm:$0xff] }
  0xbc   :  { %v5600_v63 = vcombine.low %v315_v22, %v319_v23  ;;  %v340_v50 = vld [vmem:[#allocation2 + $0x508] sm:$0xff]  ;;  %v5619_v51 = vcombine.high %v332_v41, %v336_v43  ;;  %v351_v58 = vld [vmem:[#allocation2 + $0x560] sm:$0xff] }
  0xbd   :  { %2544 = vmatpush1.bf16.msra.mxu0 %v5536_v28  ;;  %2667 = vmatpush1.bf16.msra.mxu1 %v5538_v29  ;;  %v5592_v28 = vcombine.low %v307_v14, %v311_v15  ;;  %v5594_v29 = vcombine.low %v308_v17, %v312_v18  ;;  %v344_v52 = vld [vmem:[#allocation2 + $0x528] sm:$0xff]  ;;  %v359_v4 = vld [vmem:[#allocation2 + $0x5a0] sm:$0xff] }
  0xbe   :  { %2545 = vmatprep.subr.bf16.mxu0 %v5545_v30  ;;  %2668 = vmatprep.subr.bf16.mxu1 %v5547_v31  ;;  %v5601_v30 = vcombine.high %v315_v22, %v319_v23  ;;  %v323_v31 = vld [vmem:[#allocation2 + $0x480] sm:$0xff]  ;;  %v348_v60 = vld [vmem:[#allocation2 + $0x548] sm:$0xff]  ;;  %v5627_v61 = vcombine.high %v340_v50, %v344_v52 }
  0xbf   :  { %v352_v62 = vld [vmem:[#allocation2 + $0x568] sm:$0xff] }
  0xc0   :  { %v356_v5 = vld [vmem:[#allocation2 + $0x588] sm:$0xff]  ;;  %v5635_v6 = vcombine.high %v348_v60, %v352_v62 }
  0xc1   :  { %2546 = vmatpush1.bf16.msra.mxu0 %v5544_v36  ;;  %2669 = vmatpush1.bf16.msra.mxu1 %v5546_v37  ;;  %v7189_v36 = vpack.c.bf16 %v158_v24, %v158_v24  ;;  %v5602_v37 = vcombine.low %v316_v26, %v320_v27  ;;  %v360_v7 = vld [vmem:[#allocation2 + $0x5a8] sm:$0xff] }
  0xc2   :  { %2547 = vmatprep.subr.bf16.mxu0 %v5553_v38  ;;  %2670 = vmatprep.subr.bf16.mxu1 %v5555_v39  ;;  %v5609_v38 = vcombine.high %v323_v31, %v327_v32  ;;  %v331_v39 = vld [vmem:[#allocation2 + $0x4c0] sm:$0xff]  ;;  %v364_v14 = vld [vmem:[#allocation2 + $0x5c8] sm:$0xff]  ;;  %v5643_v15 = vcombine.high %v356_v5, %v360_v7 }
  0xc3   :  { %v368_v17 = vld [vmem:[#allocation2 + $0x5e8] sm:$0xff] }
  0xc4   :  { %v372_v22 = vld [vmem:[#allocation2 + $0x608] sm:$0xff]  ;;  %v5651_v23 = vcombine.high %v364_v14, %v368_v17  ;;  %v5650_v27 = vcombine.low %v364_v14, %v368_v17 }
  0xc5   :  { %2548 = vmatpush1.bf16.msra.mxu0 %v5552_v45  ;;  %2671 = vmatpush1.bf16.msra.mxu1 %v5554_v46  ;;  %v5608_v45 = vcombine.low %v323_v31, %v327_v32  ;;  %v5610_v46 = vcombine.low %v324_v33, %v328_v35  ;;  %v376_v24 = vld [vmem:[#allocation2 + $0x628] sm:$0xff] }
  0xc6   :  { %2549 = vmatprep.subr.bf16.mxu0 %v5561_v47  ;;  %2672 = vmatprep.subr.bf16.mxu1 %v5563_v48  ;;  %v5617_v47 = vcombine.high %v331_v39, %v335_v40  ;;  %v339_v48 = vld [vmem:[#allocation2 + $0x500] sm:$0xff]  ;;  %v380_v31 = vld [vmem:[#allocation2 + $0x648] sm:$0xff]  ;;  %v5659_v32 = vcombine.high %v372_v22, %v376_v24  ;;  %v5658_v35 = vcombine.low %v372_v22, %v376_v24 }
  0xc7   :  { %v384_v33 = vld [vmem:[#allocation2 + $0x668] sm:$0xff]  ;;  %v435_v24 = vld [vmem:[#allocation2 + $0x800] sm:$0xff] }
  0xc8   :  { %v424_v14 = vld [vmem:[#allocation2 + $0x7a8] sm:$0xff] }
  0xc9   :  { %2550 = vmatpush1.bf16.msra.mxu0 %v5560_v54  ;;  %2673 = vmatpush1.bf16.msra.mxu1 %v5562_v55  ;;  %v5616_v54 = vcombine.low %v331_v39, %v335_v40  ;;  %v5618_v55 = vcombine.low %v332_v41, %v336_v43  ;;  %v388_v39 = vld [vmem:[#allocation2 + $0x688] sm:$0xff]  ;;  %v5667_v40 = vcombine.high %v380_v31, %v384_v33 }
  0xca   :  { %2551 = vmatprep.subr.bf16.mxu0 %v5569_v56  ;;  %2674 = vmatprep.subr.bf16.mxu1 %v5571_v57  ;;  %v5625_v56 = vcombine.high %v339_v48, %v343_v49  ;;  %v347_v57 = vld [vmem:[#allocation2 + $0x540] sm:$0xff]  ;;  %v392_v41 = vld [vmem:[#allocation2 + $0x6a8] sm:$0xff]  ;;  %v5666_v43 = vcombine.low %v380_v31, %v384_v33 }
  0xcb   :  { %v5632_v8 = vcombine.low %v347_v57, %v351_v58  ;;  %v432_v22 = vld [vmem:[#allocation2 + $0x7e8] sm:$0xff] }
  0xcd   :  { %2552 = vmatpush1.bf16.msra.mxu0 %v5568_v0  ;;  %2675 = vmatpush1.bf16.msra.mxu1 %v5570_v1  ;;  %v5624_v0 = vcombine.low %v339_v48, %v343_v49  ;;  %v5626_v1 = vcombine.low %v340_v50, %v344_v52  ;;  %v396_v48 = vld [vmem:[#allocation2 + $0x6c8] sm:$0xff]  ;;  %v5675_v49 = vcombine.high %v388_v39, %v392_v41 }
  0xce   :  { %2553 = vmatprep.subr.bf16.mxu0 %v5577_v2  ;;  %2676 = vmatprep.subr.bf16.mxu1 %v5579_v3  ;;  %v5633_v2 = vcombine.high %v347_v57, %v351_v58  ;;  %v355_v3 = vld [vmem:[#allocation2 + $0x580] sm:$0xff]  ;;  %v400_v50 = vld [vmem:[#allocation2 + $0x6e8] sm:$0xff]  ;;  %v5674_v52 = vcombine.low %v388_v39, %v392_v41 }
  0xcf   :  { %v5640_v18 = vcombine.low %v355_v3, %v359_v4  ;;  %v404_v57 = vld [vmem:[#allocation2 + $0x708] sm:$0xff]  ;;  %v5683_v58 = vcombine.high %v396_v48, %v400_v50 }
  0xd1   :  { %2554 = vmatpush1.bf16.msra.mxu0 %v5576_v10  ;;  %2677 = vmatpush1.bf16.msra.mxu1 %v5578_v11  ;;  %v5634_v10 = vcombine.low %v348_v60, %v352_v62  ;;  %v5641_v11 = vcombine.high %v355_v3, %v359_v4  ;;  %v408_v60 = vld [vmem:[#allocation2 + $0x728] sm:$0xff]  ;;  %v5682_v62 = vcombine.low %v396_v48, %v400_v50  ;;  %v455_v48 = vld [vmem:[#allocation2 + $0x8a0] sm:$0xff] }
  0xd2   :  { %2555 = vmatprep.subr.bf16.mxu0 %v5585_v12  ;;  %2678 = vmatprep.subr.bf16.mxu1 %v5587_v13  ;;  %v363_v12 = vld [vmem:[#allocation2 + $0x5c0] sm:$0xff]  ;;  %v412_v3 = vld [vmem:[#allocation2 + $0x748] sm:$0xff]  ;;  %v5691_v4 = vcombine.high %v404_v57, %v408_v60 }
  0xd3   :  { %v367_v13 = vld [vmem:[#allocation2 + $0x5e0] sm:$0xff] }
  0xd4   :  { %v5648_v26 = vcombine.low %v363_v12, %v367_v13 }
  0xd5   :  { %2556 = vmatpush1.bf16.msra.mxu0 %v5584_v19  ;;  %2679 = vmatpush1.bf16.msra.mxu1 %v5586_v59  ;;  %v5642_v19 = vcombine.low %v356_v5, %v360_v7  ;;  %v5649_v59 = vcombine.high %v363_v12, %v367_v13  ;;  %v416_v5 = vld [vmem:[#allocation2 + $0x768] sm:$0xff]  ;;  %v5690_v7 = vcombine.low %v404_v57, %v408_v60  ;;  %v463_v57 = vld [vmem:[#allocation2 + $0x8e0] sm:$0xff] }
  0xd6   :  { %2566 = vmatprep.subr.bf16.mxu0 %v5593_v20  ;;  %2689 = vmatprep.subr.bf16.mxu1 %v5595_v21  ;;  %v371_v20 = vld [vmem:[#allocation2 + $0x600] sm:$0xff]  ;;  %v420_v12 = vld [vmem:[#allocation2 + $0x788] sm:$0xff]  ;;  %v5699_v13 = vcombine.high %v412_v3, %v416_v5  ;;  %v5698_v17 = vcombine.low %v412_v3, %v416_v5 }
  0xd7   :  { %v375_v21 = vld [vmem:[#allocation2 + $0x620] sm:$0xff] }
  0xd8   :  { %2558 = vmatmul.mubr.bf16.vlgmr.msra.gmra.mrb[0].mxu0 %v7187_v25  ;;  %2681 = vmatmul.mubr.bf16.vlgmr.msra.gmra.mrb[0].mxu1 %v7187_v25  ;;  %v471_v3 = vld [vmem:[#allocation2 + $0x920] sm:$0xff] }
  0xd9   :  { %2567 = vmatpush1.bf16.msra.mxu0 %v5592_v28  ;;  %2690 = vmatpush1.bf16.msra.mxu1 %v5594_v29  ;;  %v5657_v28 = vcombine.high %v371_v20, %v375_v21  ;;  %v379_v29 = vld [vmem:[#allocation2 + $0x640] sm:$0xff] }
  0xda   :  { %2568 = vmatprep.subr.bf16.mxu0 %v5601_v30  ;;  %2691 = vmatprep.subr.bf16.mxu1 %v5603_v34  ;;  %v383_v30 = vld [vmem:[#allocation2 + $0x660] sm:$0xff]  ;;  %v5656_v34 = vcombine.low %v371_v20, %v375_v21  ;;  %v428_v20 = vld [vmem:[#allocation2 + $0x7c8] sm:$0xff]  ;;  %v5707_v21 = vcombine.high %v420_v12, %v424_v14 }
  0xdb   :  { %2598 = vmatprep.mubr.bf16.mxu0 %v7189_v36  ;;  %2721 = vmatprep.mubr.bf16.mxu1 %v7189_v36  ;;  %v5715_v31 = vcombine.high %v428_v20, %v432_v22 }
  0xdd   :  { %2569 = vmatpush1.bf16.msra.mxu0 %v5600_v63  ;;  %2692 = vmatpush1.bf16.msra.mxu1 %v5602_v37  ;;  %v5665_v63 = vcombine.high %v379_v29, %v383_v30  ;;  %v387_v37 = vld [vmem:[#allocation2 + $0x680] sm:$0xff] }
  0xde   :  { %2570 = vmatprep.subr.bf16.mxu0 %v5609_v38  ;;  %2693 = vmatprep.subr.bf16.mxu1 %v5611_v42  ;;  %v391_v38 = vld [vmem:[#allocation2 + $0x6a0] sm:$0xff]  ;;  %v5664_v42 = vcombine.low %v379_v29, %v383_v30  ;;  %v436_v29 = vld [vmem:[#allocation2 + $0x808] sm:$0xff] }
  0xdf   :  { %v440_v30 = vld [vmem:[#allocation2 + $0x828] sm:$0xff] }
  0xe0   :  { %v5723_v39 = vcombine.high %v436_v29, %v440_v30 }
  0xe1   :  { %2571 = vmatpush1.bf16.msra.mxu0 %v5608_v45  ;;  %2694 = vmatpush1.bf16.msra.mxu1 %v5610_v46  ;;  %v5673_v45 = vcombine.high %v387_v37, %v391_v38  ;;  %v395_v46 = vld [vmem:[#allocation2 + $0x6c0] sm:$0xff] }
  0xe2   :  { %2572 = vmatprep.subr.bf16.mxu0 %v5617_v47  ;;  %2695 = vmatprep.subr.bf16.mxu1 %v5619_v51  ;;  %v399_v47 = vld [vmem:[#allocation2 + $0x6e0] sm:$0xff]  ;;  %v5672_v51 = vcombine.low %v387_v37, %v391_v38  ;;  %v444_v38 = vld [vmem:[#allocation2 + $0x848] sm:$0xff] }
  0xe3   :  { %v447_v37 = vld [vmem:[#allocation2 + $0x860] sm:$0xff] }
  0xe5   :  { %2573 = vmatpush1.bf16.msra.mxu0 %v5616_v54  ;;  %2696 = vmatpush1.bf16.msra.mxu1 %v5618_v55  ;;  %v5681_v54 = vcombine.high %v395_v46, %v399_v47  ;;  %v403_v55 = vld [vmem:[#allocation2 + $0x700] sm:$0xff] }
  0xe6   :  { %2574 = vmatprep.subr.bf16.mxu0 %v5625_v56  ;;  %2697 = vmatprep.subr.bf16.mxu1 %v5627_v61  ;;  %v407_v56 = vld [vmem:[#allocation2 + $0x720] sm:$0xff]  ;;  %v5680_v61 = vcombine.low %v395_v46, %v399_v47 }
  0xe7   :  { %v451_v47 = vld [vmem:[#allocation2 + $0x880] sm:$0xff] }
  0xe9   :  { %2575 = vmatpush1.bf16.msra.mxu0 %v5624_v0  ;;  %2698 = vmatpush1.bf16.msra.mxu1 %v5626_v1  ;;  %v5689_v0 = vcombine.high %v403_v55, %v407_v56  ;;  %v411_v1 = vld [vmem:[#allocation2 + $0x740] sm:$0xff] }
  0xea   :  { %2576 = vmatprep.subr.bf16.mxu0 %v5633_v2  ;;  %2699 = vmatprep.subr.bf16.mxu1 %v5635_v6  ;;  %v415_v2 = vld [vmem:[#allocation2 + $0x760] sm:$0xff]  ;;  %v5688_v6 = vcombine.low %v403_v55, %v407_v56  ;;  %v5737_v55 = vcombine.high %v451_v47, %v455_v48 }
  0xeb   :  { %v459_v56 = vld [vmem:[#allocation2 + $0x8c0] sm:$0xff] }
  0xed   :  { %2577 = vmatpush1.bf16.msra.mxu0 %v5632_v8  ;;  %2700 = vmatpush1.bf16.msra.mxu1 %v5634_v10  ;;  %v5697_v8 = vcombine.high %v411_v1, %v415_v2  ;;  %v419_v10 = vld [vmem:[#allocation2 + $0x780] sm:$0xff] }
  0xee   :  { %2578 = vmatprep.subr.bf16.mxu0 %v5641_v11  ;;  %2701 = vmatprep.subr.bf16.mxu1 %v5643_v15  ;;  %v423_v11 = vld [vmem:[#allocation2 + $0x7a0] sm:$0xff]  ;;  %v5696_v15 = vcombine.low %v411_v1, %v415_v2  ;;  %v5745_v1 = vcombine.high %v459_v56, %v463_v57 }
  0xef   :  { %v467_v2 = vld [vmem:[#allocation2 + $0x900] sm:$0xff] }
  0xf1   :  { %2579 = vmatpush1.bf16.msra.mxu0 %v5640_v18  ;;  %2702 = vmatpush1.bf16.msra.mxu1 %v5642_v19  ;;  %v5705_v18 = vcombine.high %v419_v10, %v423_v11  ;;  %v427_v19 = vld [vmem:[#allocation2 + $0x7c0] sm:$0xff] }
  0xf2   :  { %2580 = vmatprep.subr.bf16.mxu0 %v5649_v59  ;;  %2703 = vmatprep.subr.bf16.mxu1 %v5651_v23  ;;  %v431_v59 = vld [vmem:[#allocation2 + $0x7e0] sm:$0xff]  ;;  %v5704_v23 = vcombine.low %v419_v10, %v423_v11  ;;  %v5753_v10 = vcombine.high %v467_v2, %v471_v3 }
  0xf3   :  { %v5712_v33 = vcombine.low %v427_v19, %v431_v59  ;;  %v475_v11 = vld [vmem:[#allocation2 + $0x940] sm:$0xff] }
  0xf5   :  { %2581 = vmatpush1.bf16.msra.mxu0 %v5648_v26  ;;  %2704 = vmatpush1.bf16.msra.mxu1 %v5650_v27  ;;  %v5706_v26 = vcombine.low %v420_v12, %v424_v14  ;;  %v5713_v27 = vcombine.high %v427_v19, %v431_v59  ;;  %v479_v12 = vld [vmem:[#allocation2 + $0x960] sm:$0xff] }
  0xf6   :  { %2582 = vmatprep.subr.bf16.mxu0 %v5657_v28  ;;  %2705 = vmatprep.subr.bf16.mxu1 %v5659_v32  ;;  %v439_v28 = vld [vmem:[#allocation2 + $0x820] sm:$0xff]  ;;  %v7198_v32 = vld.sshfl [vmem:[%s7312_s0 + $0x8] sm:$0x33 pattern:$0x76325410]  ;;  %v5761_v19 = vcombine.high %v475_v11, %v479_v12  ;;  %s6998_s0 = smov [#allocation16]  }
  0xf7   :  { %v166_v41 = vcombine.high %v7198_v32, %v7198_v32  ;;  %v483_v59 = vld [vmem:[#allocation2 + $0x980] sm:$0xff]  ;;  %s5436_s26 = sshll.u32 %s6998_s0, 4  ;;  %s5437_s26 = int_to_ptr.vmem [resolvable:$true] %s5436_s26 }
  0xf8   :  { %s6923_s27 = scalar_lea.vmem %s5437_s26, 256  ;;  %p6928_p9 = scmp.lt.s32.totalorder %s5437_s26, %s5437_s26 }
  0xf9   :  { %2583 = vmatpush1.bf16.msra.mxu0 %v5656_v34  ;;  %2706 = vmatpush1.bf16.msra.mxu1 %v5658_v35  ;;  %v5714_v34 = vcombine.low %v428_v20, %v432_v22  ;;  %v5721_v35 = vcombine.high %v435_v24, %v439_v28  ;;  %v487_v20 = vld [vmem:[#allocation2 + $0x9a0] sm:$0xff]  ;;  %p6924_p8 = scmp.ne.s32.totalorder %s5437_s26, %s6923_s27  ;;  %p6929_p10 = scmp.lt.s32.totalorder %s6923_s27, %s6923_s27 }
  0xfa   :  { %2584 = vmatprep.subr.bf16.mxu0 %v5665_v63  ;;  %2707 = vmatprep.subr.bf16.mxu1 %v5667_v40  ;;  %v443_v63 = vld [vmem:[#allocation2 + $0x840] sm:$0xff]  ;;  %v448_v40 = vld [vmem:[#allocation2 + $0x868] sm:$0xff] }
  0xfb   :  { %v5729_v46 = vcombine.high %v443_v63, %v447_v37  ;;  %v5731_v50 = vcombine.high %v444_v38, %v448_v40  ;;  %p6930_p11 = por %p6929_p10, %p6928_p9 }
  0xfd   :  { %2585 = vmatpush1.bf16.msra.mxu0 %v5664_v42  ;;  %2708 = vmatpush1.bf16.msra.mxu1 %v5666_v43  ;;  %v7204_v42 = vpack.c.bf16 %v7181_v16, %v7181_v16  ;;  %v5720_v43 = vcombine.low %v435_v24, %v439_v28  ;;  %v5728_v16 = vcombine.low %v443_v63, %v447_v37  ;;  %v491_v28 = vld [vmem:[#allocation2 + $0x9c0] sm:$0xff]  ;;  %p6931_p12 = pnand %p6930_p11, %p6924_p8 }
  0xfe   :  { %2586 = vmatprep.subr.bf16.mxu0 %v5673_v45  ;;  %2709 = vmatprep.subr.bf16.mxu1 %v5675_v49  ;;  %v5722_v45 = vcombine.low %v436_v29, %v440_v30  ;;  %v452_v49 = vld [vmem:[#allocation2 + $0x888] sm:$0xff]  ;;  %v5760_v24 = vcombine.low %v475_v11, %v479_v12  ;;  %v495_v29 = vld [vmem:[#allocation2 + $0x9e0] sm:$0xff] }
  0xff   :  { %v492_v30 = vld [vmem:[#allocation2 + $0x9c8] sm:$0xff]  ;;  %v5777_v63 = vcombine.high %v491_v28, %v495_v29  ;;  %v499_v37 = vld [vmem:[#allocation2 + $0xa00] sm:$0xff] }
 0x100   :  { %v531_v11 = vld [vmem:[#allocation2 + $0xb00] sm:$0xff] }
 0x101   :  { %2587 = vmatpush1.bf16.msra.mxu0 %v5672_v51  ;;  %2710 = vmatpush1.bf16.msra.mxu1 %v5674_v52  ;;  %v456_v51 = vld [vmem:[#allocation2 + $0x8a8] sm:$0xff]  ;;  %v7206_v52 = vpack.c.bf16 %v166_v41, %v166_v41  ;;  %v535_v12 = vld [vmem:[#allocation2 + $0xb20] sm:$0xff] }
 0x102   :  { %2588 = vmatprep.subr.bf16.mxu0 %v5681_v54  ;;  %2711 = vmatprep.subr.bf16.mxu1 %v5683_v58  ;;  %v5730_v54 = vcombine.low %v444_v38, %v448_v40  ;;  %v460_v58 = vld [vmem:[#allocation2 + $0x8c8] sm:$0xff]  ;;  %v5739_v60 = vcombine.high %v452_v49, %v456_v51  ;;  %v503_v38 = vld [vmem:[#allocation2 + $0xa20] sm:$0xff] }
 0x103   :  { %v504_v41 = vld [vmem:[#allocation2 + $0xa28] sm:$0xff] }
 0x105   :  { %2589 = vmatpush1.bf16.msra.mxu0 %v5680_v61  ;;  %2712 = vmatpush1.bf16.msra.mxu1 %v5682_v62  ;;  %v464_v61 = vld [vmem:[#allocation2 + $0x8e8] sm:$0xff]  ;;  %v5736_v62 = vcombine.low %v451_v47, %v455_v48  ;;  %v507_v47 = vld [vmem:[#allocation2 + $0xa40] sm:$0xff] }
 0x106   :  { %2590 = vmatprep.subr.bf16.mxu0 %v5689_v0  ;;  %2713 = vmatprep.subr.bf16.mxu1 %v5691_v4  ;;  %v5738_v0 = vcombine.low %v452_v49, %v456_v51  ;;  %v468_v4 = vld [vmem:[#allocation2 + $0x908] sm:$0xff]  ;;  %v5747_v5 = vcombine.high %v460_v58, %v464_v61  ;;  %v511_v48 = vld [vmem:[#allocation2 + $0xa60] sm:$0xff] }
 0x107   :  { %v508_v49 = vld [vmem:[#allocation2 + $0xa48] sm:$0xff] }
 0x108   :  { %v512_v51 = vld [vmem:[#allocation2 + $0xa68] sm:$0xff] }
 0x109   :  { %2591 = vmatpush1.bf16.msra.mxu0 %v5688_v6  ;;  %2714 = vmatpush1.bf16.msra.mxu1 %v5690_v7  ;;  %v472_v6 = vld [vmem:[#allocation2 + $0x928] sm:$0xff]  ;;  %v5744_v7 = vcombine.low %v459_v56, %v463_v57  ;;  %v515_v56 = vld [vmem:[#allocation2 + $0xa80] sm:$0xff] }
 0x10a   :  { %2592 = vmatprep.subr.bf16.mxu0 %v5697_v8  ;;  %2715 = vmatprep.subr.bf16.mxu1 %v5699_v13  ;;  %v5746_v8 = vcombine.low %v460_v58, %v464_v61  ;;  %v476_v13 = vld [vmem:[#allocation2 + $0x948] sm:$0xff]  ;;  %v5755_v14 = vcombine.high %v468_v4, %v472_v6  ;;  %v519_v57 = vld [vmem:[#allocation2 + $0xaa0] sm:$0xff] }
 0x10b   :  { %v516_v58 = vld [vmem:[#allocation2 + $0xa88] sm:$0xff] }
 0x10c   :  { %v520_v61 = vld [vmem:[#allocation2 + $0xaa8] sm:$0xff] }
 0x10d   :  { %2593 = vmatpush1.bf16.msra.mxu0 %v5696_v15  ;;  %2716 = vmatpush1.bf16.msra.mxu1 %v5698_v17  ;;  %v480_v15 = vld [vmem:[#allocation2 + $0x968] sm:$0xff]  ;;  %v5752_v17 = vcombine.low %v467_v2, %v471_v3  ;;  %v523_v2 = vld [vmem:[#allocation2 + $0xac0] sm:$0xff] }
 0x10e   :  { %2594 = vmatprep.subr.bf16.mxu0 %v5705_v18  ;;  %2717 = vmatprep.subr.bf16.mxu1 %v5707_v21  ;;  %v5754_v18 = vcombine.low %v468_v4, %v472_v6  ;;  %v484_v21 = vld [vmem:[#allocation2 + $0x988] sm:$0xff]  ;;  %v5763_v22 = vcombine.high %v476_v13, %v480_v15  ;;  %v527_v3 = vld [vmem:[#allocation2 + $0xae0] sm:$0xff] }
 0x10f   :  { %v524_v4 = vld [vmem:[#allocation2 + $0xac8] sm:$0xff] }
 0x110   :  { %v528_v6 = vld [vmem:[#allocation2 + $0xae8] sm:$0xff] }
 0x111   :  { %2595 = vmatpush1.bf16.msra.mxu0 %v5704_v23  ;;  %2718 = vmatpush1.bf16.msra.mxu1 %v5706_v26  ;;  %v488_v23 = vld [vmem:[#allocation2 + $0x9a8] sm:$0xff]  ;;  %v5762_v26 = vcombine.low %v476_v13, %v480_v15 }
 0x112   :  { %2596 = vmatprep.subr.bf16.mxu0 %v5713_v27  ;;  %2719 = vmatprep.subr.bf16.mxu1 %v5715_v31  ;;  %v5769_v27 = vcombine.high %v483_v59, %v487_v20  ;;  %v5771_v31 = vcombine.high %v484_v21, %v488_v23  ;;  %v532_v13 = vld [vmem:[#allocation2 + $0xb08] sm:$0xff] }
 0x113   :  { %v536_v15 = vld [vmem:[#allocation2 + $0xb28] sm:$0xff] }
 0x115   :  { %2597 = vmatpush1.bf16.msra.mxu0 %v5712_v33  ;;  %2720 = vmatpush1.bf16.msra.mxu1 %v5714_v34  ;;  %v496_v33 = vld [vmem:[#allocation2 + $0x9e8] sm:$0xff]  ;;  %v5768_v34 = vcombine.low %v483_v59, %v487_v20  ;;  %v539_v59 = vld [vmem:[#allocation2 + $0xb40] sm:$0xff] }
 0x116   :  { %2607 = vmatprep.subr.bf16.mxu0 %v5721_v35  ;;  %2730 = vmatprep.subr.bf16.mxu1 %v5723_v39  ;;  %v5770_v35 = vcombine.low %v484_v21, %v488_v23  ;;  %v500_v39 = vld [vmem:[#allocation2 + $0xa08] sm:$0xff]  ;;  %v5779_v40 = vcombine.high %v492_v30, %v496_v33  ;;  %v543_v20 = vld [vmem:[#allocation2 + $0xb60] sm:$0xff] }
 0x117   :  { %v540_v21 = vld [vmem:[#allocation2 + $0xb48] sm:$0xff] }
 0x118   :  { %2599 = vmatmul.mubr.bf16.vlgmr.msra.gmra.mrb[0].mxu0 %v7204_v42  ;;  %2722 = vmatmul.mubr.bf16.vlgmr.msra.gmra.mrb[0].mxu1 %v7204_v42  ;;  %v544_v23 = vld [vmem:[#allocation2 + $0xb68] sm:$0xff] }
 0x119   :  { %2608 = vmatpush1.bf16.msra.mxu0 %v5720_v43  ;;  %2731 = vmatpush1.bf16.msra.mxu1 %v5722_v45  ;;  %v5776_v43 = vcombine.low %v491_v28, %v495_v29  ;;  %v5778_v45 = vcombine.low %v492_v30, %v496_v33  ;;  %v547_v28 = vld [vmem:[#allocation2 + $0xb80] sm:$0xff]  ;;  %v548_v30 = vld [vmem:[#allocation2 + $0xb88] sm:$0xff] }
 0x11a   :  { %2609 = vmatprep.subr.bf16.mxu0 %v5729_v46  ;;  %2732 = vmatprep.subr.bf16.mxu1 %v5731_v50  ;;  %v5785_v46 = vcombine.high %v499_v37, %v503_v38  ;;  %v5787_v50 = vcombine.high %v500_v39, %v504_v41  ;;  %v551_v29 = vld [vmem:[#allocation2 + $0xba0] sm:$0xff]  ;;  %v552_v33 = vld [vmem:[#allocation2 + $0xba8] sm:$0xff] }
 0x11b   :  { %2639 = vmatprep.mubr.bf16.mxu0 %v7206_v52  ;;  %2762 = vmatprep.mubr.bf16.mxu1 %v7206_v52 }
 0x11d   :  { %2610 = vmatpush1.bf16.msra.mxu0 %v5728_v16  ;;  %2733 = vmatpush1.bf16.msra.mxu1 %v5730_v54  ;;  %v5784_v16 = vcombine.low %v499_v37, %v503_v38  ;;  %v5786_v54 = vcombine.low %v500_v39, %v504_v41  ;;  %v555_v37 = vld [vmem:[#allocation2 + $0xbc0] sm:$0xff]  ;;  %v556_v39 = vld [vmem:[#allocation2 + $0xbc8] sm:$0xff] }
 0x11e   :  { %2611 = vmatprep.subr.bf16.mxu0 %v5737_v55  ;;  %2734 = vmatprep.subr.bf16.mxu1 %v5739_v60  ;;  %v5793_v55 = vcombine.high %v507_v47, %v511_v48  ;;  %v5795_v60 = vcombine.high %v508_v49, %v512_v51  ;;  %v559_v38 = vld [vmem:[#allocation2 + $0xbe0] sm:$0xff]  ;;  %v560_v41 = vld [vmem:[#allocation2 + $0xbe8] sm:$0xff] }
 0x121   :  { %2612 = vmatpush1.bf16.msra.mxu0 %v5736_v62  ;;  %2735 = vmatpush1.bf16.msra.mxu1 %v5738_v0  ;;  %v5792_v62 = vcombine.low %v507_v47, %v511_v48  ;;  %v5794_v0 = vcombine.low %v508_v49, %v512_v51  ;;  %v181_v47 = vld [vmem:[#allocation2 + $0x10] sm:$0xff]  ;;  %v182_v49 = vld [vmem:[#allocation2 + $0x18] sm:$0xff] }
 0x122   :  { %2613 = vmatprep.subr.bf16.mxu0 %v5745_v1  ;;  %2736 = vmatprep.subr.bf16.mxu1 %v5747_v5  ;;  %v5801_v1 = vcombine.high %v515_v56, %v519_v57  ;;  %v5803_v5 = vcombine.high %v516_v58, %v520_v61  ;;  %v185_v48 = vld [vmem:[#allocation2 + $0x30] sm:$0xff]  ;;  %v186_v51 = vld [vmem:[#allocation2 + $0x38] sm:$0xff] }
 0x125   :  { %2614 = vmatpush1.bf16.msra.mxu0 %v5744_v7  ;;  %2737 = vmatpush1.bf16.msra.mxu1 %v5746_v8  ;;  %v5800_v7 = vcombine.low %v515_v56, %v519_v57  ;;  %v5802_v8 = vcombine.low %v516_v58, %v520_v61  ;;  %v189_v56 = vld [vmem:[#allocation2 + $0x50] sm:$0xff]  ;;  %v190_v58 = vld [vmem:[#allocation2 + $0x58] sm:$0xff] }
 0x126   :  { %2615 = vmatprep.subr.bf16.mxu0 %v5753_v10  ;;  %2738 = vmatprep.subr.bf16.mxu1 %v5755_v14  ;;  %v5809_v10 = vcombine.high %v523_v2, %v527_v3  ;;  %v5811_v14 = vcombine.high %v524_v4, %v528_v6  ;;  %v193_v57 = vld [vmem:[#allocation2 + $0x70] sm:$0xff]  ;;  %v194_v61 = vld [vmem:[#allocation2 + $0x78] sm:$0xff] }
 0x129   :  { %2616 = vmatpush1.bf16.msra.mxu0 %v5752_v17  ;;  %2739 = vmatpush1.bf16.msra.mxu1 %v5754_v18  ;;  %v5808_v17 = vcombine.low %v523_v2, %v527_v3  ;;  %v5810_v18 = vcombine.low %v524_v4, %v528_v6  ;;  %v5477_v2 = vcombine.high %v189_v56, %v193_v57  ;;  %v197_v3 = vld [vmem:[#allocation2 + $0x90] sm:$0xff] }
 0x12a   :  { %2617 = vmatprep.subr.bf16.mxu0 %v5761_v19  ;;  %2740 = vmatprep.subr.bf16.mxu1 %v5763_v22  ;;  %v5817_v19 = vcombine.high %v531_v11, %v535_v12  ;;  %v5819_v22 = vcombine.high %v532_v13, %v536_v15  ;;  %v201_v4 = vld [vmem:[#allocation2 + $0xb0] sm:$0xff]  ;;  %v5479_v6 = vcombine.high %v190_v58, %v194_v61 }
 0x12d   :  { %2618 = vmatpush1.bf16.msra.mxu0 %v5760_v24  ;;  %2741 = vmatpush1.bf16.msra.mxu1 %v5762_v26  ;;  %v5816_v24 = vcombine.low %v531_v11, %v535_v12  ;;  %v5818_v26 = vcombine.low %v532_v13, %v536_v15  ;;  %v205_v11 = vld [vmem:[#allocation2 + $0xd0] sm:$0xff]  ;;  %v206_v13 = vld [vmem:[#allocation2 + $0xd8] sm:$0xff] }
 0x12e   :  { %2619 = vmatprep.subr.bf16.mxu0 %v5769_v27  ;;  %2742 = vmatprep.subr.bf16.mxu1 %v5771_v31  ;;  %v5825_v27 = vcombine.high %v539_v59, %v543_v20  ;;  %v5827_v31 = vcombine.high %v540_v21, %v544_v23  ;;  %v209_v12 = vld [vmem:[#allocation2 + $0xf0] sm:$0xff]  ;;  %v210_v15 = vld [vmem:[#allocation2 + $0xf8] sm:$0xff] }
 0x131   :  { %2620 = vmatpush1.bf16.msra.mxu0 %v5768_v34  ;;  %2743 = vmatpush1.bf16.msra.mxu1 %v5770_v35  ;;  %v5824_v34 = vcombine.low %v539_v59, %v543_v20  ;;  %v5826_v35 = vcombine.low %v540_v21, %v544_v23  ;;  %v213_v59 = vld [vmem:[#allocation2 + $0x110] sm:$0xff]  ;;  %v214_v21 = vld [vmem:[#allocation2 + $0x118] sm:$0xff] }
 0x132   :  { %2621 = vmatprep.subr.bf16.mxu0 %v5777_v63  ;;  %2744 = vmatprep.subr.bf16.mxu1 %v5779_v40  ;;  %v5833_v63 = vcombine.high %v547_v28, %v551_v29  ;;  %v5835_v40 = vcombine.high %v548_v30, %v552_v33  ;;  %v217_v20 = vld [vmem:[#allocation2 + $0x130] sm:$0xff]  ;;  %v218_v23 = vld [vmem:[#allocation2 + $0x138] sm:$0xff] }
 0x135   :  { %2622 = vmatpush1.bf16.msra.mxu0 %v5776_v43  ;;  %2745 = vmatpush1.bf16.msra.mxu1 %v5778_v45  ;;  %v5832_v43 = vcombine.low %v547_v28, %v551_v29  ;;  %v5834_v45 = vcombine.low %v548_v30, %v552_v33  ;;  %v221_v28 = vld [vmem:[#allocation2 + $0x150] sm:$0xff]  ;;  %v222_v29 = vld [vmem:[#allocation2 + $0x158] sm:$0xff]  ;;  %v5503_v30 = vcombine.high %v214_v21, %v218_v23 }
 0x136   :  { %2623 = vmatprep.subr.bf16.mxu0 %v5785_v46  ;;  %2746 = vmatprep.subr.bf16.mxu1 %v5787_v50  ;;  %v5841_v46 = vcombine.high %v555_v37, %v559_v38  ;;  %v5843_v50 = vcombine.high %v556_v39, %v560_v41  ;;  %v5500_v33 = vcombine.low %v213_v59, %v217_v20 }
 0x139   :  { %2624 = vmatpush1.bf16.msra.mxu0 %v5784_v16  ;;  %2747 = vmatpush1.bf16.msra.mxu1 %v5786_v54  ;;  %v5840_v16 = vcombine.low %v555_v37, %v559_v38  ;;  %v5842_v54 = vcombine.low %v556_v39, %v560_v41  ;;  %v233_v37 = vld [vmem:[#allocation2 + $0x1b0] sm:$0xff]  ;;  %v230_v38 = vld [vmem:[#allocation2 + $0x198] sm:$0xff] }
 0x13a   :  { %2625 = vmatprep.subr.bf16.mxu0 %v5793_v55  ;;  %2748 = vmatprep.subr.bf16.mxu1 %v5795_v60  ;;  %v5469_v55 = vcombine.high %v181_v47, %v185_v48  ;;  %v5471_v60 = vcombine.high %v182_v49, %v186_v51 }
 0x13d   :  { %2626 = vmatpush1.bf16.msra.mxu0 %v5792_v62  ;;  %2749 = vmatpush1.bf16.msra.mxu1 %v5794_v0  ;;  %v7214_v62 = vpack.c.bf16 %v7198_v32, %v7198_v32  ;;  %v5468_v0 = vcombine.low %v181_v47, %v185_v48  ;;  %v5478_v32 = vcombine.low %v190_v58, %v194_v61  ;;  %v241_v47 = vld [vmem:[#allocation2 + $0x1f0] sm:$0xff]  ;;  %v238_v48 = vld [vmem:[#allocation2 + $0x1d8] sm:$0xff] }
 0x13e   :  { %2627 = vmatprep.subr.bf16.mxu0 %v5801_v1  ;;  %2750 = vmatprep.subr.bf16.mxu1 %v5803_v5  ;;  %v5470_v1 = vcombine.low %v182_v49, %v186_v51  ;;  %v198_v5 = vld [vmem:[#allocation2 + $0x98] sm:$0xff] }
 0x141   :  { %2628 = vmatpush1.bf16.msra.mxu0 %v5800_v7  ;;  %2751 = vmatpush1.bf16.msra.mxu1 %v5802_v8  ;;  %v202_v7 = vld [vmem:[#allocation2 + $0xb8] sm:$0xff]  ;;  %v5476_v8 = vcombine.low %v189_v56, %v193_v57  ;;  %v249_v56 = vld [vmem:[#allocation2 + $0x230] sm:$0xff] }
 0x142   :  { %2629 = vmatprep.subr.bf16.mxu0 %v5809_v10  ;;  %2752 = vmatprep.subr.bf16.mxu1 %v5811_v14  ;;  %v5485_v10 = vcombine.high %v197_v3, %v201_v4  ;;  %v5487_v14 = vcombine.high %v198_v5, %v202_v7  ;;  %v246_v57 = vld [vmem:[#allocation2 + $0x218] sm:$0xff] }
 0x145   :  { %2630 = vmatpush1.bf16.msra.mxu0 %v5808_v17  ;;  %2753 = vmatpush1.bf16.msra.mxu1 %v5810_v18  ;;  %v5484_v17 = vcombine.low %v197_v3, %v201_v4  ;;  %v5486_v18 = vcombine.low %v198_v5, %v202_v7  ;;  %v257_v3 = vld [vmem:[#allocation2 + $0x270] sm:$0xff]  ;;  %v254_v4 = vld [vmem:[#allocation2 + $0x258] sm:$0xff] }
 0x146   :  { %2631 = vmatprep.subr.bf16.mxu0 %v5817_v19  ;;  %2754 = vmatprep.subr.bf16.mxu1 %v5819_v22  ;;  %v5493_v19 = vcombine.high %v205_v11, %v209_v12  ;;  %v5495_v22 = vcombine.high %v206_v13, %v210_v15 }
 0x149   :  { %2632 = vmatpush1.bf16.msra.mxu0 %v5816_v24  ;;  %2755 = vmatpush1.bf16.msra.mxu1 %v5818_v26  ;;  %v5492_v24 = vcombine.low %v205_v11, %v209_v12  ;;  %v5494_v26 = vcombine.low %v206_v13, %v210_v15  ;;  %v265_v11 = vld [vmem:[#allocation2 + $0x2b0] sm:$0xff]  ;;  %v262_v12 = vld [vmem:[#allocation2 + $0x298] sm:$0xff] }
 0x14a   :  { %2633 = vmatprep.subr.bf16.mxu0 %v5825_v27  ;;  %2756 = vmatprep.subr.bf16.mxu1 %v5827_v31  ;;  %v5501_v27 = vcombine.high %v213_v59, %v217_v20  ;;  %v226_v31 = vld [vmem:[#allocation2 + $0x178] sm:$0xff]  ;;  %v273_v59 = vld [vmem:[#allocation2 + $0x2f0] sm:$0xff] }
 0x14b   :  { %v5511_v39 = vcombine.high %v222_v29, %v226_v31  ;;  %v270_v20 = vld [vmem:[#allocation2 + $0x2d8] sm:$0xff] }
 0x14d   :  { %2634 = vmatpush1.bf16.msra.mxu0 %v5824_v34  ;;  %2757 = vmatpush1.bf16.msra.mxu1 %v5826_v35  ;;  %v5502_v34 = vcombine.low %v214_v21, %v218_v23 }
 0x14e   :  { %2635 = vmatprep.subr.bf16.mxu0 %v5833_v63  ;;  %2758 = vmatprep.subr.bf16.mxu1 %v5835_v40  ;;  %v229_v63 = vld [vmem:[#allocation2 + $0x190] sm:$0xff]  ;;  %v234_v40 = vld [vmem:[#allocation2 + $0x1b8] sm:$0xff] }
 0x14f   :  { %v5519_v49 = vcombine.high %v230_v38, %v234_v40  ;;  %v5516_v51 = vcombine.low %v229_v63, %v233_v37 }
 0x151   :  { %2636 = vmatpush1.bf16.msra.mxu0 %v5832_v43  ;;  %2759 = vmatpush1.bf16.msra.mxu1 %v5834_v45  ;;  %v5510_v43 = vcombine.low %v222_v29, %v226_v31  ;;  %v5517_v45 = vcombine.high %v229_v63, %v233_v37  ;;  %v278_v29 = vld [vmem:[#allocation2 + $0x318] sm:$0xff]  ;;  %v285_v63 = vld [vmem:[#allocation2 + $0x350] sm:$0xff] }
 0x152   :  { %2637 = vmatprep.subr.bf16.mxu0 %v5841_v46  ;;  %2760 = vmatprep.subr.bf16.mxu1 %v5843_v50  ;;  %v237_v46 = vld [vmem:[#allocation2 + $0x1d0] sm:$0xff]  ;;  %v242_v50 = vld [vmem:[#allocation2 + $0x1f8] sm:$0xff] }
 0x153   :  { %v5527_v58 = vcombine.high %v238_v48, %v242_v50  ;;  %v5524_v61 = vcombine.low %v237_v46, %v241_v47  ;;  %v289_v37 = vld [vmem:[#allocation2 + $0x370] sm:$0xff] }
 0x155   :  { %2638 = vmatpush1.bf16.msra.mxu0 %v5840_v16  ;;  %2761 = vmatpush1.bf16.msra.mxu1 %v5842_v54  ;;  %v5518_v16 = vcombine.low %v230_v38, %v234_v40  ;;  %v5525_v54 = vcombine.high %v237_v46, %v241_v47  ;;  %v286_v38 = vld [vmem:[#allocation2 + $0x358] sm:$0xff]  ;;  %v293_v46 = vld [vmem:[#allocation2 + $0x390] sm:$0xff] }
 0x156   :  { %2771 = vmatprep.subr.bf16.mxu0 %v5469_v55  ;;  %2894 = vmatprep.subr.bf16.mxu1 %v5471_v60  ;;  %v245_v55 = vld [vmem:[#allocation2 + $0x210] sm:$0xff]  ;;  %v250_v60 = vld [vmem:[#allocation2 + $0x238] sm:$0xff] }
 0x157   :  { %v5535_v5 = vcombine.high %v246_v57, %v250_v60  ;;  %v5532_v7 = vcombine.low %v245_v55, %v249_v56  ;;  %v297_v47 = vld [vmem:[#allocation2 + $0x3b0] sm:$0xff] }
 0x158   :  { %2640 = vmatmul.mubr.bf16.vlgmr.msra.gmra.mrb[0].mxu0 %v7214_v62  ;;  %2763 = vmatmul.mubr.bf16.vlgmr.msra.gmra.mrb[0].mxu1 %v7214_v62 }
 0x159   :  { %2772 = vmatpush1.bf16.msra.mxu0 %v5468_v0  ;;  %2895 = vmatpush1.bf16.msra.mxu1 %v5470_v1  ;;  %v5526_v0 = vcombine.low %v238_v48, %v242_v50  ;;  %v5533_v1 = vcombine.high %v245_v55, %v249_v56  ;;  %v294_v48 = vld [vmem:[#allocation2 + $0x398] sm:$0xff]  ;;  %v5572_v50 = vcombine.low %v285_v63, %v289_v37  ;;  %v301_v55 = vld [vmem:[#allocation2 + $0x3d0] sm:$0xff] }
 0x15a   :  { %2773 = vmatprep.subr.bf16.mxu0 %v5477_v2  ;;  %2896 = vmatprep.subr.bf16.mxu1 %v5479_v6  ;;  %v253_v2 = vld [vmem:[#allocation2 + $0x250] sm:$0xff]  ;;  %v258_v6 = vld [vmem:[#allocation2 + $0x278] sm:$0xff] }
 0x15b   :  { %2803 = vmatprep.mubr.bf16.mxu0 %v7174_v9  ;;  %2926 = vmatprep.mubr.bf16.mxu1 %v7174_v9  ;;  %v225_v9 = vld [vmem:[#allocation2 + $0x170] sm:$0xff]  ;;  %v5543_v13 = vcombine.high %v254_v4, %v258_v6  ;;  %v5540_v15 = vcombine.low %v253_v2, %v257_v3 }
 0x15c   :  { %v5509_v35 = vcombine.high %v221_v28, %v225_v9  ;;  %v5508_v41 = vcombine.low %v221_v28, %v225_v9  ;;  %v277_v28 = vld [vmem:[#allocation2 + $0x310] sm:$0xff] }
 0x15d   :  { %2774 = vmatpush1.bf16.msra.mxu0 %v5476_v8  ;;  %2897 = vmatpush1.bf16.msra.mxu1 %v5478_v32  ;;  %v5534_v8 = vcombine.low %v246_v57, %v250_v60  ;;  %v5541_v32 = vcombine.high %v253_v2, %v257_v3  ;;  %v281_v9 = vld [vmem:[#allocation2 + $0x330] sm:$0xff]  ;;  %v302_v57 = vld [vmem:[#allocation2 + $0x3d8] sm:$0xff]  ;;  %v5580_v60 = vcombine.low %v293_v46, %v297_v47 }
 0x15e   :  { %2775 = vmatprep.subr.bf16.mxu0 %v5485_v10  ;;  %2898 = vmatprep.subr.bf16.mxu1 %v5487_v14  ;;  %v261_v10 = vld [vmem:[#allocation2 + $0x290] sm:$0xff]  ;;  %v266_v14 = vld [vmem:[#allocation2 + $0x2b8] sm:$0xff]  ;;  %v5564_v40 = vcombine.low %v277_v28, %v281_v9 }
 0x15f   :  { %v5551_v21 = vcombine.high %v262_v12, %v266_v14  ;;  %v5548_v23 = vcombine.low %v261_v10, %v265_v11  ;;  %v305_v56 = vld [vmem:[#allocation2 + $0x3f0] sm:$0xff] }
 0x160   :  { %v309_v2 = vld [vmem:[#allocation2 + $0x410] sm:$0xff] }
 0x161   :  { %2776 = vmatpush1.bf16.msra.mxu0 %v5484_v17  ;;  %2899 = vmatpush1.bf16.msra.mxu1 %v5486_v18  ;;  %v5542_v17 = vcombine.low %v254_v4, %v258_v6  ;;  %v5549_v18 = vcombine.high %v261_v10, %v265_v11  ;;  %v313_v3 = vld [vmem:[#allocation2 + $0x430] sm:$0xff]  ;;  %v310_v4 = vld [vmem:[#allocation2 + $0x418] sm:$0xff]  ;;  %v5588_v6 = vcombine.low %v301_v55, %v305_v56 }
 0x162   :  { %2777 = vmatprep.subr.bf16.mxu0 %v5493_v19  ;;  %2900 = vmatprep.subr.bf16.mxu1 %v5495_v22  ;;  %v269_v19 = vld [vmem:[#allocation2 + $0x2d0] sm:$0xff]  ;;  %v274_v22 = vld [vmem:[#allocation2 + $0x2f8] sm:$0xff] }
 0x163   :  { %v5556_v31 = vcombine.low %v269_v19, %v273_v59  ;;  %v317_v10 = vld [vmem:[#allocation2 + $0x450] sm:$0xff] }
 0x164   :  { %v321_v11 = vld [vmem:[#allocation2 + $0x470] sm:$0xff] }
 0x165   :  { %2778 = vmatpush1.bf16.msra.mxu0 %v5492_v24  ;;  %2901 = vmatpush1.bf16.msra.mxu1 %v5494_v26  ;;  %v5550_v24 = vcombine.low %v262_v12, %v266_v14  ;;  %v5557_v26 = vcombine.high %v269_v19, %v273_v59  ;;  %v318_v12 = vld [vmem:[#allocation2 + $0x458] sm:$0xff]  ;;  %v5596_v14 = vcombine.low %v309_v2, %v313_v3  ;;  %v325_v19 = vld [vmem:[#allocation2 + $0x490] sm:$0xff] }
 0x166   :  { %2779 = vmatprep.subr.bf16.mxu0 %v5501_v27  ;;  %2902 = vmatprep.subr.bf16.mxu1 %v5503_v30  ;;  %v5559_v27 = vcombine.high %v270_v20, %v274_v22  ;;  %v282_v30 = vld [vmem:[#allocation2 + $0x338] sm:$0xff]  ;;  %v329_v59 = vld [vmem:[#allocation2 + $0x4b0] sm:$0xff] }
 0x169   :  { %2780 = vmatpush1.bf16.msra.mxu0 %v5500_v33  ;;  %2903 = vmatpush1.bf16.msra.mxu1 %v5502_v34  ;;  %v5558_v33 = vcombine.low %v270_v20, %v274_v22  ;;  %v5565_v34 = vcombine.high %v277_v28, %v281_v9  ;;  %v326_v20 = vld [vmem:[#allocation2 + $0x498] sm:$0xff]  ;;  %v5604_v22 = vcombine.low %v317_v10, %v321_v11  ;;  %v337_v28 = vld [vmem:[#allocation2 + $0x4f0] sm:$0xff] }
 0x16a   :  { %2781 = vmatprep.subr.bf16.mxu0 %v5509_v35  ;;  %2904 = vmatprep.subr.bf16.mxu1 %v5511_v39  ;;  %v5567_v35 = vcombine.high %v278_v29, %v282_v30  ;;  %v290_v39 = vld [vmem:[#allocation2 + $0x378] sm:$0xff] }
 0x16b   :  { %v334_v9 = vld [vmem:[#allocation2 + $0x4d8] sm:$0xff] }
 0x16d   :  { %2782 = vmatpush1.bf16.msra.mxu0 %v5508_v41  ;;  %2905 = vmatpush1.bf16.msra.mxu1 %v5510_v43  ;;  %v5566_v41 = vcombine.low %v278_v29, %v282_v30  ;;  %v5573_v43 = vcombine.high %v285_v63, %v289_v37  ;;  %v338_v29 = vld [vmem:[#allocation2 + $0x4f8] sm:$0xff]  ;;  %v5612_v30 = vcombine.low %v325_v19, %v329_v59 }
 0x16e   :  { %2783 = vmatprep.subr.bf16.mxu0 %v5517_v45  ;;  %2906 = vmatprep.subr.bf16.mxu1 %v5519_v49  ;;  %v5575_v45 = vcombine.high %v286_v38, %v290_v39  ;;  %v298_v49 = vld [vmem:[#allocation2 + $0x3b8] sm:$0xff] }
 0x16f   :  { %v342_v63 = vld [vmem:[#allocation2 + $0x518] sm:$0xff] }
 0x170   :  { %v346_v37 = vld [vmem:[#allocation2 + $0x538] sm:$0xff] }
 0x171   :  { %2784 = vmatpush1.bf16.msra.mxu0 %v5516_v51  ;;  %2907 = vmatpush1.bf16.msra.mxu1 %v5518_v16  ;;  %v5574_v51 = vcombine.low %v286_v38, %v290_v39  ;;  %v5581_v16 = vcombine.high %v293_v46, %v297_v47  ;;  %v5622_v39 = vcombine.low %v334_v9, %v338_v29  ;;  %v354_v46 = vld [vmem:[#allocation2 + $0x578] sm:$0xff] }
 0x172   :  { %2785 = vmatprep.subr.bf16.mxu0 %v5525_v54  ;;  %2908 = vmatprep.subr.bf16.mxu1 %v5527_v58  ;;  %v5583_v54 = vcombine.high %v294_v48, %v298_v49  ;;  %v306_v58 = vld [vmem:[#allocation2 + $0x3f8] sm:$0xff] }
 0x175   :  { %2786 = vmatpush1.bf16.msra.mxu0 %v5524_v61  ;;  %2909 = vmatpush1.bf16.msra.mxu1 %v5526_v0  ;;  %v5582_v61 = vcombine.low %v294_v48, %v298_v49  ;;  %v5589_v0 = vcombine.high %v301_v55, %v305_v56  ;;  %v5630_v48 = vcombine.low %v342_v63, %v346_v37  ;;  %v362_v55 = vld [vmem:[#allocation2 + $0x5b8] sm:$0xff] }
 0x176   :  { %2787 = vmatprep.subr.bf16.mxu0 %v5533_v1  ;;  %2910 = vmatprep.subr.bf16.mxu1 %v5535_v5  ;;  %v5591_v1 = vcombine.high %v302_v57, %v306_v58  ;;  %v314_v5 = vld [vmem:[#allocation2 + $0x438] sm:$0xff] }
 0x179   :  { %2788 = vmatpush1.bf16.msra.mxu0 %v5532_v7  ;;  %2911 = vmatpush1.bf16.msra.mxu1 %v5534_v8  ;;  %v5590_v7 = vcombine.low %v302_v57, %v306_v58  ;;  %v5597_v8 = vcombine.high %v309_v2, %v313_v3  ;;  %v370_v2 = vld [vmem:[#allocation2 + $0x5f8] sm:$0xff] }
 0x17a   :  { %2789 = vmatprep.subr.bf16.mxu0 %v5541_v32  ;;  %2912 = vmatprep.subr.bf16.mxu1 %v5543_v13  ;;  %v5599_v32 = vcombine.high %v310_v4, %v314_v5  ;;  %v322_v13 = vld [vmem:[#allocation2 + $0x478] sm:$0xff] }
 0x17d   :  { %2790 = vmatpush1.bf16.msra.mxu0 %v5540_v15  ;;  %2913 = vmatpush1.bf16.msra.mxu1 %v5542_v17  ;;  %v5598_v15 = vcombine.low %v310_v4, %v314_v5  ;;  %v5605_v17 = vcombine.high %v317_v10, %v321_v11  ;;  %v378_v10 = vld [vmem:[#allocation2 + $0x638] sm:$0xff] }
 0x17e   :  { %2791 = vmatprep.subr.bf16.mxu0 %v5549_v18  ;;  %2914 = vmatprep.subr.bf16.mxu1 %v5551_v21  ;;  %v5607_v18 = vcombine.high %v318_v12, %v322_v13  ;;  %v330_v21 = vld [vmem:[#allocation2 + $0x4b8] sm:$0xff] }
 0x181   :  { %2792 = vmatpush1.bf16.msra.mxu0 %v5548_v23  ;;  %2915 = vmatpush1.bf16.msra.mxu1 %v5550_v24  ;;  %v5606_v23 = vcombine.low %v318_v12, %v322_v13  ;;  %v5613_v24 = vcombine.high %v325_v19, %v329_v59  ;;  %v386_v19 = vld [vmem:[#allocation2 + $0x678] sm:$0xff] }
 0x182   :  { %2793 = vmatprep.subr.bf16.mxu0 %v5557_v26  ;;  %2916 = vmatprep.subr.bf16.mxu1 %v5559_v27  ;;  %v5615_v26 = vcombine.high %v326_v20, %v330_v21  ;;  %v333_v27 = vld [vmem:[#allocation2 + $0x4d0] sm:$0xff] }
 0x183   :  { %v5620_v38 = vcombine.low %v333_v27, %v337_v28 }
 0x185   :  { %2794 = vmatpush1.bf16.msra.mxu0 %v5556_v31  ;;  %2917 = vmatpush1.bf16.msra.mxu1 %v5558_v33  ;;  %v5621_v31 = vcombine.high %v333_v27, %v337_v28  ;;  %v5623_v33 = vcombine.high %v334_v9, %v338_v29  ;;  %v394_v27 = vld [vmem:[#allocation2 + $0x6b8] sm:$0xff] }
 0x186   :  { %2795 = vmatprep.subr.bf16.mxu0 %v5565_v34  ;;  %2918 = vmatprep.subr.bf16.mxu1 %v5567_v35  ;;  %v341_v34 = vld [vmem:[#allocation2 + $0x510] sm:$0xff] }
 0x187   :  { %v345_v35 = vld [vmem:[#allocation2 + $0x530] sm:$0xff] }
 0x188   :  { %v5628_v47 = vcombine.low %v341_v34, %v345_v35 }
 0x189   :  { %2796 = vmatpush1.bf16.msra.mxu0 %v5564_v40  ;;  %2919 = vmatpush1.bf16.msra.mxu1 %v5566_v41  ;;  %v5629_v40 = vcombine.high %v341_v34, %v345_v35  ;;  %v349_v41 = vld [vmem:[#allocation2 + $0x550] sm:$0xff]  ;;  %v402_v34 = vld [vmem:[#allocation2 + $0x6f8] sm:$0xff] }
 0x18a   :  { %2797 = vmatprep.subr.bf16.mxu0 %v5573_v43  ;;  %2920 = vmatprep.subr.bf16.mxu1 %v5575_v45  ;;  %v353_v43 = vld [vmem:[#allocation2 + $0x570] sm:$0xff]  ;;  %v350_v45 = vld [vmem:[#allocation2 + $0x558] sm:$0xff] }
 0x18b   :  { %v5637_v49 = vcombine.high %v349_v41, %v353_v43  ;;  %v5636_v56 = vcombine.low %v349_v41, %v353_v43  ;;  %v5638_v57 = vcombine.low %v350_v45, %v354_v46  ;;  %v410_v41 = vld [vmem:[#allocation2 + $0x738] sm:$0xff] }
 0x18d   :  { %2798 = vmatpush1.bf16.msra.mxu0 %v5572_v50  ;;  %2921 = vmatpush1.bf16.msra.mxu1 %v5574_v51  ;;  %v5639_v50 = vcombine.high %v350_v45, %v354_v46  ;;  %v357_v51 = vld [vmem:[#allocation2 + $0x590] sm:$0xff] }
 0x18e   :  { %2799 = vmatprep.subr.bf16.mxu0 %v5581_v16  ;;  %2922 = vmatprep.subr.bf16.mxu1 %v5583_v54  ;;  %v361_v16 = vld [vmem:[#allocation2 + $0x5b0] sm:$0xff]  ;;  %v358_v54 = vld [vmem:[#allocation2 + $0x598] sm:$0xff] }
 0x18f   :  { %v5645_v58 = vcombine.high %v357_v51, %v361_v16  ;;  %v5644_v3 = vcombine.low %v357_v51, %v361_v16  ;;  %v5646_v4 = vcombine.low %v358_v54, %v362_v55  ;;  %v418_v51 = vld [vmem:[#allocation2 + $0x778] sm:$0xff] }
 0x191   :  { %2800 = vmatpush1.bf16.msra.mxu0 %v5580_v60  ;;  %2923 = vmatpush1.bf16.msra.mxu1 %v5582_v61  ;;  %v5647_v60 = vcombine.high %v358_v54, %v362_v55  ;;  %v365_v61 = vld [vmem:[#allocation2 + $0x5d0] sm:$0xff] }
 0x192   :  { %2801 = vmatprep.subr.bf16.mxu0 %v5589_v0  ;;  %2924 = vmatprep.subr.bf16.mxu1 %v5591_v1  ;;  %v369_v0 = vld [vmem:[#allocation2 + $0x5f0] sm:$0xff]  ;;  %v366_v1 = vld [vmem:[#allocation2 + $0x5d8] sm:$0xff] }
 0x193   :  { %v5653_v5 = vcombine.high %v365_v61, %v369_v0  ;;  %v5652_v11 = vcombine.low %v365_v61, %v369_v0  ;;  %v5654_v12 = vcombine.low %v366_v1, %v370_v2  ;;  %v426_v61 = vld [vmem:[#allocation2 + $0x7b8] sm:$0xff] }
 0x195   :  { %2802 = vmatpush1.bf16.msra.mxu0 %v5588_v6  ;;  %2925 = vmatpush1.bf16.msra.mxu1 %v5590_v7  ;;  %v5655_v6 = vcombine.high %v366_v1, %v370_v2  ;;  %v373_v7 = vld [vmem:[#allocation2 + $0x610] sm:$0xff] }
 0x196   :  { %2812 = vmatprep.subr.bf16.mxu0 %v5597_v8  ;;  %2935 = vmatprep.subr.bf16.mxu1 %v5599_v32  ;;  %v377_v8 = vld [vmem:[#allocation2 + $0x630] sm:$0xff]  ;;  %v374_v32 = vld [vmem:[#allocation2 + $0x618] sm:$0xff] }
 0x197   :  { %v5661_v13 = vcombine.high %v373_v7, %v377_v8  ;;  %v5660_v59 = vcombine.low %v373_v7, %v377_v8  ;;  %v434_v7 = vld [vmem:[#allocation2 + $0x7f8] sm:$0xff] }
 0x198   :  { %2804 = vmatmul.mubr.bf16.vlgmr.msra.gmra.mrb[4].mxu0 %v7187_v25  ;;  %2927 = vmatmul.mubr.bf16.vlgmr.msra.gmra.mrb[4].mxu1 %v7187_v25  ;;  %v5614_v25 = vcombine.low %v326_v20, %v330_v21  ;;  %v5662_v20 = vcombine.low %v374_v32, %v378_v10 }
 0x199   :  { %2813 = vmatpush1.bf16.msra.mxu0 %v5596_v14  ;;  %2936 = vmatpush1.bf16.msra.mxu1 %v5598_v15  ;;  %v5663_v14 = vcombine.high %v374_v32, %v378_v10  ;;  %v381_v15 = vld [vmem:[#allocation2 + $0x650] sm:$0xff] }
 0x19a   :  { %2814 = vmatprep.subr.bf16.mxu0 %v5605_v17  ;;  %2937 = vmatprep.subr.bf16.mxu1 %v5607_v18  ;;  %v385_v17 = vld [vmem:[#allocation2 + $0x670] sm:$0xff]  ;;  %v382_v18 = vld [vmem:[#allocation2 + $0x658] sm:$0xff] }
 0x19b   :  { %2844 = vmatprep.mubr.bf16.mxu0 %v7189_v36  ;;  %2967 = vmatprep.mubr.bf16.mxu1 %v7189_v36  ;;  %v5631_v36 = vcombine.high %v342_v63, %v346_v37  ;;  %v5669_v21 = vcombine.high %v381_v15, %v385_v17  ;;  %v5668_v28 = vcombine.low %v381_v15, %v385_v17  ;;  %v442_v15 = vld [vmem:[#allocation2 + $0x838] sm:$0xff] }
 0x19c   :  { %v5670_v9 = vcombine.low %v382_v18, %v386_v19 }
 0x19d   :  { %2815 = vmatpush1.bf16.msra.mxu0 %v5604_v22  ;;  %2938 = vmatpush1.bf16.msra.mxu1 %v5606_v23  ;;  %v5671_v22 = vcombine.high %v382_v18, %v386_v19  ;;  %v389_v23 = vld [vmem:[#allocation2 + $0x690] sm:$0xff] }
 0x19e   :  { %2816 = vmatprep.subr.bf16.mxu0 %v5613_v24  ;;  %2939 = vmatprep.subr.bf16.mxu1 %v5615_v26  ;;  %v393_v24 = vld [vmem:[#allocation2 + $0x6b0] sm:$0xff]  ;;  %v390_v26 = vld [vmem:[#allocation2 + $0x698] sm:$0xff] }
 0x19f   :  { %v5677_v29 = vcombine.high %v389_v23, %v393_v24  ;;  %v5676_v35 = vcombine.low %v389_v23, %v393_v24  ;;  %v5678_v63 = vcombine.low %v390_v26, %v394_v27  ;;  %v450_v23 = vld [vmem:[#allocation2 + $0x878] sm:$0xff] }
 0x1a1   :  { %2817 = vmatpush1.bf16.msra.mxu0 %v5612_v30  ;;  %2940 = vmatpush1.bf16.msra.mxu1 %v5614_v25  ;;  %v5679_v30 = vcombine.high %v390_v26, %v394_v27  ;;  %v397_v25 = vld [vmem:[#allocation2 + $0x6d0] sm:$0xff] }
 0x1a2   :  { %2818 = vmatprep.subr.bf16.mxu0 %v5621_v31  ;;  %2941 = vmatprep.subr.bf16.mxu1 %v5623_v33  ;;  %v401_v31 = vld [vmem:[#allocation2 + $0x6f0] sm:$0xff]  ;;  %v398_v33 = vld [vmem:[#allocation2 + $0x6d8] sm:$0xff] }
 0x1a3   :  { %v5685_v37 = vcombine.high %v397_v25, %v401_v31  ;;  %v5684_v43 = vcombine.low %v397_v25, %v401_v31  ;;  %v5686_v45 = vcombine.low %v398_v33, %v402_v34  ;;  %v458_v25 = vld [vmem:[#allocation2 + $0x8b8] sm:$0xff] }
 0x1a5   :  { %2819 = vmatpush1.bf16.msra.mxu0 %v5620_v38  ;;  %2942 = vmatpush1.bf16.msra.mxu1 %v5622_v39  ;;  %v5687_v38 = vcombine.high %v398_v33, %v402_v34  ;;  %v405_v39 = vld [vmem:[#allocation2 + $0x710] sm:$0xff] }
 0x1a6   :  { %2820 = vmatprep.subr.bf16.mxu0 %v5629_v40  ;;  %2943 = vmatprep.subr.bf16.mxu1 %v5631_v36  ;;  %v409_v40 = vld [vmem:[#allocation2 + $0x730] sm:$0xff]  ;;  %v406_v36 = vld [vmem:[#allocation2 + $0x718] sm:$0xff] }
 0x1a7   :  { %v5693_v46 = vcombine.high %v405_v39, %v409_v40  ;;  %v5692_v16 = vcombine.low %v405_v39, %v409_v40  ;;  %v5694_v54 = vcombine.low %v406_v36, %v410_v41  ;;  %v466_v39 = vld [vmem:[#allocation2 + $0x8f8] sm:$0xff] }
 0x1a9   :  { %2821 = vmatpush1.bf16.msra.mxu0 %v5628_v47  ;;  %2944 = vmatpush1.bf16.msra.mxu1 %v5630_v48  ;;  %v5695_v47 = vcombine.high %v406_v36, %v410_v41  ;;  %v413_v48 = vld [vmem:[#allocation2 + $0x750] sm:$0xff] }
 0x1aa   :  { %2822 = vmatprep.subr.bf16.mxu0 %v5637_v49  ;;  %2945 = vmatprep.subr.bf16.mxu1 %v5639_v50  ;;  %v417_v49 = vld [vmem:[#allocation2 + $0x770] sm:$0xff]  ;;  %v414_v50 = vld [vmem:[#allocation2 + $0x758] sm:$0xff] }
 0x1ab   :  { %v5701_v55 = vcombine.high %v413_v48, %v417_v49  ;;  %v5700_v0 = vcombine.low %v413_v48, %v417_v49  ;;  %v5702_v1 = vcombine.low %v414_v50, %v418_v51 }
 0x1ad   :  { %2823 = vmatpush1.bf16.msra.mxu0 %v5636_v56  ;;  %2946 = vmatpush1.bf16.msra.mxu1 %v5638_v57  ;;  %v5703_v56 = vcombine.high %v414_v50, %v418_v51  ;;  %v421_v57 = vld [vmem:[#allocation2 + $0x790] sm:$0xff] }
 0x1ae   :  { %2824 = vmatprep.subr.bf16.mxu0 %v5645_v58  ;;  %2947 = vmatprep.subr.bf16.mxu1 %v5647_v60  ;;  %v425_v58 = vld [vmem:[#allocation2 + $0x7b0] sm:$0xff]  ;;  %v422_v60 = vld [vmem:[#allocation2 + $0x798] sm:$0xff] }
 0x1af   :  { %v5709_v2 = vcombine.high %v421_v57, %v425_v58  ;;  %v5708_v8 = vcombine.low %v421_v57, %v425_v58  ;;  %v5710_v32 = vcombine.low %v422_v60, %v426_v61  ;;  %v477_v51 = vld [vmem:[#allocation2 + $0x950] sm:$0xff] }
 0x1b1   :  { %2825 = vmatpush1.bf16.msra.mxu0 %v5644_v3  ;;  %2948 = vmatpush1.bf16.msra.mxu1 %v5646_v4  ;;  %v5711_v3 = vcombine.high %v422_v60, %v426_v61  ;;  %v429_v4 = vld [vmem:[#allocation2 + $0x7d0] sm:$0xff] }
 0x1b2   :  { %2826 = vmatprep.subr.bf16.mxu0 %v5653_v5  ;;  %2949 = vmatprep.subr.bf16.mxu1 %v5655_v6  ;;  %v433_v5 = vld [vmem:[#allocation2 + $0x7f0] sm:$0xff]  ;;  %v430_v6 = vld [vmem:[#allocation2 + $0x7d8] sm:$0xff] }
 0x1b3   :  { %v5717_v10 = vcombine.high %v429_v4, %v433_v5  ;;  %v5716_v17 = vcombine.low %v429_v4, %v433_v5  ;;  %v5718_v18 = vcombine.low %v430_v6, %v434_v7  ;;  %v485_v61 = vld [vmem:[#allocation2 + $0x990] sm:$0xff] }
 0x1b5   :  { %2827 = vmatpush1.bf16.msra.mxu0 %v5652_v11  ;;  %2950 = vmatpush1.bf16.msra.mxu1 %v5654_v12  ;;  %v5719_v11 = vcombine.high %v430_v6, %v434_v7  ;;  %v437_v12 = vld [vmem:[#allocation2 + $0x810] sm:$0xff] }
 0x1b6   :  { %2828 = vmatprep.subr.bf16.mxu0 %v5661_v13  ;;  %2951 = vmatprep.subr.bf16.mxu1 %v5663_v14  ;;  %v441_v13 = vld [vmem:[#allocation2 + $0x830] sm:$0xff]  ;;  %v438_v14 = vld [vmem:[#allocation2 + $0x818] sm:$0xff] }
 0x1b7   :  { %v5725_v19 = vcombine.high %v437_v12, %v441_v13  ;;  %v5724_v24 = vcombine.low %v437_v12, %v441_v13  ;;  %v5726_v26 = vcombine.low %v438_v14, %v442_v15  ;;  %v493_v7 = vld [vmem:[#allocation2 + $0x9d0] sm:$0xff] }
 0x1b9   :  { %2829 = vmatpush1.bf16.msra.mxu0 %v5660_v59  ;;  %2952 = vmatpush1.bf16.msra.mxu1 %v5662_v20  ;;  %v5727_v59 = vcombine.high %v438_v14, %v442_v15  ;;  %v445_v20 = vld [vmem:[#allocation2 + $0x850] sm:$0xff] }
 0x1ba   :  { %2830 = vmatprep.subr.bf16.mxu0 %v5669_v21  ;;  %2953 = vmatprep.subr.bf16.mxu1 %v5671_v22  ;;  %v449_v21 = vld [vmem:[#allocation2 + $0x870] sm:$0xff]  ;;  %v446_v22 = vld [vmem:[#allocation2 + $0x858] sm:$0xff] }
 0x1bb   :  { %v5733_v27 = vcombine.high %v445_v20, %v449_v21  ;;  %v5732_v31 = vcombine.low %v445_v20, %v449_v21  ;;  %v5734_v33 = vcombine.low %v446_v22, %v450_v23  ;;  %v501_v15 = vld [vmem:[#allocation2 + $0xa10] sm:$0xff] }
 0x1bd   :  { %2831 = vmatpush1.bf16.msra.mxu0 %v5668_v28  ;;  %2954 = vmatpush1.bf16.msra.mxu1 %v5670_v9  ;;  %v5735_v28 = vcombine.high %v446_v22, %v450_v23  ;;  %v453_v9 = vld [vmem:[#allocation2 + $0x890] sm:$0xff] }
 0x1be   :  { %2832 = vmatprep.subr.bf16.mxu0 %v5677_v29  ;;  %2955 = vmatprep.subr.bf16.mxu1 %v5679_v30  ;;  %v457_v29 = vld [vmem:[#allocation2 + $0x8b0] sm:$0xff]  ;;  %v454_v30 = vld [vmem:[#allocation2 + $0x898] sm:$0xff] }
 0x1bf   :  { %v5741_v34 = vcombine.high %v453_v9, %v457_v29  ;;  %v5740_v40 = vcombine.low %v453_v9, %v457_v29  ;;  %v509_v23 = vld [vmem:[#allocation2 + $0xa50] sm:$0xff] }
 0x1c1   :  { %2833 = vmatpush1.bf16.msra.mxu0 %v5676_v35  ;;  %2956 = vmatpush1.bf16.msra.mxu1 %v5678_v63  ;;  %v5743_v35 = vcombine.high %v454_v30, %v458_v25  ;;  %v461_v63 = vld [vmem:[#allocation2 + $0x8d0] sm:$0xff] }
 0x1c2   :  { %2834 = vmatprep.subr.bf16.mxu0 %v5685_v37  ;;  %2957 = vmatprep.subr.bf16.mxu1 %v5687_v38  ;;  %v465_v37 = vld [vmem:[#allocation2 + $0x8f0] sm:$0xff]  ;;  %v462_v38 = vld [vmem:[#allocation2 + $0x8d8] sm:$0xff] }
 0x1c3   :  { %v5749_v36 = vcombine.high %v461_v63, %v465_v37  ;;  %v5751_v41 = vcombine.high %v462_v38, %v466_v39  ;;  %v5748_v48 = vcombine.low %v461_v63, %v465_v37  ;;  %v5750_v49 = vcombine.low %v462_v38, %v466_v39  ;;  %v525_v39 = vld [vmem:[#allocation2 + $0xad0] sm:$0xff] }
 0x1c5   :  { %2835 = vmatpush1.bf16.msra.mxu0 %v5684_v43  ;;  %2958 = vmatpush1.bf16.msra.mxu1 %v5686_v45  ;;  %v469_v43 = vld [vmem:[#allocation2 + $0x910] sm:$0xff] }
 0x1c6   :  { %2836 = vmatprep.subr.bf16.mxu0 %v5693_v46  ;;  %2959 = vmatprep.subr.bf16.mxu1 %v5695_v47  ;;  %v473_v45 = vld [vmem:[#allocation2 + $0x930] sm:$0xff]  ;;  %v470_v46 = vld [vmem:[#allocation2 + $0x918] sm:$0xff] }
 0x1c7   :  { %v474_v47 = vld [vmem:[#allocation2 + $0x938] sm:$0xff]  ;;  %v5757_v50 = vcombine.high %v469_v43, %v473_v45 }
 0x1c8   :  { %v5758_v57 = vcombine.low %v470_v46, %v474_v47 }
 0x1c9   :  { %2837 = vmatpush1.bf16.msra.mxu0 %v5692_v16  ;;  %2960 = vmatpush1.bf16.msra.mxu1 %v5694_v54  ;;  %v481_v16 = vld [vmem:[#allocation2 + $0x970] sm:$0xff]  ;;  %v478_v54 = vld [vmem:[#allocation2 + $0x958] sm:$0xff] }
 0x1ca   :  { %2838 = vmatprep.subr.bf16.mxu0 %v5701_v55  ;;  %2961 = vmatprep.subr.bf16.mxu1 %v5703_v56  ;;  %v482_v55 = vld [vmem:[#allocation2 + $0x978] sm:$0xff]  ;;  %v5756_v56 = vcombine.low %v469_v43, %v473_v45  ;;  %v5765_v58 = vcombine.high %v477_v51, %v481_v16 }
 0x1cb   :  { %v5767_v60 = vcombine.high %v478_v54, %v482_v55  ;;  %v5766_v4 = vcombine.low %v478_v54, %v482_v55  ;;  %v541_v55 = vld [vmem:[#allocation2 + $0xb50] sm:$0xff] }
 0x1cd   :  { %2839 = vmatpush1.bf16.msra.mxu0 %v5700_v0  ;;  %2962 = vmatpush1.bf16.msra.mxu1 %v5702_v1  ;;  %v489_v0 = vld [vmem:[#allocation2 + $0x9b0] sm:$0xff]  ;;  %v486_v1 = vld [vmem:[#allocation2 + $0x998] sm:$0xff] }
 0x1ce   :  { %2840 = vmatprep.subr.bf16.mxu0 %v5709_v2  ;;  %2963 = vmatprep.subr.bf16.mxu1 %v5711_v3  ;;  %v490_v2 = vld [vmem:[#allocation2 + $0x9b8] sm:$0xff]  ;;  %v5764_v3 = vcombine.low %v477_v51, %v481_v16  ;;  %v5773_v5 = vcombine.high %v485_v61, %v489_v0 }
 0x1cf   :  { %v5775_v6 = vcombine.high %v486_v1, %v490_v2  ;;  %v5774_v12 = vcombine.low %v486_v1, %v490_v2  ;;  %v549_v2 = vld [vmem:[#allocation2 + $0xb90] sm:$0xff] }
 0x1d1   :  { %2841 = vmatpush1.bf16.msra.mxu0 %v5708_v8  ;;  %2964 = vmatpush1.bf16.msra.mxu1 %v5710_v32  ;;  %v497_v8 = vld [vmem:[#allocation2 + $0x9f0] sm:$0xff]  ;;  %v494_v32 = vld [vmem:[#allocation2 + $0x9d8] sm:$0xff] }
 0x1d2   :  { %2842 = vmatprep.subr.bf16.mxu0 %v5717_v10  ;;  %2965 = vmatprep.subr.bf16.mxu1 %v5719_v11  ;;  %v498_v10 = vld [vmem:[#allocation2 + $0x9f8] sm:$0xff]  ;;  %v5772_v11 = vcombine.low %v485_v61, %v489_v0  ;;  %v5781_v13 = vcombine.high %v493_v7, %v497_v8 }
 0x1d3   :  { %v5783_v14 = vcombine.high %v494_v32, %v498_v10  ;;  %v5782_v20 = vcombine.low %v494_v32, %v498_v10  ;;  %v557_v10 = vld [vmem:[#allocation2 + $0xbd0] sm:$0xff] }
 0x1d5   :  { %2843 = vmatpush1.bf16.msra.mxu0 %v5716_v17  ;;  %2966 = vmatpush1.bf16.msra.mxu1 %v5718_v18  ;;  %v505_v17 = vld [vmem:[#allocation2 + $0xa30] sm:$0xff]  ;;  %v502_v18 = vld [vmem:[#allocation2 + $0xa18] sm:$0xff] }
 0x1d6   :  { %2853 = vmatprep.subr.bf16.mxu0 %v5725_v19  ;;  %2976 = vmatprep.subr.bf16.mxu1 %v5727_v59  ;;  %v506_v19 = vld [vmem:[#allocation2 + $0xa38] sm:$0xff]  ;;  %v5780_v59 = vcombine.low %v493_v7, %v497_v8  ;;  %v5789_v21 = vcombine.high %v501_v15, %v505_v17 }
 0x1d7   :  { %v5791_v22 = vcombine.high %v502_v18, %v506_v19  ;;  %v5790_v9 = vcombine.low %v502_v18, %v506_v19 }
 0x1d8   :  { %2845 = vmatmul.mubr.bf16.vlgmr.msra.gmra.mrb[4].mxu0 %v7204_v42  ;;  %2968 = vmatmul.mubr.bf16.vlgmr.msra.gmra.mrb[4].mxu1 %v7204_v42  ;;  %v5742_v42 = vcombine.low %v454_v30, %v458_v25  ;;  %v517_v25 = vld [vmem:[#allocation2 + $0xa90] sm:$0xff] }
 0x1d9   :  { %2854 = vmatpush1.bf16.msra.mxu0 %v5724_v24  ;;  %2977 = vmatpush1.bf16.msra.mxu1 %v5726_v26  ;;  %v513_v24 = vld [vmem:[#allocation2 + $0xa70] sm:$0xff]  ;;  %v510_v26 = vld [vmem:[#allocation2 + $0xa58] sm:$0xff] }
 0x1da   :  { %2855 = vmatprep.subr.bf16.mxu0 %v5733_v27  ;;  %2978 = vmatprep.subr.bf16.mxu1 %v5735_v28  ;;  %v514_v27 = vld [vmem:[#allocation2 + $0xa78] sm:$0xff]  ;;  %v5788_v28 = vcombine.low %v501_v15, %v505_v17  ;;  %v5797_v29 = vcombine.high %v509_v23, %v513_v24 }
 0x1db   :  { %2885 = vmatprep.mubr.bf16.mxu0 %v7206_v52  ;;  %3008 = vmatprep.mubr.bf16.mxu1 %v7206_v52  ;;  %v5759_v52 = vcombine.high %v470_v46, %v474_v47  ;;  %v5799_v30 = vcombine.high %v510_v26, %v514_v27  ;;  %v5798_v63 = vcombine.low %v510_v26, %v514_v27  ;;  %v533_v47 = vld [vmem:[#allocation2 + $0xb10] sm:$0xff]  ;;  %v6313_v27 = vld [vmem:[#allocation7 + $0x20] ss:$16 sps:$4 sm:$0xff]  }
 0x1dc   :  { %v6318_v26 = vld [vmem:[#allocation7 + $0x2c] ss:$16 sps:$4 sm:$0xff]  }
 0x1dd   :  { %2856 = vmatpush1.bf16.msra.mxu0 %v5732_v31  ;;  %2979 = vmatpush1.bf16.msra.mxu1 %v5734_v33  ;;  %v521_v31 = vld [vmem:[#allocation2 + $0xab0] sm:$0xff]  ;;  %v518_v33 = vld [vmem:[#allocation2 + $0xa98] sm:$0xff] }
 0x1de   :  { %2857 = vmatprep.subr.bf16.mxu0 %v5741_v34  ;;  %2980 = vmatprep.subr.bf16.mxu1 %v5743_v35  ;;  %v522_v34 = vld [vmem:[#allocation2 + $0xab8] sm:$0xff]  ;;  %v5796_v35 = vcombine.low %v509_v23, %v513_v24  ;;  %v5805_v37 = vcombine.high %v517_v25, %v521_v31  ;;  %v6310_v23 = vld [vmem:[#allocation7 + $0x8] ss:$16 sps:$4 sm:$0xff]  }
 0x1df   :  { %v5807_v38 = vcombine.high %v518_v33, %v522_v34  ;;  %v5806_v43 = vcombine.low %v518_v33, %v522_v34  ;;  %v6315_v24 = vld [vmem:[#allocation7 + $0x24] ss:$16 sps:$4 sm:$0xff]   ;;  %v6330_v33 = vld [vmem:[#allocation7 + $0x6c] ss:$16 sps:$4 sm:$0xff]   ;;  %v6325_v34 = vld [vmem:[#allocation7 + $0x60] ss:$16 sps:$4 sm:$0xff]  }
 0x1e1   :  { %2858 = vmatpush1.bf16.msra.mxu0 %v5740_v40  ;;  %2981 = vmatpush1.bf16.msra.mxu1 %v5742_v42  ;;  %v529_v40 = vld [vmem:[#allocation2 + $0xaf0] sm:$0xff]  ;;  %v526_v42 = vld [vmem:[#allocation2 + $0xad8] sm:$0xff] }
 0x1e2   :  { %2859 = vmatprep.subr.bf16.mxu0 %v5749_v36  ;;  %2982 = vmatprep.subr.bf16.mxu1 %v5751_v41  ;;  %v530_v36 = vld [vmem:[#allocation2 + $0xaf8] sm:$0xff]  ;;  %v5804_v41 = vcombine.low %v517_v25, %v521_v31  ;;  %v5813_v45 = vcombine.high %v525_v39, %v529_v40  ;;  %v6322_v25 = vld [vmem:[#allocation7 + $0x48] ss:$16 sps:$4 sm:$0xff]  }
 0x1e3   :  { %v5815_v46 = vcombine.high %v526_v42, %v530_v36  ;;  %v5814_v51 = vcombine.low %v526_v42, %v530_v36  ;;  %v6327_v31 = vld [vmem:[#allocation7 + $0x64] ss:$16 sps:$4 sm:$0xff]   ;;  %v571_v42 = vsub.s32 1, %v7158_v44  ;;  %v6334_v36 = vld [vmem:[#allocation7 + $0x88] ss:$16 sps:$4 sm:$0xff]  }
 0x1e5   :  { %2860 = vmatpush1.bf16.msra.mxu0 %v5748_v48  ;;  %2983 = vmatpush1.bf16.msra.mxu1 %v5750_v49  ;;  %v537_v48 = vld [vmem:[#allocation2 + $0xb30] sm:$0xff]  ;;  %v534_v49 = vld [vmem:[#allocation2 + $0xb18] sm:$0xff] }
 0x1e6   :  { %2861 = vmatprep.subr.bf16.mxu0 %v5757_v50  ;;  %2984 = vmatprep.subr.bf16.mxu1 %v5759_v52  ;;  %v538_v50 = vld [vmem:[#allocation2 + $0xb38] sm:$0xff]  ;;  %v5812_v52 = vcombine.low %v525_v39, %v529_v40  ;;  %v5821_v16 = vcombine.high %v533_v47, %v537_v48  ;;  %v7231_v39 = vld [vmem:[#allocation5] sm:$0xff]  ;;  %v575_v40 = vsub.s32 2, %v7158_v44 }
 0x1e7   :  { %v5823_v54 = vcombine.high %v534_v49, %v538_v50  ;;  %v5822_v61 = vcombine.low %v534_v49, %v538_v50  ;;  %v6337_v49 = vld [vmem:[#allocation7 + $0xa0] ss:$16 sps:$4 sm:$0xff]  }
 0x1e9   :  { %2862 = vmatpush1.bf16.msra.mxu0 %v5756_v56  ;;  %2985 = vmatpush1.bf16.msra.mxu1 %v5758_v57  ;;  %v545_v56 = vld [vmem:[#allocation2 + $0xb70] sm:$0xff]  ;;  %v542_v57 = vld [vmem:[#allocation2 + $0xb58] sm:$0xff] }
 0x1ea   :  { %2863 = vmatprep.subr.bf16.mxu0 %v5765_v58  ;;  %2986 = vmatprep.subr.bf16.mxu1 %v5767_v60  ;;  %v546_v58 = vld [vmem:[#allocation2 + $0xb78] sm:$0xff]  ;;  %v5820_v60 = vcombine.low %v533_v47, %v537_v48  ;;  %v5829_v0 = vcombine.high %v541_v55, %v545_v56  ;;  %v576_v47 = vrot.slane %v7231_v39, %v575_v40 }
 0x1eb   :  { %v5831_v1 = vcombine.high %v542_v57, %v546_v58  ;;  %v5830_v7 = vcombine.low %v542_v57, %v546_v58  ;;  %v572_v48 = vrot.slane %v7231_v39, %v571_v42 }
 0x1ed   :  { %2864 = vmatpush1.bf16.msra.mxu0 %v5764_v3  ;;  %2987 = vmatpush1.bf16.msra.mxu1 %v5766_v4  ;;  %v553_v3 = vld [vmem:[#allocation2 + $0xbb0] sm:$0xff]  ;;  %v550_v4 = vld [vmem:[#allocation2 + $0xb98] sm:$0xff] }
 0x1ee   :  { %2865 = vmatprep.subr.bf16.mxu0 %v5773_v5  ;;  %2988 = vmatprep.subr.bf16.mxu1 %v5775_v6  ;;  %v554_v5 = vld [vmem:[#allocation2 + $0xbb8] sm:$0xff]  ;;  %v5828_v6 = vcombine.low %v541_v55, %v545_v56  ;;  %v5837_v8 = vcombine.high %v549_v2, %v553_v3 }
 0x1ef   :  { %v5839_v32 = vcombine.high %v550_v4, %v554_v5  ;;  %v5838_v15 = vcombine.low %v550_v4, %v554_v5  ;;  %v6346_v5 = vld [vmem:[#allocation7 + $0xc8] ss:$16 sps:$4 sm:$0xff]  }
 0x1f1   :  { %2866 = vmatpush1.bf16.msra.mxu0 %v5772_v11  ;;  %2989 = vmatpush1.bf16.msra.mxu1 %v5774_v12  ;;  %v561_v11 = vld [vmem:[#allocation2 + $0xbf0] sm:$0xff]  ;;  %v558_v12 = vld [vmem:[#allocation2 + $0xbd8] sm:$0xff] }
 0x1f2   :  { %2867 = vmatprep.subr.bf16.mxu0 %v5781_v13  ;;  %2990 = vmatprep.subr.bf16.mxu1 %v5783_v14  ;;  %v562_v13 = vld [vmem:[#allocation2 + $0xbf8] sm:$0xff]  ;;  %v5836_v14 = vcombine.low %v549_v2, %v553_v3  ;;  %v5845_v17 = vcombine.high %v557_v10, %v561_v11  ;;  %v5844_v19 = vcombine.low %v557_v10, %v561_v11  ;;  %v6352_v10 = vld [vmem:[#allocation7 + $0xe8] ss:$16 sps:$4 sm:$0xff]  }
 0x1f3   :  { %v5847_v18 = vcombine.high %v558_v12, %v562_v13  ;;  %v6357_v11 = vld [vmem:[#allocation7 + $0x104] ss:$16 sps:$4 sm:$0xff]  }
 0x1f5   :  { %2868 = vmatpush1.bf16.msra.mxu0 %v5780_v59  ;;  %2991 = vmatpush1.bf16.msra.mxu1 %v5782_v20  ;;  %v5846_v59 = vcombine.low %v558_v12, %v562_v13  ;;  %v6309_v20 = vld [vmem:[#allocation7 + $0x4] ss:$16 sps:$4 sm:$0xff]   ;;  %v6360_v12 = vld [vmem:[#allocation7 + $0x10c] ss:$16 sps:$4 sm:$0xff]   ;;  %v6355_v13 = vld [vmem:[#allocation7 + $0x100] ss:$16 sps:$4 sm:$0xff]  }
 0x1f6   :  { %2869 = vmatprep.subr.bf16.mxu0 %v5789_v21  ;;  %2992 = vmatprep.subr.bf16.mxu1 %v5791_v22  ;;  %v6312_v21 = vld [vmem:[#allocation7 + $0xc] ss:$16 sps:$4 sm:$0xff]   ;;  %v6307_v22 = vld [vmem:[#allocation7] ss:$16 sps:$4 sm:$0xff]  }
 0x1f9   :  { %2870 = vmatpush1.bf16.msra.mxu0 %v5788_v28  ;;  %2993 = vmatpush1.bf16.msra.mxu1 %v5790_v9  ;;  %v6316_v28 = vld [vmem:[#allocation7 + $0x28] ss:$16 sps:$4 sm:$0xff]   ;;  %v6321_v9 = vld [vmem:[#allocation7 + $0x44] ss:$16 sps:$4 sm:$0xff]  }
 0x1fa   :  { %2871 = vmatprep.subr.bf16.mxu0 %v5797_v29  ;;  %2994 = vmatprep.subr.bf16.mxu1 %v5799_v30  ;;  %v6324_v29 = vld [vmem:[#allocation7 + $0x4c] ss:$16 sps:$4 sm:$0xff]   ;;  %v6319_v30 = vld [vmem:[#allocation7 + $0x40] ss:$16 sps:$4 sm:$0xff]  }
 0x1fd   :  { %2872 = vmatpush1.bf16.msra.mxu0 %v5796_v35  ;;  %2995 = vmatpush1.bf16.msra.mxu1 %v5798_v63  ;;  %v6333_v35 = vld [vmem:[#allocation7 + $0x84] ss:$16 sps:$4 sm:$0xff]   ;;  %v6336_v63 = vld [vmem:[#allocation7 + $0x8c] ss:$16 sps:$4 sm:$0xff]  }
 0x1fe   :  { %2873 = vmatprep.subr.bf16.mxu0 %v5805_v37  ;;  %2996 = vmatprep.subr.bf16.mxu1 %v5807_v38  ;;  %v567_v37 = vsub.s32 0, %v7158_v44  ;;  %v6331_v38 = vld [vmem:[#allocation7 + $0x80] ss:$16 sps:$4 sm:$0xff]  }
 0x201   :  { %2874 = vmatpush1.bf16.msra.mxu0 %v5804_v41  ;;  %2997 = vmatpush1.bf16.msra.mxu1 %v5806_v43  ;;  %v579_v41 = vsub.s32 3, %v7158_v44  ;;  %v6339_v43 = vld [vmem:[#allocation7 + $0xa4] ss:$16 sps:$4 sm:$0xff]  }
 0x202   :  { %2875 = vmatprep.subr.bf16.mxu0 %v5813_v45  ;;  %2998 = vmatprep.subr.bf16.mxu1 %v5815_v46  ;;  %v6342_v45 = vld [vmem:[#allocation7 + $0xac] ss:$16 sps:$4 sm:$0xff]   ;;  %v568_v46 = vrot.slane %v7231_v39, %v567_v37 }
 0x203   :  { %v580_v50 = vrot.slane %v7231_v39, %v579_v41 }
 0x205   :  { %2876 = vmatpush1.bf16.msra.mxu0 %v5812_v52  ;;  %2999 = vmatpush1.bf16.msra.mxu1 %v5814_v51  ;;  %v6340_v52 = vld [vmem:[#allocation7 + $0xa8] ss:$16 sps:$4 sm:$0xff]   ;;  %v6345_v51 = vld [vmem:[#allocation7 + $0xc4] ss:$16 sps:$4 sm:$0xff]  }
 0x206   :  { %2877 = vmatprep.subr.bf16.mxu0 %v5821_v16  ;;  %3000 = vmatprep.subr.bf16.mxu1 %v5823_v54  ;;  %v6348_v54 = vld [vmem:[#allocation7 + $0xcc] ss:$16 sps:$4 sm:$0xff]  }
 0x209   :  { %2878 = vmatpush1.bf16.msra.mxu0 %v5820_v60  ;;  %3001 = vmatpush1.bf16.msra.mxu1 %v5822_v61 }
 0x20a   :  { %2879 = vmatprep.subr.bf16.mxu0 %v5829_v0  ;;  %3002 = vmatprep.subr.bf16.mxu1 %v5831_v1  ;;  %v6343_v1 = vld [vmem:[#allocation7 + $0xc0] ss:$16 sps:$4 sm:$0xff]  }
 0x20d   :  { %2880 = vmatpush1.bf16.msra.mxu0 %v5828_v6  ;;  %3003 = vmatpush1.bf16.msra.mxu1 %v5830_v7  ;;  %v6351_v6 = vld [vmem:[#allocation7 + $0xe4] ss:$16 sps:$4 sm:$0xff]  }
 0x20e   :  { %2881 = vmatprep.subr.bf16.mxu0 %v5837_v8  ;;  %3004 = vmatprep.subr.bf16.mxu1 %v5839_v32  ;;  %v6354_v8 = vld [vmem:[#allocation7 + $0xec] ss:$16 sps:$4 sm:$0xff]   ;;  %v6349_v32 = vld [vmem:[#allocation7 + $0xe0] ss:$16 sps:$4 sm:$0xff]  }
 0x211   :  { %2882 = vmatpush1.bf16.msra.mxu0 %v5836_v14  ;;  %3005 = vmatpush1.bf16.msra.mxu1 %v5838_v15  ;;  %v6358_v14 = vld [vmem:[#allocation7 + $0x108] ss:$16 sps:$4 sm:$0xff]   ;;  %v6363_v15 = vld [vmem:[#allocation7 + $0x124] ss:$16 sps:$4 sm:$0xff]  }
 0x212   :  { %2883 = vmatprep.subr.bf16.mxu0 %v5845_v17  ;;  %3006 = vmatprep.subr.bf16.mxu1 %v5847_v18  ;;  %v6366_v17 = vld [vmem:[#allocation7 + $0x12c] ss:$16 sps:$4 sm:$0xff]  }
 0x215   :  { %2884 = vmatpush1.bf16.msra.mxu0 %v5844_v19  ;;  %3007 = vmatpush1.bf16.msra.mxu1 %v5846_v59 }
 0x216   :  { %4637 = vmatprep.subr.bf16.mxu0 %v6309_v20  ;;  %4801 = vmatprep.subr.bf16.mxu1 %v6312_v21  ;;  %v6361_v20 = vld [vmem:[#allocation7 + $0x120] ss:$16 sps:$4 sm:$0xff]   ;;  %v6364_v21 = vld [vmem:[#allocation7 + $0x128] ss:$16 sps:$4 sm:$0xff]  }
 0x218   :  { %2886 = vmatmul.mubr.bf16.vlgmr.msra.gmra.mrb[4].mxu0 %v7214_v62  ;;  %3009 = vmatmul.mubr.bf16.vlgmr.msra.gmra.mrb[4].mxu1 %v7214_v62  ;;  %v6328_v62 = vld [vmem:[#allocation7 + $0x68] ss:$16 sps:$4 sm:$0xff]  }
 0x219   :  { %4638 = vmatpush1.bf16.msra.mxu0 %v6307_v22  ;;  %4802 = vmatpush1.bf16.msra.mxu1 %v6310_v23 }
 0x21a   :  { %4639 = vmatprep.subr.bf16.mxu0 %v6315_v24  ;;  %4803 = vmatprep.subr.bf16.mxu1 %v6318_v26  ;;  %v6369_v24 = vld [vmem:[#allocation7 + $0x144] ss:$16 sps:$4 sm:$0xff]   ;;  %v6372_v26 = vld [vmem:[#allocation7 + $0x14c] ss:$16 sps:$4 sm:$0xff]  }
 0x21d   :  { %4640 = vmatpush1.bf16.msra.mxu0 %v6313_v27  ;;  %4804 = vmatpush1.bf16.msra.mxu1 %v6316_v28 }
 0x21e   :  { %4641 = vmatprep.subr.bf16.mxu0 %v6321_v9  ;;  %4805 = vmatprep.subr.bf16.mxu1 %v6324_v29  ;;  %v6367_v29 = vld [vmem:[#allocation7 + $0x140] ss:$16 sps:$4 sm:$0xff]  }
 0x221   :  { %4642 = vmatpush1.bf16.msra.mxu0 %v6319_v30  ;;  %4806 = vmatpush1.bf16.msra.mxu1 %v6322_v25  ;;  %v6370_v30 = vld [vmem:[#allocation7 + $0x148] ss:$16 sps:$4 sm:$0xff]  }
 0x222   :  { %4643 = vmatprep.subr.bf16.mxu0 %v6327_v31  ;;  %4807 = vmatprep.subr.bf16.mxu1 %v6330_v33  ;;  %v6375_v31 = vld [vmem:[#allocation7 + $0x164] ss:$16 sps:$4 sm:$0xff]   ;;  %v6378_v33 = vld [vmem:[#allocation7 + $0x16c] ss:$16 sps:$4 sm:$0xff]  }
 0x225   :  { %4644 = vmatpush1.bf16.msra.mxu0 %v6325_v34  ;;  %4808 = vmatpush1.bf16.msra.mxu1 %v6328_v62  ;;  %v6373_v62 = vld [vmem:[#allocation7 + $0x160] ss:$16 sps:$4 sm:$0xff]  }
 0x226   :  { %4645 = vmatprep.subr.bf16.mxu0 %v6333_v35  ;;  %4809 = vmatprep.subr.bf16.mxu1 %v6336_v63  ;;  %v6376_v35 = vld [vmem:[#allocation7 + $0x168] ss:$16 sps:$4 sm:$0xff]   ;;  %v6381_v63 = vld [vmem:[#allocation7 + $0x184] ss:$16 sps:$4 sm:$0xff]  }
 0x229   :  { %4646 = vmatpush1.bf16.msra.mxu0 %v6331_v38  ;;  %4810 = vmatpush1.bf16.msra.mxu1 %v6334_v36  ;;  %v6384_v38 = vld [vmem:[#allocation7 + $0x18c] ss:$16 sps:$4 sm:$0xff]   ;;  %v6379_v36 = vld [vmem:[#allocation7 + $0x180] ss:$16 sps:$4 sm:$0xff]  }
 0x22a   :  { %4647 = vmatprep.subr.bf16.mxu0 %v6339_v43  ;;  %4811 = vmatprep.subr.bf16.mxu1 %v6342_v45  ;;  %v6382_v43 = vld [vmem:[#allocation7 + $0x188] ss:$16 sps:$4 sm:$0xff]   ;;  %v6387_v45 = vld [vmem:[#allocation7 + $0x1a4] ss:$16 sps:$4 sm:$0xff]  }
 0x22b   :  { %v2641_v16 = vpop.f32.mrb[0].mxu0  ;;  %v2764_v56 = vpop.f32.mrb[0].mxu1 }
 0x22c   :  { %v6219_v55 = vadd.f32 %v2641_v16, %v568_v46  ;;  %v2643_v57 = vpop.f32.mrb[1].mxu0  ;;  %v6221_v58 = vadd.f32 %v2764_v56, %v576_v47  ;;  %v2766_v61 = vpop.f32.mrb[1].mxu1  ;;  %v6390_v46 = vld [vmem:[#allocation7 + $0x1ac] ss:$16 sps:$4 sm:$0xff]   ;;  %v6385_v47 = vld [vmem:[#allocation7 + $0x1a0] ss:$16 sps:$4 sm:$0xff]  }
 0x22d   :  { %v6220_v60 = vadd.f32 %v2643_v57, %v572_v48  ;;  %v2645_v0 = vpop.f32.mrb[2].mxu0  ;;  %4648 = vmatpush1.bf16.msra.mxu0 %v6337_v49  ;;  %v6222_v2 = vadd.f32 %v2766_v61, %v580_v50  ;;  %v2768_v3 = vpop.f32.mrb[2].mxu1  ;;  %4812 = vmatpush1.bf16.msra.mxu1 %v6340_v52  ;;  %v6388_v48 = vld [vmem:[#allocation7 + $0x1a8] ss:$16 sps:$4 sm:$0xff]   ;;  %v6393_v49 = vld [vmem:[#allocation7 + $0x1c4] ss:$16 sps:$4 sm:$0xff]  }
 0x22e   :  { %6731 = vtanh.f32 %v6219_v55  ;;  %v2646_v4 = vpop.f32.mrb[3].mxu0  ;;  %4649 = vmatprep.subr.bf16.mxu0 %v6345_v51  ;;  %v2769_v7 = vpop.f32.mrb[3].mxu1  ;;  %4813 = vmatprep.subr.bf16.mxu1 %v6348_v54  ;;  %v6396_v50 = vld [vmem:[#allocation7 + $0x1cc] ss:$16 sps:$4 sm:$0xff]   ;;  %v6391_v52 = vld [vmem:[#allocation7 + $0x1c0] ss:$16 sps:$4 sm:$0xff]  }
 0x22f   :  { %6733 = vtanh.f32 %v6221_v58  ;;  %v6394_v51 = vld [vmem:[#allocation7 + $0x1c8] ss:$16 sps:$4 sm:$0xff]   ;;  %v6399_v16 = vld [vmem:[#allocation7 + $0x1e4] ss:$16 sps:$4 sm:$0xff]   ;;  %v6402_v54 = vld [vmem:[#allocation7 + $0x1ec] ss:$16 sps:$4 sm:$0xff]  }
 0x230   :  { %6735 = vtanh.f32 %v6220_v60  ;;  %v6397_v55 = vld [vmem:[#allocation7 + $0x1e0] ss:$16 sps:$4 sm:$0xff]   ;;  %v6400_v56 = vld [vmem:[#allocation7 + $0x1e8] ss:$16 sps:$4 sm:$0xff]   ;;  %v6405_v57 = vld [vmem:[#allocation7 + $0x204] ss:$16 sps:$4 sm:$0xff]  }
 0x231   :  { %6737 = vtanh.f32 %v6222_v2  ;;  %4650 = vmatpush1.bf16.msra.mxu0 %v6343_v1  ;;  %4814 = vmatpush1.bf16.msra.mxu1 %v6346_v5  ;;  %v6408_v58 = vld [vmem:[#allocation7 + $0x20c] ss:$16 sps:$4 sm:$0xff]   ;;  %v6403_v60 = vld [vmem:[#allocation7 + $0x200] ss:$16 sps:$4 sm:$0xff]   ;;  %v6406_v0 = vld [vmem:[#allocation7 + $0x208] ss:$16 sps:$4 sm:$0xff]  }
 0x232   :  { %4651 = vmatprep.subr.bf16.mxu0 %v6351_v6  ;;  %4815 = vmatprep.subr.bf16.mxu1 %v6354_v8  ;;  %v6411_v2 = vld [vmem:[#allocation7 + $0x224] ss:$16 sps:$4 sm:$0xff]   ;;  %v6414_v3 = vld [vmem:[#allocation7 + $0x22c] ss:$16 sps:$4 sm:$0xff]   ;;  %v6409_v4 = vld [vmem:[#allocation7 + $0x220] ss:$16 sps:$4 sm:$0xff]  }
 0x233   :  { %v6412_v5 = vld [vmem:[#allocation7 + $0x228] ss:$16 sps:$4 sm:$0xff]   ;;  %v6417_v6 = vld [vmem:[#allocation7 + $0x244] ss:$16 sps:$4 sm:$0xff]   ;;  %v6420_v7 = vld [vmem:[#allocation7 + $0x24c] ss:$16 sps:$4 sm:$0xff]  }
 0x234   :  { %v6415_v8 = vld [vmem:[#allocation7 + $0x240] ss:$16 sps:$4 sm:$0xff]  }
 0x235   :  { %4652 = vmatpush1.bf16.msra.mxu0 %v6349_v32  ;;  %4816 = vmatpush1.bf16.msra.mxu1 %v6352_v10  ;;  %v6418_v32 = vld [vmem:[#allocation7 + $0x248] ss:$16 sps:$4 sm:$0xff]   ;;  %v6423_v10 = vld [vmem:[#allocation7 + $0x264] ss:$16 sps:$4 sm:$0xff]  }
 0x236   :  { %4653 = vmatprep.subr.bf16.mxu0 %v6357_v11  ;;  %4817 = vmatprep.subr.bf16.mxu1 %v6360_v12  ;;  %v6426_v11 = vld [vmem:[#allocation7 + $0x26c] ss:$16 sps:$4 sm:$0xff]   ;;  %v6421_v12 = vld [vmem:[#allocation7 + $0x260] ss:$16 sps:$4 sm:$0xff]  }
 0x238   :  { %v7248_v18 = vpop.eup %6731 }
 0x239   :  { %v7250_v19 = vpop.eup %6733  ;;  %4654 = vmatpush1.bf16.msra.mxu0 %v6355_v13  ;;  %4818 = vmatpush1.bf16.msra.mxu1 %v6358_v14  ;;  %v3071_v61 = vpack.c.bf16 %v7248_v18, %v7248_v18  ;;  %v6424_v13 = vld [vmem:[#allocation7 + $0x268] ss:$16 sps:$4 sm:$0xff]   ;;  %v6429_v14 = vld [vmem:[#allocation7 + $0x284] ss:$16 sps:$4 sm:$0xff]  }
 0x23a   :  { %v6736_v59 = vpop.eup %6735  ;;  %4655 = vmatprep.subr.bf16.mxu0 %v6363_v15  ;;  %4819 = vmatprep.subr.bf16.mxu1 %v6366_v17  ;;  %v6432_v15 = vld [vmem:[#allocation7 + $0x28c] ss:$16 sps:$4 sm:$0xff]   ;;  %v6427_v17 = vld [vmem:[#allocation7 + $0x280] ss:$16 sps:$4 sm:$0xff]  }
 0x23b   :  { %v7252_v22 = vpop.eup %6737  ;;  %v3072_v23 = vpack.c.bf16 %v6736_v59, %v6736_v59  ;;  %v3033_v27 = vcombine.low %v7248_v18, %v6736_v59  ;;  %v6430_v18 = vld [vmem:[#allocation7 + $0x288] ss:$16 sps:$4 sm:$0xff]   ;;  %v6435_v59 = vld [vmem:[#allocation7 + $0x2a4] ss:$16 sps:$4 sm:$0xff]  }
 0x23c   :  { %v3034_v28 = vcombine.low %v7250_v19, %v7252_v22  ;;  %v3074_v1 = vpack.c.bf16 %v7252_v22, %v7252_v22  ;;  %v6436_v22 = vld [vmem:[#allocation7 + $0x2a8] ss:$16 sps:$4 sm:$0xff]  }
 0x23d   :  { %4669 = vmatprep.mubr.bf16.mxu0 %v3072_v23  ;;  %4833 = vmatprep.mubr.bf16.mxu1 %v3072_v23  ;;  %v3041_v9 = vrot.slane %v3033_v27, %v7161_v53  ;;  %v6441_v23 = vld [vmem:[#allocation7 + $0x2c4] ss:$16 sps:$4 sm:$0xff]   ;;  %v6442_v27 = vld [vmem:[#allocation7 + $0x2c8] ss:$16 sps:$4 sm:$0xff]  }
 0x23e   :  { %4656 = vmatpush1.bf16.msra.mxu0 %v6361_v20  ;;  %4820 = vmatpush1.bf16.msra.mxu1 %v6364_v21  ;;  %v3048_v25 = vrot.slane %v3034_v28, %v7161_v53  ;;  %v6438_v20 = vld [vmem:[#allocation7 + $0x2ac] ss:$16 sps:$4 sm:$0xff]   ;;  %v6433_v21 = vld [vmem:[#allocation7 + $0x2a0] ss:$16 sps:$4 sm:$0xff]   ;;  %v6447_v28 = vld [vmem:[#allocation7 + $0x2e4] ss:$16 sps:$4 sm:$0xff]  }
 0x23f   :  { %4657 = vmatprep.subr.bf16.mxu0 %v6369_v24  ;;  %4821 = vmatprep.subr.bf16.mxu1 %v6372_v26  ;;  %v6444_v24 = vld [vmem:[#allocation7 + $0x2cc] ss:$16 sps:$4 sm:$0xff]   ;;  %v6439_v26 = vld [vmem:[#allocation7 + $0x2c0] ss:$16 sps:$4 sm:$0xff]  }
 0x240   :  { %v3049_v34 = vcombine.low %v3041_v9, %v3048_v25  ;;  %v6450_v9 = vld [vmem:[#allocation7 + $0x2ec] ss:$16 sps:$4 sm:$0xff]   ;;  %v6453_v25 = vld [vmem:[#allocation7 + $0x304] ss:$16 sps:$4 sm:$0xff]  }
 0x242   :  { %4658 = vmatpush1.bf16.msra.mxu0 %v6367_v29  ;;  %4822 = vmatpush1.bf16.msra.mxu1 %v6370_v30  ;;  %3069 = vst [vmem:[#allocation16] sm:$0xff] %v3049_v34  ;;  %v6445_v29 = vld [vmem:[#allocation7 + $0x2e0] ss:$16 sps:$4 sm:$0xff]   ;;  %v6448_v30 = vld [vmem:[#allocation7 + $0x2e8] ss:$16 sps:$4 sm:$0xff]  }
 0x243   :  { %4659 = vmatprep.subr.bf16.mxu0 %v6375_v31  ;;  %4823 = vmatprep.subr.bf16.mxu1 %v6378_v33  ;;  %v6456_v31 = vld [vmem:[#allocation7 + $0x30c] ss:$16 sps:$4 sm:$0xff]   ;;  %v6451_v33 = vld [vmem:[#allocation7 + $0x300] ss:$16 sps:$4 sm:$0xff]   ;;  %v6454_v34 = vld [vmem:[#allocation7 + $0x308] ss:$16 sps:$4 sm:$0xff]  }
 0x246   :  { %4660 = vmatpush1.bf16.msra.mxu0 %v6373_v62  ;;  %4824 = vmatpush1.bf16.msra.mxu1 %v6376_v35  ;;  %v6459_v62 = vld [vmem:[#allocation7 + $0x324] ss:$16 sps:$4 sm:$0xff]   ;;  %v6462_v35 = vld [vmem:[#allocation7 + $0x32c] ss:$16 sps:$4 sm:$0xff]  }
 0x247   :  { %4661 = vmatprep.subr.bf16.mxu0 %v6381_v63  ;;  %4825 = vmatprep.subr.bf16.mxu1 %v6384_v38  ;;  %v6457_v63 = vld [vmem:[#allocation7 + $0x320] ss:$16 sps:$4 sm:$0xff]   ;;  %v6460_v38 = vld [vmem:[#allocation7 + $0x328] ss:$16 sps:$4 sm:$0xff]  }
 0x24a   :  { %4662 = vmatpush1.bf16.msra.mxu0 %v6379_v36  ;;  %4826 = vmatpush1.bf16.msra.mxu1 %v6382_v43  ;;  %v6465_v36 = vld [vmem:[#allocation7 + $0x344] ss:$16 sps:$4 sm:$0xff]   ;;  %v6468_v43 = vld [vmem:[#allocation7 + $0x34c] ss:$16 sps:$4 sm:$0xff]  }
 0x24b   :  { %4663 = vmatprep.subr.bf16.mxu0 %v6387_v45  ;;  %4827 = vmatprep.subr.bf16.mxu1 %v6390_v46  ;;  %v6463_v45 = vld [vmem:[#allocation7 + $0x340] ss:$16 sps:$4 sm:$0xff]   ;;  %v6466_v46 = vld [vmem:[#allocation7 + $0x348] ss:$16 sps:$4 sm:$0xff]  }
 0x24e   :  { %4664 = vmatpush1.bf16.msra.mxu0 %v6385_v47  ;;  %4828 = vmatpush1.bf16.msra.mxu1 %v6388_v48  ;;  %v6471_v47 = vld [vmem:[#allocation7 + $0x364] ss:$16 sps:$4 sm:$0xff]   ;;  %v6474_v48 = vld [vmem:[#allocation7 + $0x36c] ss:$16 sps:$4 sm:$0xff]  }
 0x24f   :  { %4665 = vmatprep.subr.bf16.mxu0 %v6393_v49  ;;  %4829 = vmatprep.subr.bf16.mxu1 %v6396_v50  ;;  %v6469_v49 = vld [vmem:[#allocation7 + $0x360] ss:$16 sps:$4 sm:$0xff]   ;;  %v6472_v50 = vld [vmem:[#allocation7 + $0x368] ss:$16 sps:$4 sm:$0xff]  }
 0x252   :  { %4666 = vmatpush1.bf16.msra.mxu0 %v6391_v52  ;;  %4830 = vmatpush1.bf16.msra.mxu1 %v6394_v51  ;;  %v6477_v52 = vld [vmem:[#allocation7 + $0x384] ss:$16 sps:$4 sm:$0xff]   ;;  %v6480_v51 = vld [vmem:[#allocation7 + $0x38c] ss:$16 sps:$4 sm:$0xff]  }
 0x253   :  { %4667 = vmatprep.subr.bf16.mxu0 %v6399_v16  ;;  %4831 = vmatprep.subr.bf16.mxu1 %v6402_v54  ;;  %v6475_v16 = vld [vmem:[#allocation7 + $0x380] ss:$16 sps:$4 sm:$0xff]   ;;  %v6478_v54 = vld [vmem:[#allocation7 + $0x388] ss:$16 sps:$4 sm:$0xff]  }
 0x256   :  { %4668 = vmatpush1.bf16.msra.mxu0 %v6397_v55  ;;  %4832 = vmatpush1.bf16.msra.mxu1 %v6400_v56  ;;  %v6483_v55 = vld [vmem:[#allocation7 + $0x3a4] ss:$16 sps:$4 sm:$0xff]   ;;  %v6486_v56 = vld [vmem:[#allocation7 + $0x3ac] ss:$16 sps:$4 sm:$0xff]  }
 0x257   :  { %4678 = vmatprep.subr.bf16.mxu0 %v6405_v57  ;;  %4842 = vmatprep.subr.bf16.mxu1 %v6408_v58  ;;  %v6481_v57 = vld [vmem:[#allocation7 + $0x3a0] ss:$16 sps:$4 sm:$0xff]   ;;  %v6484_v58 = vld [vmem:[#allocation7 + $0x3a8] ss:$16 sps:$4 sm:$0xff]  }
 0x259   :  { %4670 = vmatmul.mubr.bf16.vlgmr.msra.gmra.mrb[8].mxu0 %v3071_v61  ;;  %4834 = vmatmul.mubr.bf16.vlgmr.msra.gmra.mrb[8].mxu1 %v3071_v61  ;;  %v6492_v61 = vld [vmem:[#allocation7 + $0x3cc] ss:$16 sps:$4 sm:$0xff]  }
 0x25a   :  { %4679 = vmatpush1.bf16.msra.mxu0 %v6403_v60  ;;  %4710 = vmatprep.mubr.bf16.mxu0 %v3074_v1  ;;  %v6489_v60 = vld [vmem:[#allocation7 + $0x3c4] ss:$16 sps:$4 sm:$0xff]  }
 0x25b   :  { %4843 = vmatpush1.bf16.msra.mxu1 %v6406_v0  ;;  %4874 = vmatprep.mubr.bf16.mxu1 %v3074_v1  ;;  %v6487_v0 = vld [vmem:[#allocation7 + $0x3c0] ss:$16 sps:$4 sm:$0xff]   ;;  %v6490_v1 = vld [vmem:[#allocation7 + $0x3c8] ss:$16 sps:$4 sm:$0xff]  }
 0x25c   :  { %4680 = vmatprep.subr.bf16.mxu0 %v6411_v2  ;;  %4844 = vmatprep.subr.bf16.mxu1 %v6414_v3  ;;  %v6495_v2 = vld [vmem:[#allocation7 + $0x3e4] ss:$16 sps:$4 sm:$0xff]   ;;  %v6498_v3 = vld [vmem:[#allocation7 + $0x3ec] ss:$16 sps:$4 sm:$0xff]  }
 0x25e   :  { %4681 = vmatpush1.bf16.msra.mxu0 %v6409_v4  ;;  %v6493_v4 = vld [vmem:[#allocation7 + $0x3e0] ss:$16 sps:$4 sm:$0xff]  }
 0x25f   :  { %4845 = vmatpush1.bf16.msra.mxu1 %v6412_v5  ;;  %4682 = vmatprep.subr.bf16.mxu0 %v6417_v6  ;;  %v6496_v5 = vld [vmem:[#allocation7 + $0x3e8] ss:$16 sps:$4 sm:$0xff]   ;;  %v6501_v6 = vld [vmem:[#allocation7 + $0x404] ss:$16 sps:$4 sm:$0xff]  }
 0x260   :  { %4846 = vmatprep.subr.bf16.mxu1 %v6420_v7  ;;  %v6504_v7 = vld [vmem:[#allocation7 + $0x40c] ss:$16 sps:$4 sm:$0xff]  }
 0x262   :  { %4683 = vmatpush1.bf16.msra.mxu0 %v6415_v8  ;;  %v6499_v8 = vld [vmem:[#allocation7 + $0x400] ss:$16 sps:$4 sm:$0xff]  }
 0x263   :  { %4847 = vmatpush1.bf16.msra.mxu1 %v6418_v32  ;;  %4684 = vmatprep.subr.bf16.mxu0 %v6423_v10  ;;  %v3073_v32 = vpack.c.bf16 %v7250_v19, %v7250_v19  ;;  %v6502_v10 = vld [vmem:[#allocation7 + $0x408] ss:$16 sps:$4 sm:$0xff]  }
 0x264   :  { %4848 = vmatprep.subr.bf16.mxu1 %v6426_v11  ;;  %v6507_v11 = vld [vmem:[#allocation7 + $0x424] ss:$16 sps:$4 sm:$0xff]   ;;  %v6514_v19 = vld [vmem:[#allocation7 + $0x448] ss:$16 sps:$4 sm:$0xff]  }
 0x266   :  { %4685 = vmatpush1.bf16.msra.mxu0 %v6421_v12  ;;  %v6510_v12 = vld [vmem:[#allocation7 + $0x42c] ss:$16 sps:$4 sm:$0xff]  }
 0x267   :  { %4849 = vmatpush1.bf16.msra.mxu1 %v6424_v13  ;;  %4686 = vmatprep.subr.bf16.mxu0 %v6429_v14  ;;  %v6505_v13 = vld [vmem:[#allocation7 + $0x420] ss:$16 sps:$4 sm:$0xff]   ;;  %v6508_v14 = vld [vmem:[#allocation7 + $0x428] ss:$16 sps:$4 sm:$0xff]  }
 0x268   :  { %4850 = vmatprep.subr.bf16.mxu1 %v6432_v15  ;;  %v6513_v15 = vld [vmem:[#allocation7 + $0x444] ss:$16 sps:$4 sm:$0xff]  }
 0x26a   :  { %4687 = vmatpush1.bf16.msra.mxu0 %v6427_v17  ;;  %v6516_v17 = vld [vmem:[#allocation7 + $0x44c] ss:$16 sps:$4 sm:$0xff]  }
 0x26b   :  { %4851 = vmatpush1.bf16.msra.mxu1 %v6430_v18  ;;  %4688 = vmatprep.subr.bf16.mxu0 %v6435_v59  ;;  %v6511_v18 = vld [vmem:[#allocation7 + $0x440] ss:$16 sps:$4 sm:$0xff]   ;;  %v6519_v59 = vld [vmem:[#allocation7 + $0x464] ss:$16 sps:$4 sm:$0xff]  }
 0x26c   :  { %4852 = vmatprep.subr.bf16.mxu1 %v6438_v20  ;;  %v6522_v20 = vld [vmem:[#allocation7 + $0x46c] ss:$16 sps:$4 sm:$0xff]  }
 0x26e   :  { %4689 = vmatpush1.bf16.msra.mxu0 %v6433_v21  ;;  %v6517_v21 = vld [vmem:[#allocation7 + $0x460] ss:$16 sps:$4 sm:$0xff]  }
 0x26f   :  { %4853 = vmatpush1.bf16.msra.mxu1 %v6436_v22  ;;  %4690 = vmatprep.subr.bf16.mxu0 %v6441_v23  ;;  %v6520_v22 = vld [vmem:[#allocation7 + $0x468] ss:$16 sps:$4 sm:$0xff]   ;;  %v6525_v23 = vld [vmem:[#allocation7 + $0x484] ss:$16 sps:$4 sm:$0xff]  }
 0x270   :  { %4854 = vmatprep.subr.bf16.mxu1 %v6444_v24  ;;  %v6528_v24 = vld [vmem:[#allocation7 + $0x48c] ss:$16 sps:$4 sm:$0xff]  }
 0x272   :  { %4691 = vmatpush1.bf16.msra.mxu0 %v6439_v26  ;;  %v6523_v26 = vld [vmem:[#allocation7 + $0x480] ss:$16 sps:$4 sm:$0xff]  }
 0x273   :  { %4855 = vmatpush1.bf16.msra.mxu1 %v6442_v27  ;;  %4692 = vmatprep.subr.bf16.mxu0 %v6447_v28  ;;  %v6526_v27 = vld [vmem:[#allocation7 + $0x488] ss:$16 sps:$4 sm:$0xff]   ;;  %v6531_v28 = vld [vmem:[#allocation7 + $0x4a4] ss:$16 sps:$4 sm:$0xff]  }
 0x274   :  { %4856 = vmatprep.subr.bf16.mxu1 %v6450_v9  ;;  %v6534_v9 = vld [vmem:[#allocation7 + $0x4ac] ss:$16 sps:$4 sm:$0xff]  }
 0x276   :  { %4693 = vmatpush1.bf16.msra.mxu0 %v6445_v29  ;;  %v6529_v29 = vld [vmem:[#allocation7 + $0x4a0] ss:$16 sps:$4 sm:$0xff]  }
 0x277   :  { %4857 = vmatpush1.bf16.msra.mxu1 %v6448_v30  ;;  %4694 = vmatprep.subr.bf16.mxu0 %v6453_v25  ;;  %v6532_v30 = vld [vmem:[#allocation7 + $0x4a8] ss:$16 sps:$4 sm:$0xff]   ;;  %v6537_v25 = vld [vmem:[#allocation7 + $0x4c4] ss:$16 sps:$4 sm:$0xff]  }
 0x278   :  { %4858 = vmatprep.subr.bf16.mxu1 %v6456_v31  ;;  %v6540_v31 = vld [vmem:[#allocation7 + $0x4cc] ss:$16 sps:$4 sm:$0xff]  }
 0x27a   :  { %4695 = vmatpush1.bf16.msra.mxu0 %v6451_v33  ;;  %v6535_v33 = vld [vmem:[#allocation7 + $0x4c0] ss:$16 sps:$4 sm:$0xff]  }
 0x27b   :  { %4859 = vmatpush1.bf16.msra.mxu1 %v6454_v34  ;;  %4696 = vmatprep.subr.bf16.mxu0 %v6459_v62  ;;  %v6538_v34 = vld [vmem:[#allocation7 + $0x4c8] ss:$16 sps:$4 sm:$0xff]   ;;  %v6543_v62 = vld [vmem:[#allocation7 + $0x4e4] ss:$16 sps:$4 sm:$0xff]  }
 0x27c   :  { %4860 = vmatprep.subr.bf16.mxu1 %v6462_v35  ;;  %v6546_v35 = vld [vmem:[#allocation7 + $0x4ec] ss:$16 sps:$4 sm:$0xff]  }
 0x27e   :  { %4697 = vmatpush1.bf16.msra.mxu0 %v6457_v63  ;;  %v6541_v63 = vld [vmem:[#allocation7 + $0x4e0] ss:$16 sps:$4 sm:$0xff]  }
 0x27f   :  { %4861 = vmatpush1.bf16.msra.mxu1 %v6460_v38  ;;  %4698 = vmatprep.subr.bf16.mxu0 %v6465_v36  ;;  %v6544_v38 = vld [vmem:[#allocation7 + $0x4e8] ss:$16 sps:$4 sm:$0xff]   ;;  %v6549_v36 = vld [vmem:[#allocation7 + $0x504] ss:$16 sps:$4 sm:$0xff]  }
 0x280   :  { %4862 = vmatprep.subr.bf16.mxu1 %v6468_v43  ;;  %v6552_v43 = vld [vmem:[#allocation7 + $0x50c] ss:$16 sps:$4 sm:$0xff]  }
 0x282   :  { %4699 = vmatpush1.bf16.msra.mxu0 %v6463_v45  ;;  %v6547_v45 = vld [vmem:[#allocation7 + $0x500] ss:$16 sps:$4 sm:$0xff]  }
 0x283   :  { %4863 = vmatpush1.bf16.msra.mxu1 %v6466_v46  ;;  %4700 = vmatprep.subr.bf16.mxu0 %v6471_v47  ;;  %v6550_v46 = vld [vmem:[#allocation7 + $0x508] ss:$16 sps:$4 sm:$0xff]   ;;  %v6555_v47 = vld [vmem:[#allocation7 + $0x524] ss:$16 sps:$4 sm:$0xff]  }
 0x284   :  { %4864 = vmatprep.subr.bf16.mxu1 %v6474_v48  ;;  %v6558_v48 = vld [vmem:[#allocation7 + $0x52c] ss:$16 sps:$4 sm:$0xff]  }
 0x286   :  { %4701 = vmatpush1.bf16.msra.mxu0 %v6469_v49  ;;  %v6553_v49 = vld [vmem:[#allocation7 + $0x520] ss:$16 sps:$4 sm:$0xff]  }
 0x287   :  { %4865 = vmatpush1.bf16.msra.mxu1 %v6472_v50  ;;  %4702 = vmatprep.subr.bf16.mxu0 %v6477_v52  ;;  %v6556_v50 = vld [vmem:[#allocation7 + $0x528] ss:$16 sps:$4 sm:$0xff]   ;;  %v6561_v52 = vld [vmem:[#allocation7 + $0x544] ss:$16 sps:$4 sm:$0xff]  }
 0x288   :  { %4866 = vmatprep.subr.bf16.mxu1 %v6480_v51  ;;  %v6564_v51 = vld [vmem:[#allocation7 + $0x54c] ss:$16 sps:$4 sm:$0xff]  }
 0x28a   :  { %4703 = vmatpush1.bf16.msra.mxu0 %v6475_v16  ;;  %v6559_v16 = vld [vmem:[#allocation7 + $0x540] ss:$16 sps:$4 sm:$0xff]  }
 0x28b   :  { %4867 = vmatpush1.bf16.msra.mxu1 %v6478_v54  ;;  %4704 = vmatprep.subr.bf16.mxu0 %v6483_v55  ;;  %v6562_v54 = vld [vmem:[#allocation7 + $0x548] ss:$16 sps:$4 sm:$0xff]   ;;  %v6567_v55 = vld [vmem:[#allocation7 + $0x564] ss:$16 sps:$4 sm:$0xff]  }
 0x28c   :  { %4868 = vmatprep.subr.bf16.mxu1 %v6486_v56  ;;  %v6570_v56 = vld [vmem:[#allocation7 + $0x56c] ss:$16 sps:$4 sm:$0xff]  }
 0x28e   :  { %4705 = vmatpush1.bf16.msra.mxu0 %v6481_v57  ;;  %v6565_v57 = vld [vmem:[#allocation7 + $0x560] ss:$16 sps:$4 sm:$0xff]  }
 0x28f   :  { %4869 = vmatpush1.bf16.msra.mxu1 %v6484_v58  ;;  %4706 = vmatprep.subr.bf16.mxu0 %v6489_v60  ;;  %v6568_v58 = vld [vmem:[#allocation7 + $0x568] ss:$16 sps:$4 sm:$0xff]   ;;  %v6573_v60 = vld [vmem:[#allocation7 + $0x584] ss:$16 sps:$4 sm:$0xff]  }
 0x290   :  { %4870 = vmatprep.subr.bf16.mxu1 %v6492_v61  ;;  %v6576_v61 = vld [vmem:[#allocation7 + $0x58c] ss:$16 sps:$4 sm:$0xff]  }
 0x292   :  { %4707 = vmatpush1.bf16.msra.mxu0 %v6487_v0  ;;  %v6571_v0 = vld [vmem:[#allocation7 + $0x580] ss:$16 sps:$4 sm:$0xff]  }
 0x293   :  { %4871 = vmatpush1.bf16.msra.mxu1 %v6490_v1  ;;  %4708 = vmatprep.subr.bf16.mxu0 %v6495_v2  ;;  %v6574_v1 = vld [vmem:[#allocation7 + $0x588] ss:$16 sps:$4 sm:$0xff]   ;;  %v6579_v2 = vld [vmem:[#allocation7 + $0x5a4] ss:$16 sps:$4 sm:$0xff]  }
 0x294   :  { %4872 = vmatprep.subr.bf16.mxu1 %v6498_v3  ;;  %v6582_v3 = vld [vmem:[#allocation7 + $0x5ac] ss:$16 sps:$4 sm:$0xff]  }
 0x296   :  { %4709 = vmatpush1.bf16.msra.mxu0 %v6493_v4  ;;  %v6577_v4 = vld [vmem:[#allocation7 + $0x5a0] ss:$16 sps:$4 sm:$0xff]  }
 0x297   :  { %4873 = vmatpush1.bf16.msra.mxu1 %v6496_v5  ;;  %4719 = vmatprep.subr.bf16.mxu0 %v6501_v6  ;;  %v6580_v5 = vld [vmem:[#allocation7 + $0x5a8] ss:$16 sps:$4 sm:$0xff]   ;;  %v6585_v6 = vld [vmem:[#allocation7 + $0x5c4] ss:$16 sps:$4 sm:$0xff]  }
 0x298   :  { %4883 = vmatprep.subr.bf16.mxu1 %v6504_v7  ;;  %v6588_v7 = vld [vmem:[#allocation7 + $0x5cc] ss:$16 sps:$4 sm:$0xff]  }
 0x299   :  { %4711 = vmatmul.mubr.bf16.vlgmr.msra.gmra.mrb[8].mxu0 %v3073_v32 }
 0x29a   :  { %4875 = vmatmul.mubr.bf16.vlgmr.msra.gmra.mrb[8].mxu1 %v3073_v32  ;;  %4720 = vmatpush1.bf16.msra.mxu0 %v6499_v8  ;;  %v6583_v8 = vld [vmem:[#allocation7 + $0x5c0] ss:$16 sps:$4 sm:$0xff]   ;;  %v6586_v32 = vld [vmem:[#allocation7 + $0x5c8] ss:$16 sps:$4 sm:$0xff]  }
 0x29b   :  { %4884 = vmatpush1.bf16.msra.mxu1 %v6502_v10  ;;  %4721 = vmatprep.subr.bf16.mxu0 %v6507_v11  ;;  %v6591_v10 = vld [vmem:[#allocation7 + $0x5e4] ss:$16 sps:$4 sm:$0xff]   ;;  %v6594_v11 = vld [vmem:[#allocation7 + $0x5ec] ss:$16 sps:$4 sm:$0xff]  }
 0x29c   :  { %4885 = vmatprep.subr.bf16.mxu1 %v6510_v12  ;;  %v6589_v12 = vld [vmem:[#allocation7 + $0x5e0] ss:$16 sps:$4 sm:$0xff]  }
 0x29e   :  { %4722 = vmatpush1.bf16.msra.mxu0 %v6505_v13  ;;  %v6592_v13 = vld [vmem:[#allocation7 + $0x5e8] ss:$16 sps:$4 sm:$0xff]  }
 0x29f   :  { %4886 = vmatpush1.bf16.msra.mxu1 %v6508_v14  ;;  %4723 = vmatprep.subr.bf16.mxu0 %v6513_v15  ;;  %v6597_v14 = vld [vmem:[#allocation7 + $0x604] ss:$16 sps:$4 sm:$0xff]   ;;  %v6600_v15 = vld [vmem:[#allocation7 + $0x60c] ss:$16 sps:$4 sm:$0xff]  }
 0x2a0   :  { %4887 = vmatprep.subr.bf16.mxu1 %v6516_v17  ;;  %v583_v17 = vsub.s32 4, %v7158_v44 }
 0x2a2   :  { %4724 = vmatpush1.bf16.msra.mxu0 %v6511_v18  ;;  %v591_v18 = vsub.s32 6, %v7158_v44 }
 0x2a3   :  { %4888 = vmatpush1.bf16.msra.mxu1 %v6514_v19  ;;  %4725 = vmatprep.subr.bf16.mxu0 %v6519_v59  ;;  %v587_v19 = vsub.s32 5, %v7158_v44  ;;  %v595_v59 = vsub.s32 7, %v7158_v44  ;;  %v6723_v44 = vld [vmem:[#allocation13] sm:$0xff]  }
 0x2a4   :  { %4889 = vmatprep.subr.bf16.mxu1 %v6522_v20  ;;  %v584_v20 = vrot.slane %v7231_v39, %v583_v17  ;;  %v6642_v17 = vld [vmem:[#allocation7 + $0x6ec] ss:$16 sps:$4 sm:$0xff]  }
 0x2a6   :  { %4726 = vmatpush1.bf16.msra.mxu0 %v6517_v21  ;;  %v592_v21 = vrot.slane %v7231_v39, %v591_v18  ;;  %v6637_v18 = vld [vmem:[#allocation7 + $0x6e0] ss:$16 sps:$4 sm:$0xff]  }
 0x2a7   :  { %4890 = vmatpush1.bf16.msra.mxu1 %v6520_v22  ;;  %4727 = vmatprep.subr.bf16.mxu0 %v6525_v23  ;;  %v588_v22 = vrot.slane %v7231_v39, %v587_v19  ;;  %v596_v23 = vrot.slane %v7231_v39, %v595_v59  ;;  %v6640_v19 = vld [vmem:[#allocation7 + $0x6e8] ss:$16 sps:$4 sm:$0xff]   ;;  %v6645_v59 = vld [vmem:[#allocation7 + $0x704] ss:$16 sps:$4 sm:$0xff]  }
 0x2a8   :  { %4891 = vmatprep.subr.bf16.mxu1 %v6528_v24 }
 0x2aa   :  { %4728 = vmatpush1.bf16.msra.mxu0 %v6523_v26 }
 0x2ab   :  { %4892 = vmatpush1.bf16.msra.mxu1 %v6526_v27  ;;  %4729 = vmatprep.subr.bf16.mxu0 %v6531_v28 }
 0x2ac   :  { %4893 = vmatprep.subr.bf16.mxu1 %v6534_v9 }
 0x2ae   :  { %4730 = vmatpush1.bf16.msra.mxu0 %v6529_v29 }
 0x2af   :  { %4894 = vmatpush1.bf16.msra.mxu1 %v6532_v30  ;;  %4731 = vmatprep.subr.bf16.mxu0 %v6537_v25 }
 0x2b0   :  { %4895 = vmatprep.subr.bf16.mxu1 %v6540_v31 }
 0x2b2   :  { %4732 = vmatpush1.bf16.msra.mxu0 %v6535_v33 }
 0x2b3   :  { %4896 = vmatpush1.bf16.msra.mxu1 %v6538_v34  ;;  %4733 = vmatprep.subr.bf16.mxu0 %v6543_v62 }
 0x2b4   :  { %4897 = vmatprep.subr.bf16.mxu1 %v6546_v35 }
 0x2b6   :  { %4734 = vmatpush1.bf16.msra.mxu0 %v6541_v63 }
 0x2b7   :  { %4898 = vmatpush1.bf16.msra.mxu1 %v6544_v38  ;;  %4735 = vmatprep.subr.bf16.mxu0 %v6549_v36 }
 0x2b8   :  { %4899 = vmatprep.subr.bf16.mxu1 %v6552_v43  ;;  %v6595_v43 = vld [vmem:[#allocation7 + $0x600] ss:$16 sps:$4 sm:$0xff]  }
 0x2ba   :  { %4736 = vmatpush1.bf16.msra.mxu0 %v6547_v45  ;;  %v6598_v45 = vld [vmem:[#allocation7 + $0x608] ss:$16 sps:$4 sm:$0xff]  }
 0x2bb   :  { %4900 = vmatpush1.bf16.msra.mxu1 %v6550_v46  ;;  %4737 = vmatprep.subr.bf16.mxu0 %v6555_v47 }
 0x2bc   :  { %4901 = vmatprep.subr.bf16.mxu1 %v6558_v48 }
 0x2be   :  { %4738 = vmatpush1.bf16.msra.mxu0 %v6553_v49  ;;  %v6603_v49 = vld [vmem:[#allocation7 + $0x624] ss:$16 sps:$4 sm:$0xff]  }
 0x2bf   :  { %4902 = vmatpush1.bf16.msra.mxu1 %v6556_v50  ;;  %4739 = vmatprep.subr.bf16.mxu0 %v6561_v52  ;;  %v6606_v50 = vld [vmem:[#allocation7 + $0x62c] ss:$16 sps:$4 sm:$0xff]  }
 0x2c0   :  { %4903 = vmatprep.subr.bf16.mxu1 %v6564_v51 }
 0x2c2   :  { %4740 = vmatpush1.bf16.msra.mxu0 %v6559_v16 }
 0x2c3   :  { %4904 = vmatpush1.bf16.msra.mxu1 %v6562_v54  ;;  %4741 = vmatprep.subr.bf16.mxu0 %v6567_v55  ;;  %v6601_v54 = vld [vmem:[#allocation7 + $0x620] ss:$16 sps:$4 sm:$0xff]   ;;  %v6604_v55 = vld [vmem:[#allocation7 + $0x628] ss:$16 sps:$4 sm:$0xff]  }
 0x2c4   :  { %4905 = vmatprep.subr.bf16.mxu1 %v6570_v56  ;;  %v6609_v56 = vld [vmem:[#allocation7 + $0x644] ss:$16 sps:$4 sm:$0xff]  }
 0x2c6   :  { %4742 = vmatpush1.bf16.msra.mxu0 %v6565_v57  ;;  %v6612_v57 = vld [vmem:[#allocation7 + $0x64c] ss:$16 sps:$4 sm:$0xff]  }
 0x2c7   :  { %4906 = vmatpush1.bf16.msra.mxu1 %v6568_v58  ;;  %4743 = vmatprep.subr.bf16.mxu0 %v6573_v60  ;;  %v6607_v60 = vld [vmem:[#allocation7 + $0x640] ss:$16 sps:$4 sm:$0xff]  }
 0x2c8   :  { %4907 = vmatprep.subr.bf16.mxu1 %v6576_v61  ;;  %v6610_v61 = vld [vmem:[#allocation7 + $0x648] ss:$16 sps:$4 sm:$0xff]  }
 0x2ca   :  { %4744 = vmatpush1.bf16.msra.mxu0 %v6571_v0  ;;  %v6615_v0 = vld [vmem:[#allocation7 + $0x664] ss:$16 sps:$4 sm:$0xff]  }
 0x2cb   :  { %4908 = vmatpush1.bf16.msra.mxu1 %v6574_v1  ;;  %4745 = vmatprep.subr.bf16.mxu0 %v6579_v2  ;;  %v6613_v1 = vld [vmem:[#allocation7 + $0x660] ss:$16 sps:$4 sm:$0xff]   ;;  %v6616_v2 = vld [vmem:[#allocation7 + $0x668] ss:$16 sps:$4 sm:$0xff]  }
 0x2cc   :  { %4909 = vmatprep.subr.bf16.mxu1 %v6582_v3  ;;  %v6621_v3 = vld [vmem:[#allocation7 + $0x684] ss:$16 sps:$4 sm:$0xff]  }
 0x2ce   :  { %4746 = vmatpush1.bf16.msra.mxu0 %v6577_v4  ;;  %v6624_v4 = vld [vmem:[#allocation7 + $0x68c] ss:$16 sps:$4 sm:$0xff]  }
 0x2cf   :  { %4910 = vmatpush1.bf16.msra.mxu1 %v6580_v5  ;;  %4747 = vmatprep.subr.bf16.mxu0 %v6585_v6  ;;  %v6619_v5 = vld [vmem:[#allocation7 + $0x680] ss:$16 sps:$4 sm:$0xff]   ;;  %v6622_v6 = vld [vmem:[#allocation7 + $0x688] ss:$16 sps:$4 sm:$0xff]  }
 0x2d0   :  { %4911 = vmatprep.subr.bf16.mxu1 %v6588_v7  ;;  %v6627_v7 = vld [vmem:[#allocation7 + $0x6a4] ss:$16 sps:$4 sm:$0xff]  }
 0x2d2   :  { %4748 = vmatpush1.bf16.msra.mxu0 %v6583_v8  ;;  %v6630_v8 = vld [vmem:[#allocation7 + $0x6ac] ss:$16 sps:$4 sm:$0xff]  }
 0x2d3   :  { %4912 = vmatpush1.bf16.msra.mxu1 %v6586_v32  ;;  %4749 = vmatprep.subr.bf16.mxu0 %v6591_v10  ;;  %v6625_v32 = vld [vmem:[#allocation7 + $0x6a0] ss:$16 sps:$4 sm:$0xff]   ;;  %v6628_v10 = vld [vmem:[#allocation7 + $0x6a8] ss:$16 sps:$4 sm:$0xff]  }
 0x2d4   :  { %4913 = vmatprep.subr.bf16.mxu1 %v6594_v11  ;;  %v6633_v11 = vld [vmem:[#allocation7 + $0x6c4] ss:$16 sps:$4 sm:$0xff]  }
 0x2d6   :  { %4750 = vmatpush1.bf16.msra.mxu0 %v6589_v12  ;;  %v6636_v12 = vld [vmem:[#allocation7 + $0x6cc] ss:$16 sps:$4 sm:$0xff]  }
 0x2d7   :  { %4914 = vmatpush1.bf16.msra.mxu1 %v6592_v13  ;;  %4760 = vmatprep.subr.bf16.mxu0 %v6597_v14  ;;  %v6631_v13 = vld [vmem:[#allocation7 + $0x6c0] ss:$16 sps:$4 sm:$0xff]   ;;  %v6634_v14 = vld [vmem:[#allocation7 + $0x6c8] ss:$16 sps:$4 sm:$0xff]  }
 0x2d8   :  { %4924 = vmatprep.subr.bf16.mxu1 %v6600_v15  ;;  %v6639_v15 = vld [vmem:[#allocation7 + $0x6e4] ss:$16 sps:$4 sm:$0xff]  }
 0x2eb   :  { %v2887_v24 = vpop.f32.mrb[4].mxu0  ;;  %v3010_v27 = vpop.f32.mrb[4].mxu1 }
 0x2ec   :  { %v6223_v26 = vadd.f32 %v2887_v24, %v584_v20  ;;  %v2889_v28 = vpop.f32.mrb[5].mxu0  ;;  %v6225_v9 = vadd.f32 %v3010_v27, %v592_v21  ;;  %v3012_v30 = vpop.f32.mrb[5].mxu1  ;;  %v6648_v20 = vld [vmem:[#allocation7 + $0x70c] ss:$16 sps:$4 sm:$0xff]   ;;  %v6643_v21 = vld [vmem:[#allocation7 + $0x700] ss:$16 sps:$4 sm:$0xff]  }
 0x2ed   :  { %v6224_v29 = vadd.f32 %v2889_v28, %v588_v22  ;;  %v2891_v25 = vpop.f32.mrb[6].mxu0  ;;  %v6226_v31 = vadd.f32 %v3012_v30, %v596_v23  ;;  %v3014_v33 = vpop.f32.mrb[6].mxu1  ;;  %v6646_v22 = vld [vmem:[#allocation7 + $0x708] ss:$16 sps:$4 sm:$0xff]   ;;  %v6651_v23 = vld [vmem:[#allocation7 + $0x724] ss:$16 sps:$4 sm:$0xff]  }
 0x2ee   :  { %6739 = vtanh.f32 %v6223_v26  ;;  %v2892_v34 = vpop.f32.mrb[7].mxu0  ;;  %v3015_v62 = vpop.f32.mrb[7].mxu1  ;;  %v6654_v24 = vld [vmem:[#allocation7 + $0x72c] ss:$16 sps:$4 sm:$0xff]   ;;  %v6649_v26 = vld [vmem:[#allocation7 + $0x720] ss:$16 sps:$4 sm:$0xff]  }
 0x2ef   :  { %6741 = vtanh.f32 %v6225_v9  ;;  %v6652_v27 = vld [vmem:[#allocation7 + $0x728] ss:$16 sps:$4 sm:$0xff]   ;;  %v6657_v28 = vld [vmem:[#allocation7 + $0x744] ss:$16 sps:$4 sm:$0xff]   ;;  %v6660_v9 = vld [vmem:[#allocation7 + $0x74c] ss:$16 sps:$4 sm:$0xff]  }
 0x2f0   :  { %6743 = vtanh.f32 %v6224_v29  ;;  %v6655_v29 = vld [vmem:[#allocation7 + $0x740] ss:$16 sps:$4 sm:$0xff]   ;;  %v6658_v30 = vld [vmem:[#allocation7 + $0x748] ss:$16 sps:$4 sm:$0xff]   ;;  %v6663_v25 = vld [vmem:[#allocation7 + $0x764] ss:$16 sps:$4 sm:$0xff]  }
 0x2f1   :  { %6745 = vtanh.f32 %v6226_v31  ;;  %v6666_v31 = vld [vmem:[#allocation7 + $0x76c] ss:$16 sps:$4 sm:$0xff]   ;;  %v6661_v33 = vld [vmem:[#allocation7 + $0x760] ss:$16 sps:$4 sm:$0xff]   ;;  %v6664_v34 = vld [vmem:[#allocation7 + $0x768] ss:$16 sps:$4 sm:$0xff]  }
 0x2f2   :  { %v6669_v62 = vld [vmem:[#allocation7 + $0x784] ss:$16 sps:$4 sm:$0xff]  }
 0x2f8   :  { %v6740_v35 = vpop.eup %6739 }
 0x2f9   :  { %v7273_v63 = vpop.eup %6741  ;;  %v3075_v47 = vpack.c.bf16 %v6740_v35, %v6740_v35 }
 0x2fa   :  { %v6744_v39 = vpop.eup %6743 }
 0x2fb   :  { %v6746_v38 = vpop.eup %6745  ;;  %v3076_v36 = vpack.c.bf16 %v6744_v39, %v6744_v39  ;;  %v3050_v46 = vcombine.low %v6740_v35, %v6744_v39  ;;  %v6672_v35 = vld [vmem:[#allocation7 + $0x78c] ss:$16 sps:$4 sm:$0xff]   ;;  %v6667_v39 = vld [vmem:[#allocation7 + $0x780] ss:$16 sps:$4 sm:$0xff]  }
 0x2fc   :  { %v3051_v48 = vcombine.low %v7273_v63, %v6746_v38  ;;  %v3078_v51 = vpack.c.bf16 %v6746_v38, %v6746_v38  ;;  %v6670_v38 = vld [vmem:[#allocation7 + $0x788] ss:$16 sps:$4 sm:$0xff]  }
 0x2fd   :  { %4751 = vmatprep.mubr.bf16.mxu0 %v3076_v36  ;;  %4915 = vmatprep.mubr.bf16.mxu1 %v3076_v36  ;;  %v3058_v52 = vrot.slane %v3050_v46, %v7161_v53  ;;  %v6675_v36 = vld [vmem:[#allocation7 + $0x7a4] ss:$16 sps:$4 sm:$0xff]   ;;  %v6676_v46 = vld [vmem:[#allocation7 + $0x7a8] ss:$16 sps:$4 sm:$0xff]  }
 0x2fe   :  { %4752 = vmatmul.mubr.bf16.vlgmr.msra.gmra.mrb[8].mxu0 %v3075_v47  ;;  %4916 = vmatmul.mubr.bf16.vlgmr.msra.gmra.mrb[8].mxu1 %v3075_v47  ;;  %v3065_v16 = vrot.slane %v3051_v48, %v7161_v53  ;;  %v6618_v53 = vld [vmem:[#allocation7 + $0x66c] ss:$16 sps:$4 sm:$0xff]   ;;  %v6681_v47 = vld [vmem:[#allocation7 + $0x7c4] ss:$16 sps:$4 sm:$0xff]  }
 0x2ff   :  { %4761 = vmatpush1.bf16.msra.mxu0 %v6595_v43  ;;  %4925 = vmatpush1.bf16.msra.mxu1 %v6598_v45  ;;  %v6678_v43 = vld [vmem:[#allocation7 + $0x7ac] ss:$16 sps:$4 sm:$0xff]   ;;  %v6673_v45 = vld [vmem:[#allocation7 + $0x7a0] ss:$16 sps:$4 sm:$0xff]  }
 0x300   :  { %4792 = vmatprep.mubr.bf16.mxu0 %v3078_v51  ;;  %4956 = vmatprep.mubr.bf16.mxu1 %v3078_v51  ;;  %v3066_v58 = vcombine.low %v3058_v52, %v3065_v16  ;;  %v6684_v48 = vld [vmem:[#allocation7 + $0x7cc] ss:$16 sps:$4 sm:$0xff]   ;;  %v6687_v52 = vld [vmem:[#allocation7 + $0x7e4] ss:$16 sps:$4 sm:$0xff]   ;;  %v6685_v16 = vld [vmem:[#allocation7 + $0x7e0] ss:$16 sps:$4 sm:$0xff]  }
 0x301   :  { %4762 = vmatprep.subr.bf16.mxu0 %v6603_v49  ;;  %4926 = vmatprep.subr.bf16.mxu1 %v6606_v50  ;;  %v6679_v49 = vld [vmem:[#allocation7 + $0x7c0] ss:$16 sps:$4 sm:$0xff]   ;;  %v6682_v50 = vld [vmem:[#allocation7 + $0x7c8] ss:$16 sps:$4 sm:$0xff]   ;;  %v6690_v51 = vld [vmem:[#allocation7 + $0x7ec] ss:$16 sps:$4 sm:$0xff]  }
 0x302   :  { %3070 = vst [vmem:[#allocation16 + $0x8] sm:$0xff] %v3066_v58  ;;  %v6694_v58 = vld [vmem:[#allocation10 + $0x80] sm:$0xff]  }
 0x303   :  { %4763 = vmatpush1.bf16.msra.mxu0 %v6601_v54  ;;  %4927 = vmatpush1.bf16.msra.mxu1 %v6604_v55  ;;  %v6688_v54 = vld [vmem:[#allocation7 + $0x7e8] ss:$16 sps:$4 sm:$0xff]  }
 0x304   :  { %4764 = vmatprep.subr.bf16.mxu0 %v6609_v56  ;;  %4928 = vmatprep.subr.bf16.mxu1 %v6612_v57  ;;  %v6691_v55 = vld [vmem:[#allocation10 + $0x40] sm:$0xff]  }
 0x305   :  { %v6692_v56 = vld [vmem:[#allocation10 + $0xc0] sm:$0xff]  }
 0x306   :  { %v6693_v57 = vld [vmem:[#allocation10] sm:$0xff]  }
 0x307   :  { %4765 = vmatpush1.bf16.msra.mxu0 %v6607_v60  ;;  %4929 = vmatpush1.bf16.msra.mxu1 %v6610_v61  ;;  %v3077_v60 = vpack.c.bf16 %v7273_v63, %v7273_v63  ;;  %v6695_v61 = vld [vmem:[#allocation10 + $0x48] sm:$0xff]   ;;  %v6703_v63 = vld [vmem:[#allocation10 + $0x58] sm:$0xff]  }
 0x308   :  { %4766 = vmatprep.subr.bf16.mxu0 %v6615_v0  ;;  %4930 = vmatprep.subr.bf16.mxu1 %v6618_v53  ;;  %v6696_v0 = vld [vmem:[#allocation10 + $0xc8] sm:$0xff]  }
 0x309   :  { %v6697_v53 = vld [vmem:[#allocation10 + $0x8] sm:$0xff]  }
 0x30b   :  { %4767 = vmatpush1.bf16.msra.mxu0 %v6613_v1  ;;  %4931 = vmatpush1.bf16.msra.mxu1 %v6616_v2  ;;  %v6698_v1 = vld [vmem:[#allocation10 + $0x88] sm:$0xff]   ;;  %v6699_v2 = vld [vmem:[#allocation10 + $0x50] sm:$0xff]  }
 0x30c   :  { %4768 = vmatprep.subr.bf16.mxu0 %v6621_v3  ;;  %4932 = vmatprep.subr.bf16.mxu1 %v6624_v4  ;;  %v6700_v3 = vld [vmem:[#allocation10 + $0xd0] sm:$0xff]  }
 0x30d   :  { %v6701_v4 = vld [vmem:[#allocation10 + $0x10] sm:$0xff]  }
 0x30f   :  { %4769 = vmatpush1.bf16.msra.mxu0 %v6619_v5  ;;  %4933 = vmatpush1.bf16.msra.mxu1 %v6622_v6  ;;  %v6702_v5 = vld [vmem:[#allocation10 + $0x90] sm:$0xff]   ;;  %v6704_v6 = vld [vmem:[#allocation10 + $0xd8] sm:$0xff]  }
 0x310   :  { %4770 = vmatprep.subr.bf16.mxu0 %v6627_v7  ;;  %4934 = vmatprep.subr.bf16.mxu1 %v6630_v8  ;;  %v6705_v7 = vld [vmem:[#allocation10 + $0x18] sm:$0xff]  }
 0x311   :  { %v6706_v8 = vld [vmem:[#allocation10 + $0x98] sm:$0xff]  }
 0x313   :  { %4771 = vmatpush1.bf16.msra.mxu0 %v6625_v32  ;;  %4935 = vmatpush1.bf16.msra.mxu1 %v6628_v10  ;;  %v6707_v32 = vld [vmem:[#allocation10 + $0x60] sm:$0xff]  }
 0x314   :  { %4772 = vmatprep.subr.bf16.mxu0 %v6633_v11  ;;  %4936 = vmatprep.subr.bf16.mxu1 %v6636_v12  ;;  %v6708_v10 = vld [vmem:[#allocation10 + $0xe0] sm:$0xff]  }
 0x315   :  { %v6709_v11 = vld [vmem:[#allocation10 + $0x20] sm:$0xff]  }
 0x316   :  { %v6710_v12 = vld [vmem:[#allocation10 + $0xa0] sm:$0xff]  }
 0x317   :  { %4773 = vmatpush1.bf16.msra.mxu0 %v6631_v13  ;;  %4937 = vmatpush1.bf16.msra.mxu1 %v6634_v14  ;;  %v6711_v13 = vld [vmem:[#allocation10 + $0x68] sm:$0xff]  }
 0x318   :  { %4774 = vmatprep.subr.bf16.mxu0 %v6639_v15  ;;  %4938 = vmatprep.subr.bf16.mxu1 %v6642_v17  ;;  %v6712_v14 = vld [vmem:[#allocation10 + $0xe8] sm:$0xff]  }
 0x319   :  { %v6713_v15 = vld [vmem:[#allocation10 + $0x28] sm:$0xff]  }
 0x31a   :  { %v6714_v17 = vld [vmem:[#allocation10 + $0xa8] sm:$0xff]  }
 0x31b   :  { %4775 = vmatpush1.bf16.msra.mxu0 %v6637_v18  ;;  %4939 = vmatpush1.bf16.msra.mxu1 %v6640_v19  ;;  %v6715_v18 = vld [vmem:[#allocation10 + $0x70] sm:$0xff]  }
 0x31c   :  { %4776 = vmatprep.subr.bf16.mxu0 %v6645_v59  ;;  %4940 = vmatprep.subr.bf16.mxu1 %v6648_v20  ;;  %v6716_v19 = vld [vmem:[#allocation10 + $0xf0] sm:$0xff]  }
 0x31d   :  { %v6717_v59 = vld [vmem:[#allocation10 + $0x30] sm:$0xff]  }
 0x31e   :  { %v6718_v20 = vld [vmem:[#allocation10 + $0xb0] sm:$0xff]  }
 0x31f   :  { %4777 = vmatpush1.bf16.msra.mxu0 %v6643_v21  ;;  %4941 = vmatpush1.bf16.msra.mxu1 %v6646_v22  ;;  %v6719_v21 = vld [vmem:[#allocation10 + $0x78] sm:$0xff]  }
 0x320   :  { %4778 = vmatprep.subr.bf16.mxu0 %v6651_v23  ;;  %4942 = vmatprep.subr.bf16.mxu1 %v6654_v24  ;;  %v6720_v22 = vld [vmem:[#allocation10 + $0xf8] sm:$0xff]  }
 0x321   :  { %v6721_v23 = vld [vmem:[#allocation10 + $0x38] sm:$0xff]  }
 0x322   :  { %v6722_v24 = vld [vmem:[#allocation10 + $0xb8] sm:$0xff]  }
 0x323   :  { %4779 = vmatpush1.bf16.msra.mxu0 %v6649_v26  ;;  %4943 = vmatpush1.bf16.msra.mxu1 %v6652_v27  ;;  %v6996_v26 = vmov 0.0   ;;  %v3335_v27 = vld [vmem:[#allocation8] sm:$0xf] }
 0x324   :  { %4780 = vmatprep.subr.bf16.mxu0 %v6657_v28  ;;  %4944 = vmatprep.subr.bf16.mxu1 %v6660_v9  ;;  %v3340_v28 = vrot.slane %v3335_v27, %v567_v37  ;;  %v3348_v9 = vrot.slane %v3335_v27, %v575_v40 }
 0x327   :  { %4781 = vmatpush1.bf16.msra.mxu0 %v6655_v29  ;;  %4945 = vmatpush1.bf16.msra.mxu1 %v6658_v30  ;;  %v3344_v29 = vrot.slane %v3335_v27, %v571_v42  ;;  %v3352_v30 = vrot.slane %v3335_v27, %v579_v41 }
 0x328   :  { %4782 = vmatprep.subr.bf16.mxu0 %v6663_v25  ;;  %4946 = vmatprep.subr.bf16.mxu1 %v6666_v31 }
 0x32b   :  { %4783 = vmatpush1.bf16.msra.mxu0 %v6661_v33  ;;  %4947 = vmatpush1.bf16.msra.mxu1 %v6664_v34 }
 0x32c   :  { %4784 = vmatprep.subr.bf16.mxu0 %v6669_v62  ;;  %4948 = vmatprep.subr.bf16.mxu1 %v6672_v35 }
 0x32f   :  { %4785 = vmatpush1.bf16.msra.mxu0 %v6667_v39  ;;  %4949 = vmatpush1.bf16.msra.mxu1 %v6670_v38 }
 0x330   :  { %4786 = vmatprep.subr.bf16.mxu0 %v6675_v36  ;;  %4950 = vmatprep.subr.bf16.mxu1 %v6678_v43 }
 0x333   :  { %4787 = vmatpush1.bf16.msra.mxu0 %v6673_v45  ;;  %4951 = vmatpush1.bf16.msra.mxu1 %v6676_v46 }
 0x334   :  { %4788 = vmatprep.subr.bf16.mxu0 %v6681_v47  ;;  %4952 = vmatprep.subr.bf16.mxu1 %v6684_v48 }
 0x337   :  { %4789 = vmatpush1.bf16.msra.mxu0 %v6679_v49  ;;  %4953 = vmatpush1.bf16.msra.mxu1 %v6682_v50 }
 0x338   :  { %4790 = vmatprep.subr.bf16.mxu0 %v6687_v52  ;;  %4954 = vmatprep.subr.bf16.mxu1 %v6690_v51  ;;  %v6724_v52 = vld [vmem:[#allocation13 + $0x8] sm:$0xff]   ;;  %v6725_v51 = vld [vmem:[#allocation13 + $0x10] sm:$0xff]  }
 0x33b   :  { %4791 = vmatpush1.bf16.msra.mxu0 %v6685_v16  ;;  %4955 = vmatpush1.bf16.msra.mxu1 %v6688_v54  ;;  %v6726_v16 = vld [vmem:[#allocation13 + $0x18] sm:$0xff]   ;;  %v6727_v54 = vld [vmem:[#allocation13 + $0x20] sm:$0xff]  }
 0x33c   :  { %6146 = vmatprep.subr.bf16.mxu0 %v6691_v55  ;;  %6168 = vmatprep.subr.bf16.mxu1 %v6692_v56  ;;  %v6728_v55 = vld [vmem:[#allocation13 + $0x28] sm:$0xff]   ;;  %v6729_v56 = vld [vmem:[#allocation13 + $0x30] sm:$0xff]  }
 0x33e   :  { %4793 = vmatmul.mubr.bf16.vlgmr.msra.gmra.mrb[8].mxu0 %v3077_v60  ;;  %4957 = vmatmul.mubr.bf16.vlgmr.msra.gmra.mrb[8].mxu1 %v3077_v60 }
 0x33f   :  { %6147 = vmatpush3.bf16.msra.mxu0 %v6693_v57  ;;  %6169 = vmatpush3.bf16.msra.mxu1 %v6694_v58  ;;  %v6730_v57 = vld [vmem:[#allocation13 + $0x38] sm:$0xff]  }
 0x340   :  { %6148 = vmatprep.subr.bf16.mxu0 %v6695_v61  ;;  %6170 = vmatprep.subr.bf16.mxu1 %v6696_v0  ;;  %v6104_v61 = vld [vmem:[#allocation11] ss:$0 sm:$0xff] }
 0x343   :  { %6149 = vmatpush3.bf16.msra.mxu0 %v6697_v53  ;;  %6171 = vmatpush3.bf16.msra.mxu1 %v6698_v1 }
 0x344   :  { %6150 = vmatprep.subr.bf16.mxu0 %v6699_v2  ;;  %6172 = vmatprep.subr.bf16.mxu1 %v6700_v3 }
 0x347   :  { %6151 = vmatpush3.bf16.msra.mxu0 %v6701_v4  ;;  %6173 = vmatpush3.bf16.msra.mxu1 %v6702_v5 }
 0x348   :  { %6152 = vmatprep.subr.bf16.mxu0 %v6703_v63  ;;  %6174 = vmatprep.subr.bf16.mxu1 %v6704_v6 }
 0x34b   :  { %6153 = vmatpush3.bf16.msra.mxu0 %v6705_v7  ;;  %6175 = vmatpush3.bf16.msra.mxu1 %v6706_v8 }
 0x34c   :  { %6154 = vmatprep.subr.bf16.mxu0 %v6707_v32  ;;  %6176 = vmatprep.subr.bf16.mxu1 %v6708_v10 }
 0x34f   :  { %6155 = vmatpush3.bf16.msra.mxu0 %v6709_v11  ;;  %6177 = vmatpush3.bf16.msra.mxu1 %v6710_v12 }
 0x350   :  { %6156 = vmatprep.subr.bf16.mxu0 %v6711_v13  ;;  %6178 = vmatprep.subr.bf16.mxu1 %v6712_v14 }
 0x353   :  { %6157 = vmatpush3.bf16.msra.mxu0 %v6713_v15  ;;  %6179 = vmatpush3.bf16.msra.mxu1 %v6714_v17 }
 0x354   :  { %6158 = vmatprep.subr.bf16.mxu0 %v6715_v18  ;;  %6180 = vmatprep.subr.bf16.mxu1 %v6716_v19 }
 0x357   :  { %6159 = vmatpush3.bf16.msra.mxu0 %v6717_v59  ;;  %6181 = vmatpush3.bf16.msra.mxu1 %v6718_v20 }
 0x358   :  { %6160 = vmatprep.subr.bf16.mxu0 %v6719_v21  ;;  %6182 = vmatprep.subr.bf16.mxu1 %v6720_v22 }
 0x35b   :  { %6161 = vmatpush3.bf16.msra.mxu0 %v6721_v23  ;;  %6183 = vmatpush3.bf16.msra.mxu1 %v6722_v24 }
 0x35c   :  { %6199 = vmatprep.subr.bf16.mxu0 %v6996_v26 }
 0x411   :  { %v4794_v25 = vpop.f32.mrb[8].mxu0  ;;  %v4958_v31 = vpop.f32.mrb[8].mxu1 }
 0x412   :  { %v6227_v33 = vadd.f32 %v4794_v25, %v3340_v28  ;;  %v6229_v34 = vadd.f32 %v4958_v31, %v3348_v9  ;;  %v4796_v62 = vpop.f32.mrb[9].mxu0  ;;  %v4960_v35 = vpop.f32.mrb[9].mxu1 }
 0x413   :  { %v6228_v39 = vadd.f32 %v4796_v62, %v3344_v29  ;;  %v6230_v38 = vadd.f32 %v4960_v35, %v3352_v30  ;;  %v4798_v36 = vpop.f32.mrb[10].mxu0  ;;  %v4962_v43 = vpop.f32.mrb[10].mxu1 }
 0x414   :  { %v4965_v37 = vmax.f32 %v6227_v33, 0.0  ;;  %v4967_v45 = vmax.f32 %v6229_v34, 0.0  ;;  %v4799_v46 = vpop.f32.mrb[11].mxu0  ;;  %v4963_v40 = vpop.f32.mrb[11].mxu1 }
 0x415   :  { %v4966_v47 = vmax.f32 %v6228_v39, 0.0  ;;  %v4968_v48 = vmax.f32 %v6230_v38, 0.0 }
 0x416   :  { %v4969_v41 = vpack.c.bf16 %v4965_v37, %v4965_v37  ;;  %v4971_v50 = vpack.c.bf16 %v4967_v45, %v4967_v45 }
 0x417   :  { %v4970_v42 = vpack.c.bf16 %v4966_v47, %v4966_v47  ;;  %v4972_v49 = vpack.c.bf16 %v4968_v48, %v4968_v48 }
 0x419   :  { %5268 = vmatprep.mubr.bf16.mxu0 %v4970_v42  ;;  %5308 = vmatprep.mubr.bf16.mxu1 %v4972_v49 }
 0x41a   :  { %5269 = vmatmul.mubr.bf16.vlgmr.msra.gmra.mrb[12].mxu0 %v4969_v41  ;;  %5309 = vmatmul.mubr.bf16.vlgmr.msra.gmra.mrb[12].mxu1 %v4971_v50 }
 0x41b   :  { %6200 = vmatpush3.bf16.msra.mxu0 %v6723_v44  ;;  %6215 = vmatprep.mubr.msk.bf16.mxu0 %vm6997_vm0, %v6996_v26 }
 0x41c   :  { %6201 = vmatprep.subr.bf16.mxu0 %v6996_v26 }
 0x41f   :  { %6202 = vmatpush3.bf16.msra.mxu0 %v6724_v52 }
 0x420   :  { %6203 = vmatprep.subr.bf16.mxu0 %v6996_v26 }
 0x423   :  { %6204 = vmatpush3.bf16.msra.mxu0 %v6725_v51 }
 0x424   :  { %6205 = vmatprep.subr.bf16.mxu0 %v6996_v26 }
 0x427   :  { %6206 = vmatpush3.bf16.msra.mxu0 %v6726_v16 }
 0x428   :  { %6207 = vmatprep.subr.bf16.mxu0 %v6996_v26 }
 0x42b   :  { %6208 = vmatpush3.bf16.msra.mxu0 %v6727_v54 }
 0x42c   :  { %6209 = vmatprep.subr.bf16.mxu0 %v6996_v26 }
 0x42f   :  { %6210 = vmatpush3.bf16.msra.mxu0 %v6728_v55 }
 0x430   :  { %6211 = vmatprep.subr.bf16.mxu0 %v6996_v26 }
 0x433   :  { %6212 = vmatpush3.bf16.msra.mxu0 %v6729_v56 }
 0x434   :  { %6213 = vmatprep.subr.bf16.mxu0 %v6996_v26 }
 0x437   :  { %6214 = vmatpush3.bf16.msra.mxu0 %v6730_v57 }
 0x4ed   :  { %v6162_v58 = vpop.f32.mrb[12].mxu0  ;;  %v6184_v60 = vpop.f32.mrb[12].mxu1 }
 0x4ee   :  { %v6163_v0 = vpop.f32.mrb[13].mxu0  ;;  %v6185_v53 = vpop.f32.mrb[13].mxu1 }
 0x4ef   :  { %v6164_v1 = vadd.f32 %v6163_v0, %v6162_v58  ;;  %v6186_v2 = vadd.f32 %v6185_v53, %v6184_v60  ;;  %v6165_v3 = vpop.f32.mrb[14].mxu0  ;;  %v6187_v4 = vpop.f32.mrb[14].mxu1 }
 0x4f0   :  { %v6166_v5 = vpop.f32.mrb[15].mxu0  ;;  %v6188_v63 = vpop.f32.mrb[15].mxu1 }
 0x4f1   :  { %v5271_v6 = vadd.f32 %v6164_v1, %v6104_v61 }
 0x4f3   :  { %v5311_v7 = vadd.f32 %v6186_v2, %v5271_v6 }
 0x4f5   :  { %v5316_v8 = vmax.f32 %v5311_v7, 0.0 }
 0x4f7   :  { %v5317_v32 = vpack.c.bf16 %v5316_v8, %v5316_v8 }
 0x4f9   :  { %6216 = vmatmul.mubr.bf16.vlgmr.msra.gmra.mrb[16].mxu0 %v5317_v32 }
 0x4fa   :  { %6934 = shalt.err (!%p6931_p12)
}
 0x4fb   :  { %s6935_s28 = scalar_lea.hbm %s7321_s9, 256 }
 0x4fc   :  { %p6936_p13 = scmp.ne.s32.totalorder %s7321_s9, %s6935_s28  ;;  %p6939_p0 = scmp.lt.u32.totalorder %s6935_s28, %s7321_s9 }
 0x4fe   :  { %p6941_p1 = pnand %p6939_p0, %p6936_p13 }
 0x500   :  { %6944 = shalt.err (!%p6941_p1)
}
 0x501   :  { %5439 = dma.vmem_to_hbm [thread:$0]  %s5437_s26, 256, %s7321_s9, [#allocation4]   ;;  %v6137_v10 = vld [vmem:[#allocation14] ss:$0 sm:$0xff] }
 0x502   :  { %s6999_s12 = smov [#allocation17]  }
 0x503   :  { %s5446_s13 = sshll.u32 %s6999_s12, 4  ;;  %s5447_s13 = int_to_ptr.vmem [resolvable:$true] %s5446_s13 }
 0x504   :  { %s6945_s15 = scalar_lea.vmem %s5447_s13, 32  ;;  %p6950_p3 = scmp.lt.s32.totalorder %s5447_s13, %s5447_s13 }
 0x505   :  { %p6946_p2 = scmp.ne.s32.totalorder %s5447_s13, %s6945_s15  ;;  %p6951_p4 = scmp.lt.s32.totalorder %s6945_s15, %s6945_s15 }
 0x507   :  { %p6952_p5 = por %p6951_p4, %p6950_p3 }
 0x509   :  { %p6953_p6 = pnand %p6952_p5, %p6946_p2 }
 0x5cc   :  { %v5423_v11 = vpop.f32.mrb[16].mxu0 }
 0x5cd   :  { %v5424_v12 = vadd.f32 %v6137_v10, %v5423_v11  ;;  %v6217_v13 = vpop.f32.mrb[17].mxu0 }
 0x5ce   :  { %v5426_v14 = vpop.f32.mrb[18].mxu0 }
 0x5cf   :  { %5429 = vst [vmem:[#allocation17] sm:$0x3] %v5424_v12  ;;  %v6218_v15 = vpop.f32.mrb[19].mxu0 }
 0x5d0   :  { %6956 = shalt.err (!%p6953_p6)
}
 0x5d1   :  { %s6957_s9 = scalar_lea.hbm %s7322_s10, 32 }
 0x5d2   :  { %p6958_p7 = scmp.ne.s32.totalorder %s7322_s10, %s6957_s9  ;;  %p6961_p8 = scmp.lt.u32.totalorder %s6957_s9, %s7322_s10 }
 0x5d4   :  { %p6963_p9 = pnand %p6961_p8, %p6958_p7 }
 0x5d6   :  { %6966 = shalt.err (!%p6963_p9)
}
 0x5d7   :  { %5449 = dma.vmem_to_hbm [thread:$0]  %s5447_s13, 32, %s7322_s10, [#allocation18]  }
 0x5d8   :  { %6977 = dma.done.wait [#allocation4], 256  }
 0x5d9   :  { %6978 = vsyncadd [#allocation4], 4294967040 }
 0x5da   :  { %6979 = dma.done.wait [#allocation18], 32  }
 0x5db   :  { %6980 = vsyncadd [#allocation18], 4294967264 }
 0x5dc   :  { %5456 = vsyncpa [#allocation3], 1 }
 0x5dd   :  { %5457 = vsyncpa [#allocation6], 1 }
 0x5de   :  { %5458 = vsyncpa [#allocation9], 1 }
 0x5df   :  { %5459 = vsyncpa [#allocation12], 1 }
 0x5e0   :  { %5460 = vsyncpa [#allocation15], 1 }
 0x5e1   :  { %5461 = vsyncpa [#allocation4], 1 }
 0x5e2   :  { %5462 = vsyncpa [#allocation18], 1 }

</bundles_post_ra>
